<compile_context>
chip_gen: v5e
topology: v5e:2x2
jax: 0.10.0
libtpu: 0.0.40
codegen_flags: <defaults>
</compile_context>

<pallas_src>
import functools

import jax
import jax.numpy as jnp
from jax import lax
from jax.experimental import pallas as pl
from jax.experimental.pallas import tpu as pltpu


def _p2pc_kernel(xlo_ref, xhi_ref, w3_ref, w1_ref, shift_ref, b1_ref, o_ref,
                 xm_ref, acc_ref, *, TH, Wk, C):
    """One (batch, row-strip): conv3x3 -> BN-shift -> ReLU -> conv1x1(+bias).

    xlo_ref  : (1, TH, Wk+2, C)  padded rows [s*TH, s*TH+TH)           (bf16)
    xhi_ref  : (1, 2,  Wk+2, C)  padded rows [s*TH+TH, s*TH+TH+2) halo (bf16)
    w3_ref   : (3, 3C, C)        3x3 taps, dx merged into K, BN scale folded
    w1_ref   : (C, C)            1x1 conv weight                       (bf16)
    shift_ref: (1, C)            beta - running_mean * scale           (f32)
    b1_ref   : (1, C)            1x1 conv bias                         (f32)
    o_ref    : (1, TH, Wk, C)    output strip
    xm_ref   : (TH+2, Wk, 3C)    dx-merged input scratch               (bf16)
    acc_ref  : (TH*Wk, C)        f32 accumulator scratch
    """
    # Build the dx-merged LHS in VMEM: xm[r, w, dx*C:(dx+1)*C] = x_pad[r, w+dx, :]
    # (static sublane-shifted reads; lane-aligned stores since C % 128 == 0).
    for dx in range(3):
        lanes = slice(dx * C, (dx + 1) * C)
        xm_ref[0:TH, :, lanes] = xlo_ref[0, :, dx:dx + Wk, :]
        xm_ref[TH:TH + 2, :, lanes] = xhi_ref[0, :, dx:dx + Wk, :]

    # 3x3 conv as three K=3C MXU matmuls (one per dy).  The dy slice is along
    # the untiled outer axis and the reshape is a pure sublane merge (Wk % 8).
    for dy in range(3):
        lhs = xm_ref[dy:dy + TH, :, :].reshape(TH * Wk, 3 * C)
        contrib = jnp.dot(lhs, w3_ref[dy], preferred_element_type=jnp.float32)
        if dy == 0:
            acc_ref[...] = contrib
        else:
            acc_ref[...] += contrib

    # BN (scale pre-folded into w3) + ReLU, then 1x1 conv (+ bias) on the MXU.
    y = jnp.maximum(acc_ref[...] + shift_ref[...], 0.0).astype(w1_ref.dtype)
    z = jnp.dot(y, w1_ref[...], preferred_element_type=jnp.float32) + b1_ref[...]
    o_ref[...] = z.reshape(1, TH, Wk, C).astype(o_ref.dtype)


def _pick_strip_rows(H, Wk, target_m=512, max_th=64):
    """Even TH with TH*Wk >= 256 (fills the 256-wide MXU), near target_m,
    minimal H padding."""
    best_th, best_score = 2, None
    for th in range(2, max_th + 1, 2):
        m = th * Wk
        pad = (-H) % th
        score = (m < 256, m > 4096, pad, abs(m - target_m))
        if best_score is None or score < best_score:
            best_th, best_score = th, score
    return best_th


def p2pc_forward(x, w3_hwio, w1, bn_gamma, bn_beta, bn_mean, bn_var, b1,
                 eps=1e-5, compute_dtype=jnp.bfloat16, out_dtype=None,
                 channels_last_in=False, channels_last_out=False):
    """P2PC.forward (default config) applied to img_feats[0]."""
    if channels_last_in:
        B, H, W, C = x.shape
        x_nhwc = x
    else:
        B, C, H, W = x.shape
        x_nhwc = jnp.transpose(x, (0, 2, 3, 1))       # channels onto lanes
    out_dtype = x.dtype if out_dtype is None else out_dtype
    assert C % 128 == 0, "channel count must be a multiple of 128 (lane-dense)"

    Wk = -(-W // 8) * 8                    # enforce W % 8 == 0 (pad if needed)
    TH = _pick_strip_rows(H, Wk)
    Hk = -(-H // TH) * TH                  # pad H to a multiple of TH
    n_strips = Hk // TH
    Wp = Wk + 2

    # Zero-pad: 1 halo row/col on top/left; 1 halo + alignment pad bottom/right.
    x_pad = jnp.pad(x_nhwc.astype(compute_dtype),
                    ((0, 0), (1, 1 + Hk - H), (1, 1 + Wk - W), (0, 0)))

    # Fold eval-mode BN into per-output-channel scale (into w3) + additive shift.
    scale = (bn_gamma.astype(jnp.float32) /
             jnp.sqrt(bn_var.astype(jnp.float32) + eps))
    shift = (bn_beta.astype(jnp.float32)
             - bn_mean.astype(jnp.float32) * scale).reshape(1, C)
    w3m = (w3_hwio.astype(jnp.float32) * scale[None, None, None, :]
           ).reshape(3, 3 * C, C).astype(compute_dtype)   # (dy, dx*Cin, Cout)
    w1c = w1.astype(compute_dtype)
    b1r = b1.reshape(1, C).astype(jnp.float32)

    kernel = functools.partial(_p2pc_kernel, TH=TH, Wk=Wk, C=C)
    half = TH // 2   # 2-row halo block index = element offset (s+1)*TH / 2

    # VMEM budget from actual block / scratch sizes (double-buffered streams),
    # capped at 48 MiB to leave compiler headroom on v7x's 64 MiB per-TC VMEM.
    esz = jnp.dtype(compute_dtype).itemsize
    osz = jnp.dtype(out_dtype).itemsize
    stream = (TH * Wp * C + 2 * Wp * C) * esz + TH * Wk * C * osz
    weights = (9 * C * C + C * C) * esz + 4 * C * 4
    scratch = (TH + 2) * Wk * 3 * C * esz + TH * Wk * C * 4
    vmem_limit = int(min(max(2 * (stream + weights) + scratch + (8 << 20),
                             24 << 20), 48 << 20))

    out_nhwc = pl.pallas_call(
        kernel,
        out_shape=jax.ShapeDtypeStruct((B, Hk, Wk, C), out_dtype),
        grid=(B, n_strips),
        in_specs=[
            # TH-row strip of the padded image (blocked along H).
            pl.BlockSpec((1, TH, Wp, C), lambda b, s: (b, s, 0, 0)),
            # 2-row halo taken from the start of the next strip (same array,
            # blocked along H in 2-row blocks -> element offset (s+1)*TH).
            pl.BlockSpec((1, 2, Wp, C), lambda b, s: (b, (s + 1) * half, 0, 0)),
            pl.BlockSpec((3, 3 * C, C), lambda b, s: (0, 0, 0)),
            pl.BlockSpec((C, C), lambda b, s: (0, 0)),
            pl.BlockSpec((1, C), lambda b, s: (0, 0)),
            pl.BlockSpec((1, C), lambda b, s: (0, 0)),
        ],
        out_specs=pl.BlockSpec((1, TH, Wk, C), lambda b, s: (b, s, 0, 0)),
        scratch_shapes=[
            pltpu.VMEM((TH + 2, Wk, 3 * C), compute_dtype),   # dx-merged LHS
            pltpu.VMEM((TH * Wk, C), jnp.float32),            # f32 accumulator
        ],
        compiler_params=pltpu.CompilerParams(
            dimension_semantics=("parallel", "parallel"),
            vmem_limit_bytes=vmem_limit),
    )(x_pad, x_pad, w3m, w1c, shift, b1r)

    if Hk != H or Wk != W:
        out_nhwc = out_nhwc[:, :H, :W, :]
    if channels_last_out:
        return out_nhwc
    return jnp.transpose(out_nhwc, (0, 3, 1, 2))     # back to PyTorch NCHW


def _reference(x_nchw, w3_hwio, w1, bn_gamma, bn_beta, bn_mean, bn_var, b1,
               eps=1e-5):
    """Pure-JAX f32 reference (same math path as the PyTorch module, eval BN)."""
    x_nhwc = jnp.transpose(x_nchw, (0, 2, 3, 1)).astype(jnp.float32)
    y = lax.conv_general_dilated(
        x_nhwc, w3_hwio, window_strides=(1, 1), padding="SAME",
        dimension_numbers=("NHWC", "HWIO", "NHWC"))
    scale = bn_gamma / jnp.sqrt(bn_var + eps)
    shift = bn_beta - bn_mean * scale
    y = jnp.maximum(y * scale + shift, 0.0)
    z = jnp.einsum("bhwc,cd->bhwd", y, w1) + b1
    return jnp.transpose(z, (0, 3, 1, 2))


if __name__ == "__main__":
    # Small synthetic config (module default out_channel=256 scaled down to 128
    # so the channel dim is lane-dense and MXU-native while staying small).
    B, C, H, W = 2, 128, 16, 16

    key = jax.random.PRNGKey(0)
    ks = jax.random.split(key, 8)

    # img_feats[0] : NCHW, channel count == out_channel of project_layers.
    x = jax.random.normal(ks[0], (B, C, H, W), dtype=jnp.float32)

    # project_layers params:
    #   Conv2d(C, C, 3, 1, 1, bias=False)  -> weight HWIO (3,3,Cin,Cout)
    #   BatchNorm2d(C)                     -> gamma, beta, running_mean/var
    #   Conv2d(C, C, 1)                    -> weight (Cin,Cout), bias (C,)
    w3 = jax.random.normal(ks[1], (3, 3, C, C), dtype=jnp.float32) * 0.05
    bn_gamma = 1.0 + 0.1 * jax.random.normal(ks[2], (C,), dtype=jnp.float32)
    bn_beta = 0.1 * jax.random.normal(ks[3], (C,), dtype=jnp.float32)
    bn_mean = 0.05 * jax.random.normal(ks[4], (C,), dtype=jnp.float32)
    bn_var = jnp.abs(1.0 + 0.1 * jax.random.normal(ks[5], (C,), dtype=jnp.float32))
    w1 = jax.random.normal(ks[6], (C, C), dtype=jnp.float32) * 0.05
    b1 = 0.1 * jax.random.normal(ks[7], (C,), dtype=jnp.float32)

    fwd = jax.jit(p2pc_forward)
    out = fwd(x, w3, w1, bn_gamma, bn_beta, bn_mean, bn_var, b1)
    out = jax.block_until_ready(out)

    ref = _reference(x, w3, w1, bn_gamma, bn_beta, bn_mean, bn_var, b1)
    assert out.shape == (B, C, H, W)
    # bf16 MXU matmuls (f32 accumulation) -> scale-relative tolerance.
    err = float(jnp.max(jnp.abs(out.astype(jnp.float32) - ref)))
    mag = float(jnp.max(jnp.abs(ref))) + 1e-6
    assert err <= 3e-2 * mag + 2e-2, f"mismatch vs reference: err={err}, max={mag}"

    # TODO(synk): fuse_pt_feat / add_sine3d_pos / use_fuse_img_feat /
    # mask_preprocess branches and get_loss are disabled by the default config
    # and not implemented here.
    print("KERNEL_OK")
</pallas_src>

<mosaic_0001>
module attributes {stable_mosaic.version = 11 : i64} {
  func.func @_p2pc_kernel(%arg0: i32, %arg1: i32, %arg2: memref<1x16x18x128xbf16, #tpu.memory_space<vmem>>, %arg3: memref<1x2x18x128xbf16, #tpu.memory_space<vmem>>, %arg4: memref<3x384x128xbf16, #tpu.memory_space<vmem>>, %arg5: memref<128x128xbf16, #tpu.memory_space<vmem>>, %arg6: memref<1x128xf32, #tpu.memory_space<vmem>>, %arg7: memref<1x128xf32, #tpu.memory_space<vmem>>, %arg8: memref<1x16x16x128xf32, #tpu.memory_space<vmem>>, %arg9: memref<18x16x384xbf16, #tpu.memory_space<vmem>>, %arg10: memref<256x128xf32, #tpu.memory_space<vmem>>) attributes {dimension_semantics = [#tpu.dimension_semantics<parallel>, #tpu.dimension_semantics<parallel>], iteration_bounds = array<i64: 2, 1>, scalar_prefetch = 0 : i64, scratch_operands = 2 : i64, tpu.core_type = #tpu.core_type<tc>, window_params = [{transform_indices = @transform_0, window_bounds = array<i64: 1, 16, 18, 128>}, {transform_indices = @transform_1, window_bounds = array<i64: 1, 2, 18, 128>}, {pipeline_mode = #tpu.pipeline_mode<synchronous>, transform_indices = @transform_2, window_bounds = array<i64: 3, 384, 128>}, {pipeline_mode = #tpu.pipeline_mode<synchronous>, transform_indices = @transform_3, window_bounds = array<i64: 128, 128>}, {pipeline_mode = #tpu.pipeline_mode<synchronous>, transform_indices = @transform_4, window_bounds = array<i64: 1, 128>}, {pipeline_mode = #tpu.pipeline_mode<synchronous>, transform_indices = @transform_5, window_bounds = array<i64: 1, 128>}, {transform_indices = @transform_6, window_bounds = array<i64: 1, 16, 16, 128>}]} {
    %c0 = arith.constant 0 : index
    %c0_0 = arith.constant 0 : index
    %c0_1 = arith.constant 0 : index
    %c0_2 = arith.constant 0 : index
    %0 = vector.load %arg2[%c0, %c0_0, %c0_1, %c0_2] : memref<1x16x18x128xbf16, #tpu.memory_space<vmem>>, vector<1x16x16x128xbf16>
    %1 = vector.shape_cast %0 : vector<1x16x16x128xbf16> to vector<16x16x128xbf16>
    %c0_3 = arith.constant 0 : index
    %c0_4 = arith.constant 0 : index
    %c0_5 = arith.constant 0 : index
    %2 = vector.load %arg9[%c0_3, %c0_4, %c0_5] : memref<18x16x384xbf16, #tpu.memory_space<vmem>>, vector<16x16x128xbf16>
    tpu.vector_store %arg9[%c0_3, %c0_4, %c0_5], %1 {strides = array<i32>} : memref<18x16x384xbf16, #tpu.memory_space<vmem>>, vector<16x16x128xbf16>,
    %c0_6 = arith.constant 0 : index
    %c0_7 = arith.constant 0 : index
    %c0_8 = arith.constant 0 : index
    %c0_9 = arith.constant 0 : index
    %3 = vector.load %arg3[%c0_6, %c0_7, %c0_8, %c0_9] : memref<1x2x18x128xbf16, #tpu.memory_space<vmem>>, vector<1x2x16x128xbf16>
    %4 = vector.shape_cast %3 : vector<1x2x16x128xbf16> to vector<2x16x128xbf16>
    %c16 = arith.constant 16 : index
    %c0_10 = arith.constant 0 : index
    %c0_11 = arith.constant 0 : index
    %5 = vector.load %arg9[%c16, %c0_10, %c0_11] : memref<18x16x384xbf16, #tpu.memory_space<vmem>>, vector<2x16x128xbf16>
    tpu.vector_store %arg9[%c16, %c0_10, %c0_11], %4 {strides = array<i32>} : memref<18x16x384xbf16, #tpu.memory_space<vmem>>, vector<2x16x128xbf16>,
    %c0_12 = arith.constant 0 : index
    %c0_13 = arith.constant 0 : index
    %c1 = arith.constant 1 : index
    %c0_14 = arith.constant 0 : index
    %6 = vector.load %arg2[%c0_12, %c0_13, %c1, %c0_14] : memref<1x16x18x128xbf16, #tpu.memory_space<vmem>>, vector<1x16x16x128xbf16>
    %7 = vector.shape_cast %6 : vector<1x16x16x128xbf16> to vector<16x16x128xbf16>
    %c0_15 = arith.constant 0 : index
    %c0_16 = arith.constant 0 : index
    %c128 = arith.constant 128 : index
    %8 = vector.load %arg9[%c0_15, %c0_16, %c128] : memref<18x16x384xbf16, #tpu.memory_space<vmem>>, vector<16x16x128xbf16>
    tpu.vector_store %arg9[%c0_15, %c0_16, %c128], %7 {strides = array<i32>} : memref<18x16x384xbf16, #tpu.memory_space<vmem>>, vector<16x16x128xbf16>,
    %c0_17 = arith.constant 0 : index
    %c0_18 = arith.constant 0 : index
    %c1_19 = arith.constant 1 : index
    %c0_20 = arith.constant 0 : index
    %9 = vector.load %arg3[%c0_17, %c0_18, %c1_19, %c0_20] : memref<1x2x18x128xbf16, #tpu.memory_space<vmem>>, vector<1x2x16x128xbf16>
    %10 = vector.shape_cast %9 : vector<1x2x16x128xbf16> to vector<2x16x128xbf16>
    %c16_21 = arith.constant 16 : index
    %c0_22 = arith.constant 0 : index
    %c128_23 = arith.constant 128 : index
    %11 = vector.load %arg9[%c16_21, %c0_22, %c128_23] : memref<18x16x384xbf16, #tpu.memory_space<vmem>>, vector<2x16x128xbf16>
    tpu.vector_store %arg9[%c16_21, %c0_22, %c128_23], %10 {strides = array<i32>} : memref<18x16x384xbf16, #tpu.memory_space<vmem>>, vector<2x16x128xbf16>,
    %c0_24 = arith.constant 0 : index
    %c0_25 = arith.constant 0 : index
    %c2 = arith.constant 2 : index
    %c0_26 = arith.constant 0 : index
    %12 = vector.load %arg2[%c0_24, %c0_25, %c2, %c0_26] : memref<1x16x18x128xbf16, #tpu.memory_space<vmem>>, vector<1x16x16x128xbf16>
    %13 = vector.shape_cast %12 : vector<1x16x16x128xbf16> to vector<16x16x128xbf16>
    %c0_27 = arith.constant 0 : index
    %c0_28 = arith.constant 0 : index
    %c256 = arith.constant 256 : index
    %14 = vector.load %arg9[%c0_27, %c0_28, %c256] : memref<18x16x384xbf16, #tpu.memory_space<vmem>>, vector<16x16x128xbf16>
    tpu.vector_store %arg9[%c0_27, %c0_28, %c256], %13 {strides = array<i32>} : memref<18x16x384xbf16, #tpu.memory_space<vmem>>, vector<16x16x128xbf16>,
    %c0_29 = arith.constant 0 : index
    %c0_30 = arith.constant 0 : index
    %c2_31 = arith.constant 2 : index
    %c0_32 = arith.constant 0 : index
    %15 = vector.load %arg3[%c0_29, %c0_30, %c2_31, %c0_32] : memref<1x2x18x128xbf16, #tpu.memory_space<vmem>>, vector<1x2x16x128xbf16>
    %16 = vector.shape_cast %15 : vector<1x2x16x128xbf16> to vector<2x16x128xbf16>
    %c16_33 = arith.constant 16 : index
    %c0_34 = arith.constant 0 : index
    %c256_35 = arith.constant 256 : index
    %17 = vector.load %arg9[%c16_33, %c0_34, %c256_35] : memref<18x16x384xbf16, #tpu.memory_space<vmem>>, vector<2x16x128xbf16>
    tpu.vector_store %arg9[%c16_33, %c0_34, %c256_35], %16 {strides = array<i32>} : memref<18x16x384xbf16, #tpu.memory_space<vmem>>, vector<2x16x128xbf16>,
    %c0_36 = arith.constant 0 : index
    %c0_37 = arith.constant 0 : index
    %c0_38 = arith.constant 0 : index
    %18 = vector.load %arg9[%c0_36, %c0_37, %c0_38] : memref<18x16x384xbf16, #tpu.memory_space<vmem>>, vector<16x16x384xbf16>
    %19 = vector.shape_cast %18 : vector<16x16x384xbf16> to vector<256x384xbf16>
    %c0_39 = arith.constant 0 : index
    %c0_40 = arith.constant 0 : index
    %c0_41 = arith.constant 0 : index
    %20 = vector.load %arg4[%c0_39, %c0_40, %c0_41] : memref<3x384x128xbf16, #tpu.memory_space<vmem>>, vector<1x384x128xbf16>
    %21 = vector.shape_cast %20 : vector<1x384x128xbf16> to vector<384x128xbf16>
    %cst = arith.constant dense<0.000000e+00> : vector<256x128xf32>
    %22 = tpu.matmul %19, %21, %cst {dimension_numbers = #tpu.dot_dimension_numbers<[1], [0], [0], [1], [0, 0, 1, 1], [], []>} : vector<256x384xbf16>, vector<384x128xbf16>, vector<256x128xf32> -> vector<256x128xf32>
    %c0_42 = arith.constant 0 : index
    %c0_43 = arith.constant 0 : index
    %23 = vector.load %arg10[%c0_42, %c0_43] : memref<256x128xf32, #tpu.memory_space<vmem>>, vector<256x128xf32>
    tpu.vector_store %arg10[%c0_42, %c0_43], %22 {strides = array<i32>} : memref<256x128xf32, #tpu.memory_space<vmem>>, vector<256x128xf32>,
    %c1_44 = arith.constant 1 : index
    %c0_45 = arith.constant 0 : index
    %c0_46 = arith.constant 0 : index
    %24 = vector.load %arg9[%c1_44, %c0_45, %c0_46] : memref<18x16x384xbf16, #tpu.memory_space<vmem>>, vector<16x16x384xbf16>
    %25 = vector.shape_cast %24 : vector<16x16x384xbf16> to vector<256x384xbf16>
    %c1_47 = arith.constant 1 : index
    %c0_48 = arith.constant 0 : index
    %c0_49 = arith.constant 0 : index
    %26 = vector.load %arg4[%c1_47, %c0_48, %c0_49] : memref<3x384x128xbf16, #tpu.memory_space<vmem>>, vector<1x384x128xbf16>
    %27 = vector.shape_cast %26 : vector<1x384x128xbf16> to vector<384x128xbf16>
    %cst_50 = arith.constant dense<0.000000e+00> : vector<256x128xf32>
    %28 = tpu.matmul %25, %27, %cst_50 {dimension_numbers = #tpu.dot_dimension_numbers<[1], [0], [0], [1], [0, 0, 1, 1], [], []>} : vector<256x384xbf16>, vector<384x128xbf16>, vector<256x128xf32> -> vector<256x128xf32>
    %c0_51 = arith.constant 0 : index
    %c0_52 = arith.constant 0 : index
    %29 = vector.load %arg10[%c0_51, %c0_52] : memref<256x128xf32, #tpu.memory_space<vmem>>, vector<256x128xf32>
    %30 = arith.addf %29, %28 : vector<256x128xf32>
    %c0_53 = arith.constant 0 : index
    %c0_54 = arith.constant 0 : index
    %31 = vector.load %arg10[%c0_53, %c0_54] : memref<256x128xf32, #tpu.memory_space<vmem>>, vector<256x128xf32>
    tpu.vector_store %arg10[%c0_53, %c0_54], %30 {strides = array<i32>} : memref<256x128xf32, #tpu.memory_space<vmem>>, vector<256x128xf32>,
    %c2_55 = arith.constant 2 : index
    %c0_56 = arith.constant 0 : index
    %c0_57 = arith.constant 0 : index
    %32 = vector.load %arg9[%c2_55, %c0_56, %c0_57] : memref<18x16x384xbf16, #tpu.memory_space<vmem>>, vector<16x16x384xbf16>
    %33 = vector.shape_cast %32 : vector<16x16x384xbf16> to vector<256x384xbf16>
    %c2_58 = arith.constant 2 : index
    %c0_59 = arith.constant 0 : index
    %c0_60 = arith.constant 0 : index
    %34 = vector.load %arg4[%c2_58, %c0_59, %c0_60] : memref<3x384x128xbf16, #tpu.memory_space<vmem>>, vector<1x384x128xbf16>
    %35 = vector.shape_cast %34 : vector<1x384x128xbf16> to vector<384x128xbf16>
    %cst_61 = arith.constant dense<0.000000e+00> : vector<256x128xf32>
    %36 = tpu.matmul %33, %35, %cst_61 {dimension_numbers = #tpu.dot_dimension_numbers<[1], [0], [0], [1], [0, 0, 1, 1], [], []>} : vector<256x384xbf16>, vector<384x128xbf16>, vector<256x128xf32> -> vector<256x128xf32>
    %c0_62 = arith.constant 0 : index
    %c0_63 = arith.constant 0 : index
    %37 = vector.load %arg10[%c0_62, %c0_63] : memref<256x128xf32, #tpu.memory_space<vmem>>, vector<256x128xf32>
    %38 = arith.addf %37, %36 : vector<256x128xf32>
    %c0_64 = arith.constant 0 : index
    %c0_65 = arith.constant 0 : index
    %39 = vector.load %arg10[%c0_64, %c0_65] : memref<256x128xf32, #tpu.memory_space<vmem>>, vector<256x128xf32>
    tpu.vector_store %arg10[%c0_64, %c0_65], %38 {strides = array<i32>} : memref<256x128xf32, #tpu.memory_space<vmem>>, vector<256x128xf32>,
    %c0_66 = arith.constant 0 : index
    %c0_67 = arith.constant 0 : index
    %40 = vector.load %arg10[%c0_66, %c0_67] : memref<256x128xf32, #tpu.memory_space<vmem>>, vector<256x128xf32>
    %c0_68 = arith.constant 0 : index
    %c0_69 = arith.constant 0 : index
    %41 = vector.load %arg6[%c0_68, %c0_69] : memref<1x128xf32, #tpu.memory_space<vmem>>, vector<1x128xf32>
    %42 = vector.broadcast %41 : vector<1x128xf32> to vector<256x128xf32>
    %43 = arith.addf %40, %42 : vector<256x128xf32>
    %cst_70 = arith.constant 0.000000e+00 : f32
    %44 = vector.broadcast %cst_70 : f32 to vector<256x128xf32>
    %45 = arith.maximumf %43, %44 : vector<256x128xf32>
    %46 = arith.truncf %45 : vector<256x128xf32> to vector<256x128xbf16>
    %c0_71 = arith.constant 0 : index
    %c0_72 = arith.constant 0 : index
    %47 = vector.load %arg5[%c0_71, %c0_72] : memref<128x128xbf16, #tpu.memory_space<vmem>>, vector<128x128xbf16>
    %cst_73 = arith.constant dense<0.000000e+00> : vector<256x128xf32>
    %48 = tpu.matmul %46, %47, %cst_73 {dimension_numbers = #tpu.dot_dimension_numbers<[1], [0], [0], [1], [0, 0, 1, 1], [], []>} : vector<256x128xbf16>, vector<128x128xbf16>, vector<256x128xf32> -> vector<256x128xf32>
    %c0_74 = arith.constant 0 : index
    %c0_75 = arith.constant 0 : index
    %49 = vector.load %arg7[%c0_74, %c0_75] : memref<1x128xf32, #tpu.memory_space<vmem>>, vector<1x128xf32>
    %50 = vector.broadcast %49 : vector<1x128xf32> to vector<256x128xf32>
    %51 = arith.addf %48, %50 : vector<256x128xf32>
    %52 = vector.shape_cast %51 : vector<256x128xf32> to vector<1x16x16x128xf32>
    %c0_76 = arith.constant 0 : index
    %c0_77 = arith.constant 0 : index
    %c0_78 = arith.constant 0 : index
    %c0_79 = arith.constant 0 : index
    %53 = vector.load %arg8[%c0_76, %c0_77, %c0_78, %c0_79] : memref<1x16x16x128xf32, #tpu.memory_space<vmem>>, vector<1x16x16x128xf32>
    tpu.vector_store %arg8[%c0_76, %c0_77, %c0_78, %c0_79], %52 {strides = array<i32>} : memref<1x16x16x128xf32, #tpu.memory_space<vmem>>, vector<1x16x16x128xf32>,
    return
  }
  func.func @transform_0(%arg0: i32, %arg1: i32) -> (i32, i32, i32, i32) {
    %c0_i32 = arith.constant 0 : i32
    %c0_i32_0 = arith.constant 0 : i32
    %c0_i32_1 = arith.constant 0 : i32
    return %arg0, %arg1, %c0_i32, %c0_i32_0 : i32, i32, i32, i32
  }
  func.func @transform_1(%arg0: i32, %arg1: i32) -> (i32, i32, i32, i32) {
    %c1_i32 = arith.constant 1 : i32
    %0 = arith.addi %arg1, %c1_i32 : i32
    %c8_i32 = arith.constant 8 : i32
    %1 = arith.muli %0, %c8_i32 : i32
    %c0_i32 = arith.constant 0 : i32
    %c0_i32_0 = arith.constant 0 : i32
    %c0_i32_1 = arith.constant 0 : i32
    return %arg0, %1, %c0_i32, %c0_i32_0 : i32, i32, i32, i32
  }
  func.func @transform_2(%arg0: i32, %arg1: i32) -> (i32, i32, i32) {
    %c0_i32 = arith.constant 0 : i32
    %c0_i32_0 = arith.constant 0 : i32
    %c0_i32_1 = arith.constant 0 : i32
    %c0_i32_2 = arith.constant 0 : i32
    return %c0_i32, %c0_i32_0, %c0_i32_1 : i32, i32, i32
  }
  func.func @transform_3(%arg0: i32, %arg1: i32) -> (i32, i32) {
    %c0_i32 = arith.constant 0 : i32
    %c0_i32_0 = arith.constant 0 : i32
    %c0_i32_1 = arith.constant 0 : i32
    return %c0_i32, %c0_i32_0 : i32, i32
  }
  func.func @transform_4(%arg0: i32, %arg1: i32) -> (i32, i32) {
    %c0_i32 = arith.constant 0 : i32
    %c0_i32_0 = arith.constant 0 : i32
    %c0_i32_1 = arith.constant 0 : i32
    return %c0_i32, %c0_i32_0 : i32, i32
  }
  func.func @transform_5(%arg0: i32, %arg1: i32) -> (i32, i32) {
    %c0_i32 = arith.constant 0 : i32
    %c0_i32_0 = arith.constant 0 : i32
    %c0_i32_1 = arith.constant 0 : i32
    return %c0_i32, %c0_i32_0 : i32, i32
  }
  func.func @transform_6(%arg0: i32, %arg1: i32) -> (i32, i32, i32, i32) {
    %c0_i32 = arith.constant 0 : i32
    %c0_i32_0 = arith.constant 0 : i32
    %c0_i32_1 = arith.constant 0 : i32
    return %arg0, %arg1, %c0_i32, %c0_i32_0 : i32, i32, i32, i32
  }
}

</mosaic_0001>

<bundles_post_ra>
// kernel: p2pc_forward.1
= control target key start
LH: loop header
LB: loop body
LE: loop exit
PB: predicated region body
PF: predicated region fallthrough
CT: control target
= control target key end

     0   :  { %11 = vsyncpa [#allocation5], 0  ;;  %s6699_s0 = inlined_call_operand.vmem [shape: bf16[2,18,18,128], index: 0, kind: input, shape index: {}, may-alias: {0,1}]   ;;  %s6700_s1 = inlined_call_operand.vmem [shape: bf16[2,18,18,128], index: 1, kind: input, shape index: {}, may-alias: {0,1}]   ;;  %s6701_s2 = inlined_call_operand.vmem [shape: bf16[3,384,128], index: 2, kind: input, shape index: {}]   ;;  %s6702_s3 = inlined_call_operand.vmem [shape: bf16[128,128], index: 3, kind: input, shape index: {}]   ;;  %s6703_s4 = inlined_call_operand.vmem [shape: f32[1,128], index: 4, kind: input, shape index: {}]   ;;  %s6704_s5 = inlined_call_operand.vmem [shape: f32[1,128], index: 5, kind: input, shape index: {}]   ;;  %s6705_s6 = inlined_call_operand.hbm [shape: f32[2,16,16,128], index: 6, kind: output, shape index: {}]  }
   0x1   :  { %13 = vsyncpa [#allocation5 + $0x1], 0  ;;  %s5742_s21 = smov 0   ;;  %s5744_s22 = smov 0  }
   0x2   :  { %s5746_s23 = smov 0   ;;  %s5748_s24 = smov 0  }
   0x3   :  { %s5750_s25 = smov 0   ;;  %s5752_s26 = smov 0  }
   0x4 LB: > { %s4297_s27 = sadd.s32 4294967295, %s5703_s26   ;;  %s4298_s28 = sadd.s32 4294967294, %s5703_s26   ;;  %s5703_s26 = sphi %s5752_s26, %s19_s26   ;;  %s5699_s25 = sphi %s5750_s25, %s6718_s25   ;;  %s5695_s24 = sphi %s5748_s24, %s6717_s24   ;;  %s5691_s23 = sphi %s5746_s23, %s6716_s23   ;;  %s5687_s22 = sphi %s5744_s22, %s6715_s22   ;;  %s5683_s21 = sphi %s5742_s21, %s6714_s21  }
   0x5   : > { %s31_s29 = sadd.s32 1, %s5699_s25  ;;  %s184_s30 = sadd.s32 1, %s5691_s23 }
   0x6   : > { %p33_p0 = scmp.ge.s32.totalorder %s31_s29, 2  ;;  %p194_p1 = scmp.ne.s32.totalorder %s5691_s23, %s5687_s22 }
   0x7   : > { %p195_p2 = scmp.eq.s32.totalorder %s4297_s27, 1  ;;  %p200_p3 = scmp.ne.s32.totalorder %s5687_s22, %s5683_s21 }
   0x8   : > { %s6720_s29 = smov (%p33_p0, %s31_s29), 0  ;;  %p201_p5 = scmp.eq.s32.totalorder %s4298_s28, 1 }
   0x9   : > { %p5782_p4 = por %p195_p2, %p194_p1  ;;  %s179_s8 = ssub.s32 %s5699_s25, %s6720_s29 }
   0xa   : > { %p4301_p6 = scmp.ge.s32.totalorder %s5703_s26, 1  ;;  %p182_p7 = scmp.eq.s32.totalorder %s179_s8, 0 }
   0xb   : > { %p5789_p8 = por %p201_p5, %p200_p3  ;;  %p273_p9 = scmp.lt.s32.totalorder %s5703_s26, 3 }
   0xc   : > { %s5795_s10 = scalar_select %p182_p7, %s5691_s23, %s184_s30  }
   0xd   : > { %p274_p10 = pnand %p4301_p6, %p273_p9 }
   0xf   : > { %277 = sbr.rel (%p274_p10) target bundleno = 971 (0x3cb), region = 44 }
  0x14   : > { %v5377_v0 = vld [vmem:[%s6701_s2 + $0x38] sm:$0xff]  ;;  %p331_p11 = scmp.lt.s32.totalorder %s5695_s24, 1  ;;  %v5376_v2 = vld [vmem:[%s6701_s2 + $0x30] sm:$0xff]  ;;  %vm483_vm0 = vsmask.f32 3328  ;;  %v5375_v4 = vld [vmem:[%s6701_s2 + $0x28] sm:$0xff] }
  0x15   : > { %v5385_v1 = vld [vmem:[%s6701_s2 + $0x78] sm:$0xff]  ;;  %1817 = vmatpush.bf16.msra.mxu0 %v5377_v0  ;;  %5547 = vmatpush.bf16.msra.mxu2 %v5377_v0  ;;  %v5384_v3 = vld [vmem:[%s6701_s2 + $0x70] sm:$0xff]  ;;  %v5383_v5 = vld [vmem:[%s6701_s2 + $0x68] sm:$0xff]  ;;  %vm484_vm1 = vsmask.f32 7440  ;;  %vm1092_vm3 = vcmask 1042432  }
  0x16   : > { %s5808_s17 = scalar_select %p331_p11, %s5695_s24, 1  ;;  %1906 = vmatpush.bf16.msra.mxu1 %v5385_v1  ;;  %5555 = vmatpush.bf16.msra.mxu3 %v5385_v1  ;;  %v5374_v9 = vld [vmem:[%s6701_s2 + $0x20] sm:$0xff]  ;;  %v5373_v31 = vld [vmem:[%s6701_s2 + $0x18] sm:$0xff]  ;;  %vm5852_vm2 = vmor %vm483_vm0, %vm484_vm1  ;;  %vm1093_vm4 = vcmask 1046532  }
  0x17   : > { %v5382_v18 = vld [vmem:[%s6701_s2 + $0x60] sm:$0xff]  ;;  %v5381_v37 = vld [vmem:[%s6701_s2 + $0x58] sm:$0xff]  ;;  %v5372_v48 = vld [vmem:[%s6701_s2 + $0x10] sm:$0xff]  ;;  %s5546_s12 = sshll.u32 %s5695_s24, 8  ;;  %s5645_s30 = scalar_lea.hbm %s6705_s6, 512 }
  0x18   : > { %s5563_s20 = smul.u32 216, %s5808_s17  ;;  %v5380_v53 = vld [vmem:[%s6701_s2 + $0x50] sm:$0xff]  ;;  %v5371_v57 = vld [vmem:[%s6701_s2 + $0x8] sm:$0xff]  ;;  %vm6097_vm5 = vmor %vm1092_vm3, %vm1093_vm4  ;;  %s4190_s16 = scalar_lea.hbm %s6705_s6, %s5546_s12 }
  0x19   : > { %1818 = vmatpush.bf16.msra.mxu0 %v5376_v2  ;;  %5548 = vmatpush.bf16.msra.mxu2 %v5376_v2  ;;  %v5379_v1 = vld [vmem:[%s6701_s2 + $0x48] sm:$0xff] }
  0x1a   : > { %s5825_s13 = scalar_lea.vmem %s6699_s0, %s5563_s20  ;;  %1907 = vmatpush.bf16.msra.mxu1 %v5384_v3  ;;  %5556 = vmatpush.bf16.msra.mxu3 %v5384_v3  ;;  %s5321_s11 = sadd.s32 192, %s5563_s20 }
  0x1b   : > { %v362_v6 = vld [vmem:[%s5825_s13] sm:$0xf]  ;;  %v363_v7 = vld [vmem:[%s5825_s13 + $0x4] sm:$0xf]  ;;  %v437_v13 = vld [vmem:[%s5825_s13 + $0x8] sm:$0x1]  ;;  %s6378_s17 = scalar_lea.vmem %s6700_s1, %s5321_s11 }
  0x1c   : > { %v378_v8 = vld [vmem:[%s5825_s13 + $0x60] sm:$0xf]  ;;  %394 = vst [vmem:[#allocation2] sm:$0xf] %v362_v6  ;;  %v379_v10 = vld [vmem:[%s5825_s13 + $0x64] sm:$0xf] }
  0x1d   : > { %v435_v11 = vld [vmem:[%s5825_s13] sm:$0xf]  ;;  %395 = vst [vmem:[#allocation2 + $0xc] sm:$0xf] %v363_v7  ;;  %v436_v12 = vld [vmem:[%s5825_s13 + $0x4] sm:$0xf]  ;;  %1819 = vmatpush.bf16.msra.mxu0 %v5375_v4  ;;  %5549 = vmatpush.bf16.msra.mxu2 %v5375_v4 }
  0x1e   : > { %410 = vst [vmem:[#allocation2 + $0xc0] sm:$0xf] %v378_v8  ;;  %v487_v14 = vshrl.u32 %v435_v11, 16  ;;  %v490_v15 = vshll.u32 %v435_v11, 16  ;;  %v496_v16 = vshll.u32 %v436_v12, 16  ;;  %v500_v17 = vshrl.u32 %v436_v12, 16  ;;  %1908 = vmatpush.bf16.msra.mxu1 %v5383_v5  ;;  %5557 = vmatpush.bf16.msra.mxu3 %v5383_v5 }
  0x1f   : > { %411 = vst [vmem:[#allocation2 + $0xcc] sm:$0xf] %v379_v10  ;;  %v506_v19 = vshll.u32 %v437_v13, 16  ;;  %v459_v20 = vld [vmem:[%s5825_s13 + $0x60] sm:$0xf] }
  0x20   : > { %v489_v21 = vrot.slane %v487_v14, 4  ;;  %v492_v22 = vrot.slane %v490_v15, 5  ;;  %v498_v23 = vrot.slane %v496_v16, 5  ;;  %v502_v24 = vrot.slane %v500_v17, 4  ;;  %v460_v25 = vld [vmem:[%s5825_s13 + $0x64] sm:$0xf] }
  0x21   : > { %v508_v26 = vrot.slane %v506_v19, 5  ;;  %v461_v27 = vld [vmem:[%s5825_s13 + $0x68] sm:$0x1]  ;;  %v679_v28 = vshrl.u32 %v459_v20, 16  ;;  %v682_v29 = vshll.u32 %v459_v20, 16  ;;  %v688_v30 = vshll.u32 %v460_v25, 16  ;;  %1820 = vmatpush.bf16.msra.mxu0 %v5374_v9  ;;  %5550 = vmatpush.bf16.msra.mxu2 %v5374_v9 }
  0x22   : > { %v493_v32 = vor.u32 %v492_v22, %v489_v21  ;;  %v503_v33 = vor.u32 %v502_v24, %v498_v23  ;;  %v692_v34 = vshrl.u32 %v460_v25, 16  ;;  %v698_v35 = vshll.u32 %v461_v27, 16  ;;  %v364_v36 = vld [vmem:[%s5825_s13 + $0xc] sm:$0xf]  ;;  %1909 = vmatpush.bf16.msra.mxu1 %v5382_v18  ;;  %5558 = vmatpush.bf16.msra.mxu3 %v5382_v18  ;;  %v365_v42 = vld [vmem:[%s5825_s13 + $0x10] sm:$0xf] }
  0x23   : > { %v681_v39 = vrot.slane %v679_v28, 4  ;;  %v684_v40 = vrot.slane %v682_v29, 5  ;;  %v690_v41 = vrot.slane %v688_v30, 5  ;;  %396 = vst [vmem:[#allocation2 + $0x18] sm:$0xf] %v364_v36  ;;  %v5370_v11 = vld [vmem:[%s6701_s2] sm:$0xff] }
  0x24   : > { %v494_v43 = vrot.slane %v493_v32, 4  ;;  %v504_v44 = vrot.slane %v503_v33, 4  ;;  %v694_v45 = vrot.slane %v692_v34, 4  ;;  %v700_v47 = vrot.slane %v698_v35, 5  ;;  %397 = vst [vmem:[#allocation2 + $0x24] sm:$0xf] %v365_v42 }
  0x25   : > { %v685_v46 = vor.u32 %v684_v40, %v681_v39  ;;  %1821 = vmatpush.bf16.msra.mxu0 %v5373_v31  ;;  %5551 = vmatpush.bf16.msra.mxu2 %v5373_v31  ;;  %v380_v52 = vld [vmem:[%s5825_s13 + $0x6c] sm:$0xf]  ;;  %v381_v55 = vld [vmem:[%s5825_s13 + $0x70] sm:$0xf]  ;;  %v440_v62 = vld [vmem:[%s5825_s13 + $0x14] sm:$0x1] }
  0x26   : > { %v499_v49 = vsel %vm5852_vm2, %v494_v43, %v498_v23  ;;  %v509_v50 = vsel %vm5852_vm2, %v504_v44, %v508_v26  ;;  %v695_v51 = vor.u32 %v694_v45, %v690_v41  ;;  %1910 = vmatpush.bf16.msra.mxu1 %v5381_v37  ;;  %5559 = vmatpush.bf16.msra.mxu3 %v5381_v37  ;;  %v438_v56 = vld [vmem:[%s5825_s13 + $0xc] sm:$0xf]  ;;  %v439_v59 = vld [vmem:[%s5825_s13 + $0x10] sm:$0xf]  ;;  %v530_v5 = vshll.u32 %v440_v62, 16  ;;  %v5378_v18 = vld [vmem:[%s6701_s2 + $0x40] sm:$0xff] }
  0x27   : > { %902 = vst [vmem:[#allocation2 + $0x4] sm:$0xf] %v499_v49  ;;  %v686_v54 = vrot.slane %v685_v46, 4  ;;  %v511_v60 = vshrl.u32 %v438_v56, 16  ;;  %v514_v63 = vshll.u32 %v438_v56, 16  ;;  %v520_v0 = vshll.u32 %v439_v59, 16 }
  0x28   : > { %903 = vst [vmem:[#allocation2 + $0x10] sm:$0xf] %v509_v50  ;;  %v696_v58 = vrot.slane %v695_v51, 4  ;;  %v524_v4 = vshrl.u32 %v439_v59, 16  ;;  %v5882_v6 = vld [vmem:[#allocation2] sm:$0xf] }
  0x29   : > { %v691_v61 = vsel %vm5852_vm2, %v686_v54, %v690_v41  ;;  %412 = vst [vmem:[#allocation2 + $0xd8] sm:$0xf] %v380_v52  ;;  %1822 = vmatpush.bf16.msra.mxu0 %v5372_v48  ;;  %5552 = vmatpush.bf16.msra.mxu2 %v5372_v48  ;;  %v513_v3 = vrot.slane %v511_v60, 4  ;;  %v5323_v7 = vld [vmem:[#allocation2 + $0x8] sm:$0xf0]  ;;  %v516_v8 = vrot.slane %v514_v63, 5 }
  0x2a   : > { %v701_v2 = vsel %vm5852_vm2, %v696_v58, %v700_v47  ;;  %918 = vst [vmem:[#allocation2 + $0xc4] sm:$0xf] %v691_v61  ;;  %1911 = vmatpush.bf16.msra.mxu1 %v5380_v53  ;;  %5560 = vmatpush.bf16.msra.mxu3 %v5380_v53  ;;  %v522_v9 = vrot.slane %v520_v0, 5  ;;  %v462_v10 = vld [vmem:[%s5825_s13 + $0x6c] sm:$0xf]  ;;  %v526_v13 = vrot.slane %v524_v4, 4  ;;  %v4326_v29 = vor.u32 %v5323_v7, %v5882_v6 }
  0x2b   : > { %919 = vst [vmem:[#allocation2 + $0xd0] sm:$0xf] %v701_v2  ;;  %v4421_v12 = vld [vmem:[#allocation2 + $0xc0] sm:$0xf]  ;;  %v5347_v14 = vld [vmem:[#allocation2 + $0xc8] sm:$0xf0]  ;;  %v517_v15 = vor.u32 %v516_v8, %v513_v3 }
  0x2c   : > { %413 = vst [vmem:[#allocation2 + $0xe4] sm:$0xf] %v381_v55  ;;  %v463_v16 = vld [vmem:[%s5825_s13 + $0x70] sm:$0xf]  ;;  %v464_v17 = vld [vmem:[%s5825_s13 + $0x74] sm:$0x1]  ;;  %v527_v20 = vor.u32 %v526_v13, %v522_v9  ;;  %v4422_v35 = vor.u32 %v5347_v14, %v4421_v12 }
  0x2d   : > { %1823 = vmatpush.bf16.msra.mxu0 %v5371_v57  ;;  %5553 = vmatpush.bf16.msra.mxu2 %v5371_v57  ;;  %v532_v21 = vrot.slane %v530_v5, 5  ;;  %v703_v22 = vshrl.u32 %v462_v10, 16  ;;  %v706_v23 = vshll.u32 %v462_v10, 16  ;;  %v518_v25 = vrot.slane %v517_v15, 4  ;;  %v5393_v30 = vld [vmem:[%s6701_s2 + $0xb8] sm:$0xff]  ;;  %v5392_v50 = vld [vmem:[%s6701_s2 + $0xb0] sm:$0xff] }
  0x2e   : > { %v5322_v19 = vld [vmem:[#allocation2 + $0x4] sm:$0xf]  ;;  %1912 = vmatpush.bf16.msra.mxu1 %v5379_v1  ;;  %5561 = vmatpush.bf16.msra.mxu3 %v5379_v1  ;;  %v712_v26 = vshll.u32 %v463_v16, 16  ;;  %v716_v27 = vshrl.u32 %v463_v16, 16  ;;  %v722_v28 = vshll.u32 %v464_v17, 16  ;;  %v5449_v31 = vld [vmem:[%s6701_s2 + $0xf8] sm:$0xff] }
  0x2f   : > { %v4327_v24 = vld [vmem:[#allocation2 + $0xc] sm:$0xf0]  ;;  %v528_v32 = vrot.slane %v527_v20, 4  ;;  %v705_v33 = vrot.slane %v703_v22, 4  ;;  %v708_v34 = vrot.slane %v706_v23, 5  ;;  %v5457_v37 = vld [vmem:[%s6701_s2 + $0x138] sm:$0xff]  ;;  %v523_v39 = vsel %vm5852_vm2, %v518_v25, %v522_v9 }
  0x30   : > { %v714_v40 = vrot.slane %v712_v26, 5  ;;  %v718_v41 = vrot.slane %v716_v27, 4  ;;  %v4330_v42 = vor.u32 %v5322_v19, %v4327_v24  ;;  %904 = vst [vmem:[#allocation2 + $0x1c] sm:$0xf] %v523_v39  ;;  %v366_v46 = vld [vmem:[%s5825_s13 + $0x18] sm:$0xf] }
  0x31   : > { %v5346_v36 = vld [vmem:[#allocation2 + $0xc4] sm:$0xf]  ;;  %1824 = vmatpush.bf16.msra.mxu0 %v5370_v11  ;;  %5554 = vmatpush.bf16.msra.mxu2 %v5370_v11  ;;  %v533_v44 = vsel %vm5852_vm2, %v528_v32, %v532_v21  ;;  %v709_v45 = vor.u32 %v708_v34, %v705_v33  ;;  %v724_v49 = vrot.slane %v722_v28, 5  ;;  %v367_v51 = vld [vmem:[%s5825_s13 + $0x1c] sm:$0xf]  ;;  %v5448_v53 = vld [vmem:[%s6701_s2 + $0xf0] sm:$0xff] }
  0x32   : > { %v4423_v43 = vld [vmem:[#allocation2 + $0xcc] sm:$0xf0]  ;;  %1913 = vmatpush.bf16.msra.mxu1 %v5378_v18  ;;  %5562 = vmatpush.bf16.msra.mxu3 %v5378_v18  ;;  %905 = vst [vmem:[#allocation2 + $0x28] sm:$0xf] %v533_v44  ;;  %v719_v48 = vor.u32 %v718_v41, %v714_v40  ;;  %v382_v54 = vld [vmem:[%s5825_s13 + $0x78] sm:$0xf] }
  0x33   : > { %v4426_v47 = vor.u32 %v5346_v36, %v4423_v43  ;;  %v710_v52 = vrot.slane %v709_v45, 4  ;;  %398 = vst [vmem:[#allocation2 + $0x30] sm:$0xf] %v366_v46  ;;  %v5456_v56 = vld [vmem:[%s6701_s2 + $0x130] sm:$0xff]  ;;  %v383_v57 = vld [vmem:[%s5825_s13 + $0x7c] sm:$0xf] }
  0x34   : > { %1825 = vmatmul.bf16.vlgmr.msra.gmra.mxu0 %v4326_v29  ;;  %1865 = vmatmul.bf16.vlgmr.msra.gmra.mxu2 %v4422_v35  ;;  %v720_v55 = vrot.slane %v719_v48, 4  ;;  %399 = vst [vmem:[#allocation2 + $0x3c] sm:$0xf] %v367_v51  ;;  %v441_v59 = vld [vmem:[%s5825_s13 + $0x18] sm:$0xf]  ;;  %v5391_v4 = vld [vmem:[%s6701_s2 + $0xa8] sm:$0xff] }
  0x35   : > { %1995 = vmatpush.bf16.msrb.mxu2 %v5393_v30  ;;  %1914 = vmatmul.bf16.vlgmr.msra.gmra.mxu1 %v4330_v42  ;;  %v715_v58 = vsel %vm5852_vm2, %v710_v52, %v714_v40  ;;  %414 = vst [vmem:[#allocation2 + $0xf0] sm:$0xf] %v382_v54  ;;  %v442_v60 = vld [vmem:[%s5825_s13 + $0x1c] sm:$0xf]  ;;  %v443_v62 = vld [vmem:[%s5825_s13 + $0x20] sm:$0x1] }
  0x36   : > { %2630 = vmatpush.bf16.msrb.mxu3 %v5449_v31  ;;  %2719 = vmatpush.bf16.msrb.mxu0 %v5457_v37  ;;  %v725_v61 = vsel %vm5852_vm2, %v720_v55, %v724_v49  ;;  %920 = vst [vmem:[#allocation2 + $0xdc] sm:$0xf] %v715_v58  ;;  %v535_v63 = vshrl.u32 %v441_v59, 16  ;;  %v538_v0 = vshll.u32 %v441_v59, 16  ;;  %v544_v1 = vshll.u32 %v442_v60, 16  ;;  %v5447_v9 = vld [vmem:[%s6701_s2 + $0xe8] sm:$0xff] }
  0x37   : > { %1954 = vmatmul.bf16.vlgmr.msra.gmra.mxu3 %v4426_v47  ;;  %921 = vst [vmem:[#allocation2 + $0xe8] sm:$0xf] %v725_v61  ;;  %v548_v2 = vshrl.u32 %v442_v60, 16  ;;  %v554_v3 = vshll.u32 %v443_v62, 16  ;;  %v465_v11 = vld [vmem:[%s5825_s13 + $0x78] sm:$0xf] }
  0x38   : > { %415 = vst [vmem:[#allocation2 + $0xfc] sm:$0xf] %v383_v57  ;;  %v537_v5 = vrot.slane %v535_v63, 4  ;;  %v540_v6 = vrot.slane %v538_v0, 5  ;;  %v546_v7 = vrot.slane %v544_v1, 5  ;;  %v727_v20 = vshrl.u32 %v465_v11, 16 }
  0x39   : > { %1996 = vmatpush.bf16.msrb.mxu2 %v5392_v50  ;;  %v550_v8 = vrot.slane %v548_v2, 4  ;;  %v466_v12 = vld [vmem:[%s5825_s13 + $0x7c] sm:$0xf]  ;;  %v4337_v13 = vld [vmem:[#allocation2 + $0x18] sm:$0xf]  ;;  %v556_v18 = vrot.slane %v554_v3, 5 }
  0x3a   : > { %2631 = vmatpush.bf16.msrb.mxu3 %v5448_v53  ;;  %2720 = vmatpush.bf16.msrb.mxu0 %v5456_v56  ;;  %v541_v10 = vor.u32 %v540_v6, %v537_v5  ;;  %v5326_v14 = vld [vmem:[#allocation2 + $0x20] sm:$0xf0]  ;;  %v4433_v15 = vld [vmem:[#allocation2 + $0xd8] sm:$0xf]  ;;  %v467_v19 = vld [vmem:[%s5825_s13 + $0x80] sm:$0x1] }
  0x3b   : > { %v5350_v16 = vld [vmem:[#allocation2 + $0xe0] sm:$0xf0]  ;;  %v551_v17 = vor.u32 %v550_v8, %v546_v7  ;;  %v730_v21 = vshll.u32 %v465_v11, 16  ;;  %v5325_v22 = vld [vmem:[#allocation2 + $0x1c] sm:$0xf]  ;;  %v736_v25 = vshll.u32 %v466_v12, 16  ;;  %v4338_v42 = vor.u32 %v5326_v14, %v4337_v13 }
  0x3c   : > { %v4339_v23 = vld [vmem:[#allocation2 + $0x24] sm:$0xf0]  ;;  %v542_v24 = vrot.slane %v541_v10, 4  ;;  %v740_v26 = vshrl.u32 %v466_v12, 16  ;;  %v729_v30 = vrot.slane %v727_v20, 4  ;;  %v746_v32 = vshll.u32 %v467_v19, 16 }
  0x3d   : > { %1997 = vmatpush.bf16.msrb.mxu2 %v5391_v4  ;;  %v5455_v27 = vld [vmem:[%s6701_s2 + $0x128] sm:$0xff]  ;;  %v5349_v28 = vld [vmem:[#allocation2 + $0xdc] sm:$0xf]  ;;  %v552_v29 = vrot.slane %v551_v17, 4  ;;  %v732_v31 = vrot.slane %v730_v21, 5  ;;  %v738_v35 = vrot.slane %v736_v25, 5  ;;  %v4434_v43 = vor.u32 %v5350_v16, %v4433_v15 }
  0x3e   : > { %2632 = vmatpush.bf16.msrb.mxu3 %v5447_v9  ;;  %v4435_v33 = vld [vmem:[#allocation2 + $0xe4] sm:$0xf0]  ;;  %v547_v34 = vsel %vm5852_vm2, %v542_v24, %v546_v7  ;;  %v742_v36 = vrot.slane %v740_v26, 4  ;;  %2721 = vmatpush.bf16.msrb.mxu0 %v5455_v27  ;;  %v368_v37 = vld [vmem:[%s5825_s13 + $0x24] sm:$0xf]  ;;  %v748_v41 = vrot.slane %v746_v32, 5  ;;  %v4342_v47 = vor.u32 %v5325_v22, %v4339_v23 }
  0x3f   : > { %v557_v39 = vsel %vm5852_vm2, %v552_v29, %v556_v18  ;;  %906 = vst [vmem:[#allocation2 + $0x34] sm:$0xf] %v547_v34  ;;  %v733_v40 = vor.u32 %v732_v31, %v729_v30  ;;  %v369_v45 = vld [vmem:[%s5825_s13 + $0x28] sm:$0xf]  ;;  %v384_v46 = vld [vmem:[%s5825_s13 + $0x84] sm:$0xf]  ;;  %v4438_v48 = vor.u32 %v5349_v28, %v4435_v33 }
  0x40   : > { %907 = vst [vmem:[#allocation2 + $0x40] sm:$0xf] %v557_v39  ;;  %v743_v44 = vor.u32 %v742_v36, %v738_v35  ;;  %v385_v50 = vld [vmem:[%s5825_s13 + $0x88] sm:$0xf]  ;;  %v444_v52 = vld [vmem:[%s5825_s13 + $0x24] sm:$0xf] }
  0x41   : > { %v734_v49 = vrot.slane %v733_v40, 4  ;;  %400 = vst [vmem:[#allocation2 + $0x48] sm:$0xf] %v368_v37  ;;  %v445_v54 = vld [vmem:[%s5825_s13 + $0x28] sm:$0xf]  ;;  %v559_v57 = vshrl.u32 %v444_v52, 16 }
  0x42   : > { %v744_v51 = vrot.slane %v743_v44, 4  ;;  %401 = vst [vmem:[#allocation2 + $0x54] sm:$0xf] %v369_v45  ;;  %v446_v55 = vld [vmem:[%s5825_s13 + $0x2c] sm:$0x1]  ;;  %v562_v58 = vshll.u32 %v444_v52, 16 }
  0x43   : > { %v739_v53 = vsel %vm5852_vm2, %v734_v49, %v738_v35  ;;  %416 = vst [vmem:[#allocation2 + $0x108] sm:$0xf] %v384_v46  ;;  %v568_v59 = vshll.u32 %v445_v54, 16  ;;  %v572_v60 = vshrl.u32 %v445_v54, 16  ;;  %v578_v61 = vshll.u32 %v446_v55, 16  ;;  %v5390_v12 = vld [vmem:[%s6701_s2 + $0xa0] sm:$0xff] }
  0x44   : > { %1830 = vmatmul.bf16.gmra.mxu0 %v4338_v42  ;;  %1870 = vmatmul.bf16.gmra.mxu2 %v4434_v43  ;;  %v749_v56 = vsel %vm5852_vm2, %v744_v51, %v748_v41  ;;  %922 = vst [vmem:[#allocation2 + $0xf4] sm:$0xf] %v739_v53  ;;  %v468_v62 = vld [vmem:[%s5825_s13 + $0x84] sm:$0xf]  ;;  %v561_v63 = vrot.slane %v559_v57, 4  ;;  %v564_v0 = vrot.slane %v562_v58, 5 }
  0x45   : > { %1919 = vmatmul.bf16.gmra.mxu1 %v4342_v47  ;;  %923 = vst [vmem:[#allocation2 + $0x100] sm:$0xf] %v749_v56  ;;  %v570_v1 = vrot.slane %v568_v59, 5  ;;  %v574_v2 = vrot.slane %v572_v60, 4  ;;  %v751_v3 = vshrl.u32 %v468_v62, 16  ;;  %v580_v5 = vrot.slane %v578_v61, 5  ;;  %1998 = vmatpush.bf16.msrb.mxu2 %v5390_v12 }
  0x46   : > { %417 = vst [vmem:[#allocation2 + $0x114] sm:$0xf] %v385_v50  ;;  %v565_v4 = vor.u32 %v564_v0, %v561_v63  ;;  %v469_v6 = vld [vmem:[%s5825_s13 + $0x88] sm:$0xf]  ;;  %v470_v7 = vld [vmem:[%s5825_s13 + $0x8c] sm:$0x1] }
  0x47   : > { %1959 = vmatmul.bf16.gmra.mxu3 %v4438_v48  ;;  %v575_v8 = vor.u32 %v574_v2, %v570_v1  ;;  %v753_v9 = vrot.slane %v751_v3, 4  ;;  %v754_v10 = vshll.u32 %v468_v62, 16  ;;  %v760_v11 = vshll.u32 %v469_v6, 16  ;;  %v4349_v13 = vld [vmem:[#allocation2 + $0x30] sm:$0xf]  ;;  %v5446_v18 = vld [vmem:[%s6701_s2 + $0xe0] sm:$0xff] }
  0x48   : > { %v5329_v14 = vld [vmem:[#allocation2 + $0x38] sm:$0xf0]  ;;  %v566_v15 = vrot.slane %v565_v4, 4  ;;  %v764_v16 = vshrl.u32 %v469_v6, 16  ;;  %v770_v17 = vshll.u32 %v470_v7, 16  ;;  %v5454_v26 = vld [vmem:[%s6701_s2 + $0x120] sm:$0xff]  ;;  %2633 = vmatpush.bf16.msrb.mxu3 %v5446_v18 }
  0x49   : > { %v4445_v19 = vld [vmem:[#allocation2 + $0xf0] sm:$0xf]  ;;  %v5353_v20 = vld [vmem:[#allocation2 + $0xf8] sm:$0xf0]  ;;  %v5328_v21 = vld [vmem:[#allocation2 + $0x34] sm:$0xf]  ;;  %2722 = vmatpush.bf16.msrb.mxu0 %v5454_v26  ;;  %v4350_v39 = vor.u32 %v5329_v14, %v4349_v13 }
  0x4a   : > { %v4351_v22 = vld [vmem:[#allocation2 + $0x3c] sm:$0xf0]  ;;  %v576_v23 = vrot.slane %v575_v8, 4  ;;  %v756_v24 = vrot.slane %v754_v10, 5  ;;  %v762_v25 = vrot.slane %v760_v11, 5  ;;  %v571_v28 = vsel %vm5852_vm2, %v566_v15, %v570_v1  ;;  %v5389_v4 = vld [vmem:[%s6701_s2 + $0x98] sm:$0xff] }
  0x4b   : > { %v5352_v27 = vld [vmem:[#allocation2 + $0xf4] sm:$0xf]  ;;  %v766_v29 = vrot.slane %v764_v16, 4  ;;  %v370_v30 = vld [vmem:[%s5825_s13 + $0x30] sm:$0xf]  ;;  %v772_v36 = vrot.slane %v770_v17, 5  ;;  %v4446_v43 = vor.u32 %v5353_v20, %v4445_v19  ;;  %v4354_v44 = vor.u32 %v5328_v21, %v4351_v22  ;;  %1999 = vmatpush.bf16.msrb.mxu2 %v5389_v4 }
  0x4c   : > { %v4447_v31 = vld [vmem:[#allocation2 + $0xfc] sm:$0xf0]  ;;  %v581_v32 = vsel %vm5852_vm2, %v576_v23, %v580_v5  ;;  %908 = vst [vmem:[#allocation2 + $0x4c] sm:$0xf] %v571_v28  ;;  %v757_v33 = vor.u32 %v756_v24, %v753_v9  ;;  %v371_v34 = vld [vmem:[%s5825_s13 + $0x34] sm:$0xf] }
  0x4d   : > { %909 = vst [vmem:[#allocation2 + $0x58] sm:$0xf] %v581_v32  ;;  %v767_v35 = vor.u32 %v766_v29, %v762_v25  ;;  %v386_v37 = vld [vmem:[%s5825_s13 + $0x90] sm:$0xf]  ;;  %v387_v41 = vld [vmem:[%s5825_s13 + $0x94] sm:$0xf]  ;;  %v4450_v48 = vor.u32 %v5352_v27, %v4447_v31 }
  0x4e   : > { %v758_v40 = vrot.slane %v757_v33, 4  ;;  %402 = vst [vmem:[#allocation2 + $0x60] sm:$0xf] %v370_v30  ;;  %v447_v42 = vld [vmem:[%s5825_s13 + $0x30] sm:$0xf]  ;;  %v5445_v5 = vld [vmem:[%s6701_s2 + $0xd8] sm:$0xff] }
  0x4f   : > { %v768_v45 = vrot.slane %v767_v35, 4  ;;  %403 = vst [vmem:[#allocation2 + $0x6c] sm:$0xf] %v371_v34  ;;  %v448_v46 = vld [vmem:[%s5825_s13 + $0x34] sm:$0xf]  ;;  %v583_v47 = vshrl.u32 %v447_v42, 16  ;;  %2634 = vmatpush.bf16.msrb.mxu3 %v5445_v5 }
  0x50   : > { %v763_v49 = vsel %vm5852_vm2, %v758_v40, %v762_v25  ;;  %418 = vst [vmem:[#allocation2 + $0x120] sm:$0xf] %v386_v37  ;;  %v449_v50 = vld [vmem:[%s5825_s13 + $0x38] sm:$0x1]  ;;  %v586_v51 = vshll.u32 %v447_v42, 16  ;;  %v592_v52 = vshll.u32 %v448_v46, 16 }
  0x51   : > { %v773_v53 = vsel %vm5852_vm2, %v768_v45, %v772_v36  ;;  %924 = vst [vmem:[#allocation2 + $0x10c] sm:$0xf] %v763_v49  ;;  %v585_v54 = vrot.slane %v583_v47, 4  ;;  %v596_v55 = vshrl.u32 %v448_v46, 16  ;;  %v602_v56 = vshll.u32 %v449_v50, 16  ;;  %v5453_v13 = vld [vmem:[%s6701_s2 + $0x118] sm:$0xff] }
  0x52   : > { %925 = vst [vmem:[#allocation2 + $0x118] sm:$0xf] %v773_v53  ;;  %v588_v57 = vrot.slane %v586_v51, 5  ;;  %v594_v58 = vrot.slane %v592_v52, 5  ;;  %v471_v59 = vld [vmem:[%s5825_s13 + $0x90] sm:$0xf]  ;;  %2723 = vmatpush.bf16.msrb.mxu0 %v5453_v13 }
  0x53   : > { %419 = vst [vmem:[#allocation2 + $0x12c] sm:$0xf] %v387_v41  ;;  %v598_v60 = vrot.slane %v596_v55, 4  ;;  %v472_v62 = vld [vmem:[%s5825_s13 + $0x94] sm:$0xf]  ;;  %v604_v1 = vrot.slane %v602_v56, 5 }
  0x54   : > { %1835 = vmatmul.bf16.gmra.mxu0 %v4350_v39  ;;  %1875 = vmatmul.bf16.gmra.mxu2 %v4446_v43  ;;  %v589_v61 = vor.u32 %v588_v57, %v585_v54  ;;  %v473_v63 = vld [vmem:[%s5825_s13 + $0x98] sm:$0x1]  ;;  %v775_v2 = vshrl.u32 %v471_v59, 16  ;;  %v778_v3 = vshll.u32 %v471_v59, 16  ;;  %v784_v7 = vshll.u32 %v472_v62, 16 }
  0x55   : > { %1924 = vmatmul.bf16.gmra.mxu1 %v4354_v44  ;;  %v599_v0 = vor.u32 %v598_v60, %v594_v58  ;;  %v788_v8 = vshrl.u32 %v472_v62, 16  ;;  %v794_v9 = vshll.u32 %v473_v63, 16  ;;  %v4361_v17 = vld [vmem:[#allocation2 + $0x48] sm:$0xf]  ;;  %v5332_v18 = vld [vmem:[#allocation2 + $0x50] sm:$0xf0] }
  0x56   : > { %v590_v6 = vrot.slane %v589_v61, 4  ;;  %v777_v11 = vrot.slane %v775_v2, 4  ;;  %v780_v12 = vrot.slane %v778_v3, 5  ;;  %v786_v15 = vrot.slane %v784_v7, 5  ;;  %v372_v21 = vld [vmem:[%s5825_s13 + $0x3c] sm:$0xf] }
  0x57   : > { %1964 = vmatmul.bf16.gmra.mxu3 %v4450_v48  ;;  %v600_v10 = vrot.slane %v599_v0, 4  ;;  %v790_v16 = vrot.slane %v788_v8, 4  ;;  %v4457_v22 = vld [vmem:[#allocation2 + $0x108] sm:$0xf]  ;;  %v5356_v23 = vld [vmem:[#allocation2 + $0x110] sm:$0xf0]  ;;  %v4362_v39 = vor.u32 %v5332_v18, %v4361_v17 }
  0x58   : > { %v595_v14 = vsel %vm5852_vm2, %v590_v6, %v594_v58  ;;  %v781_v20 = vor.u32 %v780_v12, %v777_v11  ;;  %v796_v25 = vrot.slane %v794_v9, 5  ;;  %v373_v26 = vld [vmem:[%s5825_s13 + $0x40] sm:$0xf]  ;;  %v5331_v27 = vld [vmem:[#allocation2 + $0x4c] sm:$0xf]  ;;  %v4458_v44 = vor.u32 %v5356_v23, %v4457_v22  ;;  %v5444_v9 = vld [vmem:[%s6701_s2 + $0xd0] sm:$0xff] }
  0x59   : > { %v605_v19 = vsel %vm5852_vm2, %v600_v10, %v604_v1  ;;  %910 = vst [vmem:[#allocation2 + $0x64] sm:$0xf] %v595_v14  ;;  %v791_v24 = vor.u32 %v790_v16, %v786_v15  ;;  %v4363_v28 = vld [vmem:[#allocation2 + $0x54] sm:$0xf0]  ;;  %v5355_v29 = vld [vmem:[#allocation2 + $0x10c] sm:$0xf]  ;;  %2635 = vmatpush.bf16.msrb.mxu3 %v5444_v9 }
  0x5a   : > { %911 = vst [vmem:[#allocation2 + $0x70] sm:$0xf] %v605_v19  ;;  %v4459_v30 = vld [vmem:[#allocation2 + $0x114] sm:$0xf0]  ;;  %v782_v31 = vrot.slane %v781_v20, 4  ;;  %v4366_v48 = vor.u32 %v5331_v27, %v4363_v28  ;;  %v5388_v1 = vld [vmem:[%s6701_s2 + $0x90] sm:$0xff] }
  0x5b   : > { %404 = vst [vmem:[#allocation2 + $0x78] sm:$0xf] %v372_v21  ;;  %v388_v32 = vld [vmem:[%s5825_s13 + $0x9c] sm:$0xf]  ;;  %v792_v33 = vrot.slane %v791_v24, 4  ;;  %v4462_v49 = vor.u32 %v5355_v29, %v4459_v30  ;;  %2000 = vmatpush.bf16.msrb.mxu2 %v5388_v1  ;;  %v5452_v10 = vld [vmem:[%s6701_s2 + $0x110] sm:$0xff] }
  0x5c   : > { %405 = vst [vmem:[#allocation2 + $0x84] sm:$0xf] %v373_v26  ;;  %v389_v34 = vld [vmem:[%s5825_s13 + $0xa0] sm:$0xf]  ;;  %v787_v35 = vsel %vm5852_vm2, %v782_v31, %v786_v15  ;;  %v450_v36 = vld [vmem:[%s5825_s13 + $0x3c] sm:$0xf]  ;;  %2724 = vmatpush.bf16.msrb.mxu0 %v5452_v10 }
  0x5d   : > { %420 = vst [vmem:[#allocation2 + $0x138] sm:$0xf] %v388_v32  ;;  %v451_v37 = vld [vmem:[%s5825_s13 + $0x40] sm:$0xf]  ;;  %v797_v40 = vsel %vm5852_vm2, %v792_v33, %v796_v25  ;;  %v452_v41 = vld [vmem:[%s5825_s13 + $0x44] sm:$0x1] }
  0x5e   : > { %926 = vst [vmem:[#allocation2 + $0x124] sm:$0xf] %v787_v35  ;;  %v607_v42 = vshrl.u32 %v450_v36, 16  ;;  %v610_v43 = vshll.u32 %v450_v36, 16  ;;  %v616_v45 = vshll.u32 %v451_v37, 16  ;;  %v620_v46 = vshrl.u32 %v451_v37, 16 }
  0x5f   : > { %927 = vst [vmem:[#allocation2 + $0x130] sm:$0xf] %v797_v40  ;;  %v626_v47 = vshll.u32 %v452_v41, 16  ;;  %v474_v55 = vld [vmem:[%s5825_s13 + $0x9c] sm:$0xf] }
  0x60   : > { %421 = vst [vmem:[#allocation2 + $0x144] sm:$0xf] %v389_v34  ;;  %v609_v50 = vrot.slane %v607_v42, 4  ;;  %v612_v51 = vrot.slane %v610_v43, 5  ;;  %v618_v52 = vrot.slane %v616_v45, 5  ;;  %v622_v53 = vrot.slane %v620_v46, 4 }
  0x61   : > { %v475_v56 = vld [vmem:[%s5825_s13 + $0xa0] sm:$0xf]  ;;  %v628_v58 = vrot.slane %v626_v47, 5  ;;  %v476_v59 = vld [vmem:[%s5825_s13 + $0xa4] sm:$0x1]  ;;  %v799_v60 = vshrl.u32 %v474_v55, 16 }
  0x62   : > { %v613_v54 = vor.u32 %v612_v51, %v609_v50  ;;  %v623_v57 = vor.u32 %v622_v53, %v618_v52  ;;  %v802_v61 = vshll.u32 %v474_v55, 16  ;;  %v808_v63 = vshll.u32 %v475_v56, 16  ;;  %v374_v15 = vld [vmem:[%s5825_s13 + $0x48] sm:$0xf]  ;;  %v375_v16 = vld [vmem:[%s5825_s13 + $0x4c] sm:$0xf] }
  0x63   : > { %v812_v0 = vshrl.u32 %v475_v56, 16  ;;  %v801_v3 = vrot.slane %v799_v60, 4  ;;  %v818_v5 = vshll.u32 %v476_v59, 16  ;;  %406 = vst [vmem:[#allocation2 + $0x90] sm:$0xf] %v374_v15  ;;  %v5465_v9 = vld [vmem:[%s6701_s2 + $0x178] sm:$0xff] }
  0x64   : > { %1840 = vmatmul.bf16.gmra.mxu0 %v4362_v39  ;;  %1880 = vmatmul.bf16.gmra.mxu2 %v4458_v44  ;;  %v614_v62 = vrot.slane %v613_v54, 4  ;;  %v624_v2 = vrot.slane %v623_v57, 4  ;;  %v804_v4 = vrot.slane %v802_v61, 5  ;;  %v810_v7 = vrot.slane %v808_v63, 5  ;;  %v390_v18 = vld [vmem:[%s5825_s13 + $0xa8] sm:$0xf] }
  0x65   : > { %1929 = vmatmul.bf16.gmra.mxu1 %v4366_v48  ;;  %v814_v8 = vrot.slane %v812_v0, 4  ;;  %v820_v13 = vrot.slane %v818_v5, 5  ;;  %v4373_v19 = vld [vmem:[#allocation2 + $0x60] sm:$0xf]  ;;  %v5335_v20 = vld [vmem:[#allocation2 + $0x68] sm:$0xf0] }
  0x66   : > { %v619_v6 = vsel %vm5852_vm2, %v614_v62, %v618_v52  ;;  %v629_v11 = vsel %vm5852_vm2, %v624_v2, %v628_v58  ;;  %v805_v12 = vor.u32 %v804_v4, %v801_v3  ;;  %v4469_v21 = vld [vmem:[#allocation2 + $0x120] sm:$0xf]  ;;  %v5359_v22 = vld [vmem:[#allocation2 + $0x128] sm:$0xf0]  ;;  %407 = vst [vmem:[#allocation2 + $0x9c] sm:$0xf] %v375_v16  ;;  %v4374_v42 = vor.u32 %v5335_v20, %v4373_v19 }
  0x67   : > { %1969 = vmatmul.bf16.gmra.mxu3 %v4462_v49  ;;  %912 = vst [vmem:[#allocation2 + $0x7c] sm:$0xf] %v619_v6  ;;  %v815_v14 = vor.u32 %v814_v8, %v810_v7  ;;  %v391_v24 = vld [vmem:[%s5825_s13 + $0xac] sm:$0xf]  ;;  %v5334_v25 = vld [vmem:[#allocation2 + $0x64] sm:$0xf]  ;;  %v4470_v43 = vor.u32 %v5359_v22, %v4469_v21  ;;  %2808 = vmatpush.bf16.msrb.mxu1 %v5465_v9 }
  0x68   : > { %913 = vst [vmem:[#allocation2 + $0x88] sm:$0xf] %v629_v11  ;;  %v806_v17 = vrot.slane %v805_v12, 4  ;;  %v4375_v26 = vld [vmem:[#allocation2 + $0x6c] sm:$0xf0]  ;;  %v5387_v2 = vld [vmem:[%s6701_s2 + $0x88] sm:$0xff] }
  0x69   : > { %v816_v23 = vrot.slane %v815_v14, 4  ;;  %v5358_v27 = vld [vmem:[#allocation2 + $0x124] sm:$0xf]  ;;  %v4471_v28 = vld [vmem:[#allocation2 + $0x12c] sm:$0xf0]  ;;  %v4378_v46 = vor.u32 %v5334_v25, %v4375_v26  ;;  %v5443_v3 = vld [vmem:[%s6701_s2 + $0xc8] sm:$0xff]  ;;  %2001 = vmatpush.bf16.msrb.mxu2 %v5387_v2 }
  0x6a   : > { %v811_v29 = vsel %vm5852_vm2, %v806_v17, %v810_v7  ;;  %422 = vst [vmem:[#allocation2 + $0x150] sm:$0xf] %v390_v18  ;;  %v453_v30 = vld [vmem:[%s5825_s13 + $0x48] sm:$0xf]  ;;  %v454_v31 = vld [vmem:[%s5825_s13 + $0x4c] sm:$0xf]  ;;  %v4474_v47 = vor.u32 %v5358_v27, %v4471_v28  ;;  %2636 = vmatpush.bf16.msrb.mxu3 %v5443_v3 }
  0x6b   : > { %v821_v32 = vsel %vm5852_vm2, %v816_v23, %v820_v13  ;;  %928 = vst [vmem:[#allocation2 + $0x13c] sm:$0xf] %v811_v29  ;;  %v455_v33 = vld [vmem:[%s5825_s13 + $0x50] sm:$0x1]  ;;  %v631_v34 = vshrl.u32 %v453_v30, 16  ;;  %v634_v35 = vshll.u32 %v453_v30, 16 }
  0x6c   : > { %929 = vst [vmem:[#allocation2 + $0x148] sm:$0xf] %v821_v32  ;;  %v640_v36 = vshll.u32 %v454_v31, 16  ;;  %v644_v37 = vshrl.u32 %v454_v31, 16  ;;  %v650_v39 = vshll.u32 %v455_v33, 16  ;;  %v5451_v6 = vld [vmem:[%s6701_s2 + $0x108] sm:$0xff] }
  0x6d   : > { %423 = vst [vmem:[#allocation2 + $0x15c] sm:$0xf] %v391_v24  ;;  %v633_v40 = vrot.slane %v631_v34, 4  ;;  %v636_v41 = vrot.slane %v634_v35, 5  ;;  %v477_v49 = vld [vmem:[%s5825_s13 + $0xa8] sm:$0xf]  ;;  %2725 = vmatpush.bf16.msrb.mxu0 %v5451_v6 }
  0x6e   : > { %v642_v44 = vrot.slane %v640_v36, 5  ;;  %v646_v45 = vrot.slane %v644_v37, 4  ;;  %v478_v50 = vld [vmem:[%s5825_s13 + $0xac] sm:$0xf]  ;;  %v652_v52 = vrot.slane %v650_v39, 5  ;;  %v823_v54 = vshrl.u32 %v477_v49, 16 }
  0x6f   : > { %v637_v48 = vor.u32 %v636_v41, %v633_v40  ;;  %v479_v53 = vld [vmem:[%s5825_s13 + $0xb0] sm:$0x1]  ;;  %v826_v55 = vshll.u32 %v477_v49, 16  ;;  %v832_v57 = vshll.u32 %v478_v50, 16  ;;  %v836_v58 = vshrl.u32 %v478_v50, 16  ;;  %v5442_v3 = vld [vmem:[%s6701_s2 + $0xc0] sm:$0xff] }
  0x70   : > { %v647_v51 = vor.u32 %v646_v45, %v642_v44  ;;  %v825_v60 = vrot.slane %v823_v54, 4  ;;  %v842_v62 = vshll.u32 %v479_v53, 16  ;;  %v376_v10 = vld [vmem:[%s5825_s13 + $0x54] sm:$0xf]  ;;  %v377_v12 = vld [vmem:[%s5825_s13 + $0x58] sm:$0xf]  ;;  %2637 = vmatpush.bf16.msrb.mxu3 %v5442_v3 }
  0x71   : > { %v638_v56 = vrot.slane %v637_v48, 4  ;;  %v828_v61 = vrot.slane %v826_v55, 5  ;;  %v834_v0 = vrot.slane %v832_v57, 5  ;;  %v838_v1 = vrot.slane %v836_v58, 4  ;;  %408 = vst [vmem:[#allocation2 + $0xa8] sm:$0xf] %v376_v10 }
  0x72   : > { %v648_v59 = vrot.slane %v647_v51, 4  ;;  %v844_v8 = vrot.slane %v842_v62, 5  ;;  %v5464_v14 = vld [vmem:[%s6701_s2 + $0x170] sm:$0xff]  ;;  %409 = vst [vmem:[#allocation2 + $0xb4] sm:$0xf] %v377_v12  ;;  %v5462_v6 = vld [vmem:[%s6701_s2 + $0x160] sm:$0xff] }
  0x73   : > { %v643_v63 = vsel %vm5852_vm2, %v638_v56, %v642_v44  ;;  %v829_v5 = vor.u32 %v828_v61, %v825_v60  ;;  %v839_v7 = vor.u32 %v838_v1, %v834_v0  ;;  %v456_v15 = vld [vmem:[%s5825_s13 + $0x54] sm:$0xf]  ;;  %v4385_v16 = vld [vmem:[#allocation2 + $0x78] sm:$0xf]  ;;  %v5338_v17 = vld [vmem:[#allocation2 + $0x80] sm:$0xf0]  ;;  %2809 = vmatpush.bf16.msrb.mxu1 %v5464_v14 }
  0x74   : > { %1845 = vmatmul.bf16.gmra.mxu0 %v4374_v42  ;;  %1885 = vmatmul.bf16.gmra.mxu2 %v4470_v43  ;;  %v653_v4 = vsel %vm5852_vm2, %v648_v59, %v652_v52  ;;  %914 = vst [vmem:[#allocation2 + $0x94] sm:$0xf] %v643_v63  ;;  %v392_v19 = vld [vmem:[%s5825_s13 + $0xb4] sm:$0xf]  ;;  %v393_v20 = vld [vmem:[%s5825_s13 + $0xb8] sm:$0xf]  ;;  %v4386_v40 = vor.u32 %v5338_v17, %v4385_v16 }
  0x75   : > { %1934 = vmatmul.bf16.gmra.mxu1 %v4378_v46  ;;  %915 = vst [vmem:[#allocation2 + $0xa0] sm:$0xf] %v653_v4  ;;  %v830_v11 = vrot.slane %v829_v5, 4  ;;  %v840_v13 = vrot.slane %v839_v7, 4  ;;  %v457_v21 = vld [vmem:[%s5825_s13 + $0x58] sm:$0xf] }
  0x76   : > { %v4481_v22 = vld [vmem:[#allocation2 + $0x138] sm:$0xf]  ;;  %v5362_v23 = vld [vmem:[#allocation2 + $0x140] sm:$0xf0]  ;;  %v5337_v24 = vld [vmem:[#allocation2 + $0x7c] sm:$0xf] }
  0x77   : > { %1974 = vmatmul.bf16.gmra.mxu3 %v4474_v47  ;;  %v835_v18 = vsel %vm5852_vm2, %v830_v11, %v834_v0  ;;  %v4387_v25 = vld [vmem:[#allocation2 + $0x84] sm:$0xf0]  ;;  %v845_v26 = vsel %vm5852_vm2, %v840_v13, %v844_v8  ;;  %v458_v27 = vld [vmem:[%s5825_s13 + $0x5c] sm:$0x1]  ;;  %v655_v28 = vshrl.u32 %v456_v15, 16  ;;  %v658_v29 = vshll.u32 %v456_v15, 16 }
  0x78   : > { %930 = vst [vmem:[#allocation2 + $0x154] sm:$0xf] %v835_v18  ;;  %v664_v30 = vshll.u32 %v457_v21, 16  ;;  %v668_v31 = vshrl.u32 %v457_v21, 16  ;;  %v674_v32 = vshll.u32 %v458_v27, 16  ;;  %v4482_v43 = vor.u32 %v5362_v23, %v4481_v22  ;;  %v5386_v0 = vld [vmem:[%s6701_s2 + $0x80] sm:$0xff] }
  0x79   : > { %931 = vst [vmem:[#allocation2 + $0x160] sm:$0xf] %v845_v26  ;;  %v5361_v33 = vld [vmem:[#allocation2 + $0x13c] sm:$0xf]  ;;  %v657_v34 = vrot.slane %v655_v28, 4  ;;  %v660_v35 = vrot.slane %v658_v29, 5  ;;  %v4390_v44 = vor.u32 %v5337_v24, %v4387_v25  ;;  %2002 = vmatpush.bf16.msrb.mxu2 %v5386_v0 }
  0x7a   : > { %424 = vst [vmem:[#allocation2 + $0x168] sm:$0xf] %v392_v19  ;;  %v4483_v36 = vld [vmem:[#allocation2 + $0x144] sm:$0xf0]  ;;  %v666_v37 = vrot.slane %v664_v30, 5  ;;  %v670_v39 = vrot.slane %v668_v31, 4 }
  0x7b   : > { %425 = vst [vmem:[#allocation2 + $0x174] sm:$0xf] %v393_v20  ;;  %v661_v41 = vor.u32 %v660_v35, %v657_v34  ;;  %v480_v42 = vld [vmem:[%s5825_s13 + $0xb4] sm:$0xf]  ;;  %v676_v46 = vrot.slane %v674_v32, 5  ;;  %v4486_v49 = vor.u32 %v5361_v33, %v4483_v36  ;;  %v5463_v4 = vld [vmem:[%s6701_s2 + $0x168] sm:$0xff] }
  0x7c   : > { %v671_v45 = vor.u32 %v670_v39, %v666_v37  ;;  %v481_v47 = vld [vmem:[%s5825_s13 + $0xb8] sm:$0xf]  ;;  %v482_v48 = vld [vmem:[%s5825_s13 + $0xbc] sm:$0x1]  ;;  %v847_v51 = vshrl.u32 %v480_v42, 16  ;;  %v850_v52 = vshll.u32 %v480_v42, 16  ;;  %2810 = vmatpush.bf16.msrb.mxu1 %v5463_v4 }
  0x7d   : > { %v662_v50 = vrot.slane %v661_v41, 4  ;;  %v856_v54 = vshll.u32 %v481_v47, 16  ;;  %v860_v55 = vshrl.u32 %v481_v47, 16  ;;  %v866_v56 = vshll.u32 %v482_v48, 16  ;;  %v5450_v7 = vld [vmem:[%s6701_s2 + $0x100] sm:$0xff]  ;;  %v5461_v25 = vld [vmem:[%s6701_s2 + $0x158] sm:$0xff] }
  0x7e   : > { %v672_v53 = vrot.slane %v671_v45, 4  ;;  %v849_v58 = vrot.slane %v847_v51, 4  ;;  %v852_v59 = vrot.slane %v850_v52, 5  ;;  %v996_v8 = vld [vmem:[%s5825_s13] sm:$0xe]  ;;  %2726 = vmatpush.bf16.msrb.mxu0 %v5450_v7  ;;  %v5460_v42 = vld [vmem:[%s6701_s2 + $0x150] sm:$0xff] }
  0x7f   : > { %v667_v57 = vsel %vm5852_vm2, %v662_v50, %v666_v37  ;;  %v858_v61 = vrot.slane %v856_v54, 5  ;;  %v862_v62 = vrot.slane %v860_v55, 4  ;;  %v868_v2 = vrot.slane %v866_v56, 5  ;;  %v997_v10 = vld [vmem:[%s5825_s13 + $0x4] sm:$0xf]  ;;  %v5521_v45 = vld [vmem:[%s6701_s2 + $0x1b8] sm:$0xff] }
  0x80   : > { %v677_v60 = vsel %vm5852_vm2, %v672_v53, %v676_v46  ;;  %916 = vst [vmem:[#allocation2 + $0xac] sm:$0xf] %v667_v57  ;;  %v853_v63 = vor.u32 %v852_v59, %v849_v58  ;;  %v998_v11 = vld [vmem:[%s5825_s13 + $0x8] sm:$0x1]  ;;  %v4305_v13 = vrot.slane %v996_v8, 9  ;;  %v1097_v14 = vrot.slane %v997_v10, 5  ;;  %2811 = vmatpush.bf16.msrb.mxu1 %v5462_v6  ;;  %3507 = vmatpush.bf16.msra.mxu2 %v5521_v45 }
  0x81   : > { %917 = vst [vmem:[#allocation2 + $0xb8] sm:$0xf] %v677_v60  ;;  %v863_v1 = vor.u32 %v862_v62, %v858_v61  ;;  %v4397_v15 = vld [vmem:[#allocation2 + $0x90] sm:$0xf]  ;;  %v5341_v16 = vld [vmem:[#allocation2 + $0x98] sm:$0xf0] }
  0x82   : > { %v854_v5 = vrot.slane %v853_v63, 4  ;;  %v1100_v19 = vrot.slane %v998_v11, 5  ;;  %v4493_v20 = vld [vmem:[#allocation2 + $0x150] sm:$0xf]  ;;  %v5365_v21 = vld [vmem:[#allocation2 + $0x158] sm:$0xf0]  ;;  %v1098_v22 = vsel %vm6097_vm5, %v4305_v13, %v1097_v14  ;;  %v4398_v32 = vor.u32 %v5341_v16, %v4397_v15 }
  0x83   : > { %v864_v9 = vrot.slane %v863_v1, 4  ;;  %v1099_v23 = vrot.slane %v1097_v14, 4  ;;  %v5340_v24 = vld [vmem:[#allocation2 + $0x94] sm:$0xf]  ;;  %1239 = vst [vmem:[#allocation2 + $0x8] sm:$0xf] %v1098_v22  ;;  %v4494_v35 = vor.u32 %v5365_v21, %v4493_v20 }
  0x84   : > { %1850 = vmatmul.bf16.gmra.mxu0 %v4386_v40  ;;  %1890 = vmatmul.bf16.gmra.mxu2 %v4482_v43  ;;  %v859_v12 = vsel %vm5852_vm2, %v854_v5, %v858_v61  ;;  %v4399_v26 = vld [vmem:[#allocation2 + $0x9c] sm:$0xf0]  ;;  %v5364_v27 = vld [vmem:[#allocation2 + $0x154] sm:$0xf]  ;;  %v1000_v29 = vld [vmem:[%s5825_s13 + $0x10] sm:$0xf] }
  0x85   : > { %1939 = vmatmul.bf16.gmra.mxu1 %v4390_v44  ;;  %v869_v17 = vsel %vm5852_vm2, %v864_v9, %v868_v2  ;;  %932 = vst [vmem:[#allocation2 + $0x16c] sm:$0xf] %v859_v12  ;;  %v1101_v28 = vsel %vm6097_vm5, %v1099_v23, %v1100_v19  ;;  %v4495_v30 = vld [vmem:[#allocation2 + $0x15c] sm:$0xf0]  ;;  %v1104_v31 = vrot.slane %v1000_v29, 5  ;;  %v4402_v40 = vor.u32 %v5340_v24, %v4399_v26  ;;  %v5529_v46 = vld [vmem:[%s6701_s2 + $0x1f8] sm:$0xff] }
  0x86   : > { %933 = vst [vmem:[#allocation2 + $0x178] sm:$0xf] %v869_v17  ;;  %v999_v33 = vld [vmem:[%s5825_s13 + $0xc] sm:$0xe]  ;;  %v1001_v34 = vld [vmem:[%s5825_s13 + $0x14] sm:$0x1]  ;;  %2812 = vmatpush.bf16.msrb.mxu1 %v5461_v25  ;;  %v4498_v41 = vor.u32 %v5364_v27, %v4495_v30  ;;  %3596 = vmatpush.bf16.msra.mxu3 %v5529_v46 }
  0x87   : > { %1979 = vmatmul.bf16.gmra.mxu3 %v4486_v49  ;;  %1240 = vst [vmem:[#allocation2 + $0x14] sm:$0xf] %v1101_v28  ;;  %v4306_v36 = vrot.slane %v999_v33, 9  ;;  %v1106_v37 = vrot.slane %v1104_v31, 4  ;;  %v1107_v39 = vrot.slane %v1001_v34, 5  ;;  %v5459_v47 = vld [vmem:[%s6701_s2 + $0x148] sm:$0xff] }
  0x88   : > { %v5458_v48 = vld [vmem:[%s6701_s2 + $0x140] sm:$0xff]  ;;  %v4409_v49 = vld [vmem:[#allocation2 + $0xa8] sm:$0xf]  ;;  %v5537_v50 = vld [vmem:[%s6701_s2 + $0x238] sm:$0xff] }
  0x89   : > { %v1105_v43 = vsel %vm6097_vm5, %v4306_v36, %v1104_v31  ;;  %v1108_v44 = vsel %vm6097_vm5, %v1106_v37, %v1107_v39  ;;  %v5344_v51 = vld [vmem:[#allocation2 + $0xb0] sm:$0xf0]  ;;  %v4505_v52 = vld [vmem:[#allocation2 + $0x168] sm:$0xf]  ;;  %v5343_v54 = vld [vmem:[#allocation2 + $0xac] sm:$0xf]  ;;  %3685 = vmatpush.bf16.msra.mxu0 %v5537_v50 }
  0x8a   : > { %1241 = vst [vmem:[#allocation2 + $0x20] sm:$0xf] %v1105_v43  ;;  %2813 = vmatpush.bf16.msrb.mxu1 %v5460_v42  ;;  %v5368_v53 = vld [vmem:[#allocation2 + $0x170] sm:$0xf0]  ;;  %v4411_v55 = vld [vmem:[#allocation2 + $0xb4] sm:$0xf0]  ;;  %v4410_v60 = vor.u32 %v5344_v51, %v4409_v49 }
  0x8b   : > { %1242 = vst [vmem:[#allocation2 + $0x2c] sm:$0xf] %v1108_v44  ;;  %v1003_v56 = vld [vmem:[%s5825_s13 + $0x1c] sm:$0xf]  ;;  %v1002_v61 = vld [vmem:[%s5825_s13 + $0x18] sm:$0xe]  ;;  %v4506_v63 = vor.u32 %v5368_v53, %v4505_v52  ;;  %v4414_v3 = vor.u32 %v5343_v54, %v4411_v55 }
  0x8c   : > { %v5367_v57 = vld [vmem:[#allocation2 + $0x16c] sm:$0xf]  ;;  %v1111_v59 = vrot.slane %v1003_v56, 5  ;;  %v1004_v62 = vld [vmem:[%s5825_s13 + $0x20] sm:$0x1]  ;;  %v4307_v0 = vrot.slane %v1002_v61, 9 }
  0x8d   : > { %v4507_v58 = vld [vmem:[#allocation2 + $0x174] sm:$0xf0]  ;;  %v1114_v2 = vrot.slane %v1004_v62, 5  ;;  %v5395_v8 = vld [vmem:[#allocation2 + $0x20] sm:$0xf0]  ;;  %v5528_v33 = vld [vmem:[%s6701_s2 + $0x1f0] sm:$0xff] }
  0x8e   : > { %2814 = vmatpush.bf16.msrb.mxu1 %v5459_v47  ;;  %v1113_v1 = vrot.slane %v1111_v59, 4  ;;  %v4510_v4 = vor.u32 %v5367_v57, %v4507_v58  ;;  %v1112_v5 = vsel %vm6097_vm5, %v4307_v0, %v1111_v59  ;;  %v4661_v7 = vld [vmem:[#allocation2 + $0x18] sm:$0xf]  ;;  %v5394_v9 = vld [vmem:[#allocation2 + $0x1c] sm:$0xf]  ;;  %3597 = vmatpush.bf16.msra.mxu3 %v5528_v33  ;;  %v5536_v42 = vld [vmem:[%s6701_s2 + $0x230] sm:$0xff] }
  0x8f   : > { %1243 = vst [vmem:[#allocation2 + $0x38] sm:$0xf] %v1112_v5  ;;  %v4663_v10 = vld [vmem:[#allocation2 + $0x24] sm:$0xf0]  ;;  %v5324_v12 = vld [vmem:[#allocation2 + $0x10] sm:$0xf0]  ;;  %v4662_v26 = vor.u32 %v5395_v8, %v4661_v7  ;;  %3686 = vmatpush.bf16.msra.mxu0 %v5536_v42 }
  0x90   : > { %v1115_v6 = vsel %vm6097_vm5, %v1113_v1, %v1114_v2  ;;  %v4333_v11 = vld [vmem:[#allocation2 + $0x8] sm:$0xf]  ;;  %v4666_v17 = vor.u32 %v5394_v9, %v4663_v10  ;;  %v1005_v19 = vld [vmem:[%s5825_s13 + $0x24] sm:$0xe]  ;;  %v1007_v20 = vld [vmem:[%s5825_s13 + $0x2c] sm:$0x1] }
  0x91   : > { %1244 = vst [vmem:[#allocation2 + $0x44] sm:$0xf] %v1115_v6  ;;  %v1006_v13 = vld [vmem:[%s5825_s13 + $0x28] sm:$0xf]  ;;  %v4669_v14 = vld [vmem:[#allocation2 + $0x20] sm:$0xf]  ;;  %v4334_v21 = vor.u32 %v5324_v12, %v4333_v11 }
  0x92   : > { %2815 = vmatpush.bf16.msrb.mxu1 %v5458_v48  ;;  %v5396_v15 = vld [vmem:[#allocation2 + $0x28] sm:$0xf0]  ;;  %v1118_v16 = vrot.slane %v1006_v13, 5  ;;  %v4308_v22 = vrot.slane %v1005_v19, 9  ;;  %v1121_v24 = vrot.slane %v1007_v20, 5 }
  0x93   : > { %v4670_v27 = vor.u32 %v5396_v15, %v4669_v14  ;;  %v5327_v43 = vld [vmem:[#allocation2 + $0x28] sm:$0xf0]  ;;  %v4673_v44 = vld [vmem:[#allocation2 + $0x30] sm:$0xf]  ;;  %v5398_v45 = vld [vmem:[#allocation2 + $0x38] sm:$0xf0] }
  0x94   : > { %1855 = vmatmul.bf16.gmra.mxu0 %v4398_v32  ;;  %1895 = vmatmul.bf16.gmra.mxu2 %v4494_v35  ;;  %v1120_v23 = vrot.slane %v1118_v16, 4  ;;  %v1119_v29 = vsel %vm6097_vm5, %v4308_v22, %v1118_v16  ;;  %v5520_v32 = vld [vmem:[%s6701_s2 + $0x1b0] sm:$0xff]  ;;  %v4675_v47 = vld [vmem:[#allocation2 + $0x3c] sm:$0xf0]  ;;  %v1010_v55 = vld [vmem:[%s5825_s13 + $0x38] sm:$0x1] }
  0x95   : > { %1944 = vmatmul.bf16.gmra.mxu1 %v4402_v40  ;;  %1245 = vst [vmem:[#allocation2 + $0x50] sm:$0xf] %v1119_v29  ;;  %3508 = vmatpush.bf16.msra.mxu2 %v5520_v32  ;;  %v5397_v46 = vld [vmem:[#allocation2 + $0x34] sm:$0xf]  ;;  %v1008_v54 = vld [vmem:[%s5825_s13 + $0x30] sm:$0xe] }
  0x96   : > { %v1122_v30 = vsel %vm6097_vm5, %v1120_v23, %v1121_v24  ;;  %v1009_v48 = vld [vmem:[%s5825_s13 + $0x34] sm:$0xf]  ;;  %v4681_v49 = vld [vmem:[#allocation2 + $0x38] sm:$0xf]  ;;  %v4678_v57 = vor.u32 %v5397_v46, %v4675_v47  ;;  %v4309_v58 = vrot.slane %v1008_v54, 9 }
  0x97   : > { %1984 = vmatmul.bf16.gmra.mxu3 %v4498_v41  ;;  %1246 = vst [vmem:[#allocation2 + $0x5c] sm:$0xf] %v1122_v30  ;;  %v4345_v41 = vld [vmem:[#allocation2 + $0x20] sm:$0xf]  ;;  %v1125_v51 = vrot.slane %v1009_v48, 5 }
  0x98   : > { %v5399_v50 = vld [vmem:[#allocation2 + $0x40] sm:$0xf0]  ;;  %v4346_v53 = vor.u32 %v5327_v43, %v4345_v41  ;;  %v4357_v11 = vld [vmem:[#allocation2 + $0x38] sm:$0xf]  ;;  %v4685_v13 = vld [vmem:[#allocation2 + $0x48] sm:$0xf] }
  0x99   : > { %v1127_v59 = vrot.slane %v1125_v51, 4  ;;  %v4682_v0 = vor.u32 %v5399_v50, %v4681_v49  ;;  %v1126_v2 = vsel %vm6097_vm5, %v4309_v58, %v1125_v51  ;;  %v5330_v12 = vld [vmem:[#allocation2 + $0x40] sm:$0xf0]  ;;  %v5401_v14 = vld [vmem:[#allocation2 + $0x50] sm:$0xf0]  ;;  %v5519_v43 = vld [vmem:[%s6701_s2 + $0x1a8] sm:$0xff] }
  0x9a   : > { %1247 = vst [vmem:[#allocation2 + $0x68] sm:$0xf] %v1126_v2  ;;  %v5400_v15 = vld [vmem:[#allocation2 + $0x4c] sm:$0xf]  ;;  %v4687_v16 = vld [vmem:[#allocation2 + $0x54] sm:$0xf0]  ;;  %v4358_v23 = vor.u32 %v5330_v12, %v4357_v11  ;;  %3509 = vmatpush.bf16.msra.mxu2 %v5519_v43 }
  0x9b   : > { %v1011_v24 = vld [vmem:[%s5825_s13 + $0x3c] sm:$0xe]  ;;  %v4697_v54 = vld [vmem:[#allocation2 + $0x60] sm:$0xf]  ;;  %v1015_v58 = vld [vmem:[%s5825_s13 + $0x4c] sm:$0xf] }
  0x9c   : > { %v4693_v19 = vld [vmem:[#allocation2 + $0x50] sm:$0xf] }
  0x9d   : > { %v4369_v51 = vld [vmem:[#allocation2 + $0x50] sm:$0xf] }
  0x9e   : > { %v5402_v20 = vld [vmem:[#allocation2 + $0x58] sm:$0xf0]  ;;  %v1016_v2 = vld [vmem:[%s5825_s13 + $0x50] sm:$0x1] }
  0xa4   : > { %1860 = vmatmul.bf16.gmra.mxu0 %v4410_v60  ;;  %1900 = vmatmul.bf16.gmra.mxu2 %v4506_v63  ;;  %v1128_v60 = vrot.slane %v1010_v55, 5  ;;  %v4674_v63 = vor.u32 %v5398_v45, %v4673_v44  ;;  %v5527_v44 = vld [vmem:[%s6701_s2 + $0x1e8] sm:$0xff] }
  0xa5   : > { %1949 = vmatmul.bf16.gmra.mxu1 %v4414_v3  ;;  %3598 = vmatpush.bf16.msra.mxu3 %v5527_v44  ;;  %v5404_v55 = vld [vmem:[#allocation2 + $0x68] sm:$0xf0]  ;;  %v1017_v44 = vld [vmem:[%s5825_s13 + $0x54] sm:$0xe] }
  0xa6   : > { %v1129_v3 = vsel %vm6097_vm5, %v1127_v59, %v1128_v60  ;;  %v4705_v59 = vld [vmem:[#allocation2 + $0x68] sm:$0xf] }
  0xa7   : > { %1989 = vmatmul.bf16.gmra.mxu3 %v4510_v4  ;;  %1248 = vst [vmem:[#allocation2 + $0x74] sm:$0xf] %v1129_v3 }
  0xae   : > { %v5405_v60 = vld [vmem:[#allocation2 + $0x70] sm:$0xf0] }
  0xb1   : > { %v1826_v25 = vpop.f32.mrf.mxu0 }
  0xb2   : > { %v1915_v28 = vpop.f32.mrf.mxu1 }
  0xb3   : > { %v6147_v31 = vadd.f32 %v1915_v28, %v1826_v25  ;;  %v1013_v25 = vld [vmem:[%s5825_s13 + $0x44] sm:$0x1]  ;;  %v4310_v28 = vrot.slane %v1011_v24, 9 }
  0xb4   : > { %2003 = vmatmul.bf16.vlgmr.msrb.gmra.mxu2 %v4334_v21  ;;  %2727 = vmatmul.bf16.vlgmr.msrb.gmra.mxu0 %v4666_v17  ;;  %v1012_v17 = vld [vmem:[%s5825_s13 + $0x40] sm:$0xf]  ;;  %v1135_v30 = vrot.slane %v1013_v25, 5 }
  0xb5   : > { %2816 = vmatmul.bf16.vlgmr.msrb.gmra.mxu1 %v4670_v27  ;;  %v1132_v21 = vrot.slane %v1012_v17, 5  ;;  %v4690_v27 = vor.u32 %v5400_v15, %v4687_v16 }
  0xb7   : > { %2638 = vmatmul.bf16.vlgmr.msrb.gmra.mxu3 %v4662_v26  ;;  %v1866_v34 = vpop.f32.mrf.mxu2  ;;  %v1134_v29 = vrot.slane %v1132_v21, 4 }
  0xb9   : > { %v1828_v37 = vpop.f32.mrf.mxu0  ;;  %v1136_v41 = vsel %vm6097_vm5, %v1134_v29, %v1135_v30  ;;  %v5407_v29 = vld [vmem:[#allocation2 + $0x80] sm:$0xf0]  ;;  %v5406_v30 = vld [vmem:[#allocation2 + $0x7c] sm:$0xf] }
  0xba   : > { %v1955_v35 = vpop.f32.mrf.mxu3  ;;  %v1917_v39 = vpop.f32.mrf.mxu1  ;;  %1250 = vst [vmem:[#allocation2 + $0x8c] sm:$0xf] %v1136_v41 }
  0xbb   : > { %v6155_v36 = vadd.f32 %v1955_v35, %v1866_v34  ;;  %v6157_v40 = vadd.f32 %v1917_v39, %v1828_v37  ;;  %v4686_v34 = vor.u32 %v5401_v14, %v4685_v13  ;;  %v4694_v35 = vor.u32 %v5402_v20, %v4693_v19 }
  0xbc   : > { %v1133_v39 = vsel %vm6097_vm5, %v4310_v28, %v1132_v21  ;;  %v4698_v13 = vor.u32 %v5404_v55, %v4697_v54  ;;  %v4706_v14 = vor.u32 %v5405_v60, %v4705_v59  ;;  %v4709_v28 = vld [vmem:[#allocation2 + $0x78] sm:$0xf] }
  0xbd   : > { %1249 = vst [vmem:[#allocation2 + $0x80] sm:$0xf] %v1133_v39  ;;  %v4710_v55 = vor.u32 %v5407_v29, %v4709_v28  ;;  %v1022_v28 = vld [vmem:[%s5825_s13 + $0x68] sm:$0x1] }
  0xbf   : > { %v1868_v52 = vpop.f32.mrf.mxu2 }
  0xc1   : > { %v1831_v62 = vpop.f32.mrf.mxu0 }
  0xc2   : > { %v1957_v56 = vpop.f32.mrf.mxu3  ;;  %v1920_v1 = vpop.f32.mrf.mxu1 }
  0xc3   : > { %v6165_v61 = vadd.f32 %v1957_v56, %v1868_v52  ;;  %v6171_v4 = vadd.f32 %v1920_v1, %v1831_v62  ;;  %v5535_v52 = vld [vmem:[%s6701_s2 + $0x228] sm:$0xff]  ;;  %v5403_v56 = vld [vmem:[#allocation2 + $0x64] sm:$0xf]  ;;  %v1139_v62 = vrot.slane %v1015_v58, 5 }
  0xc4   : > { %2008 = vmatmul.bf16.gmra.mxu2 %v4346_v53  ;;  %2732 = vmatmul.bf16.gmra.mxu0 %v4678_v57  ;;  %v5333_v53 = vld [vmem:[#allocation2 + $0x58] sm:$0xf0]  ;;  %v4699_v57 = vld [vmem:[#allocation2 + $0x6c] sm:$0xf0]  ;;  %v1014_v1 = vld [vmem:[%s5825_s13 + $0x48] sm:$0xe] }
  0xc5   : > { %2821 = vmatmul.bf16.gmra.mxu1 %v4682_v0  ;;  %3687 = vmatpush.bf16.msra.mxu0 %v5535_v52  ;;  %v4370_v0 = vor.u32 %v5333_v53, %v4369_v51 }
  0xc7   : > { %2643 = vmatmul.bf16.gmra.mxu3 %v4674_v63  ;;  %v1871_v5 = vpop.f32.mrf.mxu2 }
  0xc9   : > { %v1833_v8 = vpop.f32.mrf.mxu0 }
  0xca   : > { %v1960_v6 = vpop.f32.mrf.mxu3  ;;  %v1922_v9 = vpop.f32.mrf.mxu1 }
  0xcb   : > { %v6173_v7 = vadd.f32 %v1960_v6, %v1871_v5  ;;  %v6175_v10 = vadd.f32 %v1922_v9, %v1833_v8  ;;  %v4702_v5 = vor.u32 %v5403_v56, %v4699_v57  ;;  %v4311_v6 = vrot.slane %v1014_v1, 9 }
  0xcc   : > { %v1141_v8 = vrot.slane %v1139_v62, 4  ;;  %v1142_v9 = vrot.slane %v1016_v2, 5 }
  0xcd   : > { %v1140_v16 = vsel %vm6097_vm5, %v4311_v6, %v1139_v62  ;;  %v5518_v62 = vld [vmem:[%s6701_s2 + $0x1a0] sm:$0xff] }
  0xce   : > { %v1143_v17 = vsel %vm6097_vm5, %v1141_v8, %v1142_v9  ;;  %1251 = vst [vmem:[#allocation2 + $0x98] sm:$0xf] %v1140_v16  ;;  %3510 = vmatpush.bf16.msra.mxu2 %v5518_v62  ;;  %v4393_v8 = vld [vmem:[#allocation2 + $0x80] sm:$0xf]  ;;  %v5413_v62 = vld [vmem:[#allocation2 + $0xb0] sm:$0xf0] }
  0xcf   : > { %v1873_v22 = vpop.f32.mrf.mxu2  ;;  %1252 = vst [vmem:[#allocation2 + $0xa4] sm:$0xf] %v1143_v17  ;;  %v5534_v9 = vld [vmem:[%s6701_s2 + $0x220] sm:$0xff] }
  0xd0   : > { %v4723_v16 = vld [vmem:[#allocation2 + $0x9c] sm:$0xf0]  ;;  %3688 = vmatpush.bf16.msra.mxu0 %v5534_v9  ;;  %v1021_v17 = vld [vmem:[%s5825_s13 + $0x64] sm:$0xf] }
  0xd1   : > { %v1836_v33 = vpop.f32.mrf.mxu0 }
  0xd2   : > { %v1962_v26 = vpop.f32.mrf.mxu3  ;;  %v1925_v37 = vpop.f32.mrf.mxu1 }
  0xd3   : > { %v6180_v32 = vadd.f32 %v1962_v26, %v1873_v22  ;;  %v6186_v42 = vadd.f32 %v1925_v37, %v1836_v33  ;;  %v4381_v26 = vld [vmem:[#allocation2 + $0x68] sm:$0xf]  ;;  %v5408_v37 = vld [vmem:[#allocation2 + $0x88] sm:$0xf0] }
  0xd4   : > { %2013 = vmatmul.bf16.gmra.mxu2 %v4358_v23  ;;  %2737 = vmatmul.bf16.gmra.mxu0 %v4690_v27  ;;  %v5336_v27 = vld [vmem:[#allocation2 + $0x70] sm:$0xf0]  ;;  %v4711_v33 = vld [vmem:[#allocation2 + $0x84] sm:$0xf0] }
  0xd5   : > { %2826 = vmatmul.bf16.gmra.mxu1 %v4694_v35  ;;  %v4717_v35 = vld [vmem:[#allocation2 + $0x80] sm:$0xf]  ;;  %v4382_v43 = vor.u32 %v5336_v27, %v4381_v26 }
  0xd6   : > { %v4718_v56 = vor.u32 %v5408_v37, %v4717_v35  ;;  %v1020_v27 = vld [vmem:[%s5825_s13 + $0x60] sm:$0xe]  ;;  %v1156_v35 = vrot.slane %v1022_v28, 5 }
  0xd7   : > { %2648 = vmatmul.bf16.gmra.mxu3 %v4686_v34  ;;  %v1876_v45 = vpop.f32.mrf.mxu2  ;;  %v1018_v34 = vld [vmem:[%s5825_s13 + $0x58] sm:$0xf] }
  0xd8   : > { %v1146_v39 = vrot.slane %v1018_v34, 5 }
  0xd9   : > { %v1838_v48 = vpop.f32.mrf.mxu0 }
  0xda   : > { %v1965_v46 = vpop.f32.mrf.mxu3  ;;  %v1927_v49 = vpop.f32.mrf.mxu1  ;;  %v1148_v51 = vrot.slane %v1146_v39, 4 }
  0xdb   : > { %v6194_v47 = vadd.f32 %v1965_v46, %v1876_v45  ;;  %v6196_v50 = vadd.f32 %v1927_v49, %v1838_v48  ;;  %v1019_v45 = vld [vmem:[%s5825_s13 + $0x5c] sm:$0x1]  ;;  %v4714_v48 = vor.u32 %v5406_v30, %v4711_v33  ;;  %v4312_v49 = vrot.slane %v1017_v44, 9 }
  0xdc   : > { %v1149_v52 = vrot.slane %v1019_v45, 5  ;;  %v4313_v33 = vrot.slane %v1020_v27, 9 }
  0xdd   : > { %v1147_v58 = vsel %vm6097_vm5, %v4312_v49, %v1146_v39 }
  0xde   : > { %v1150_v59 = vsel %vm6097_vm5, %v1148_v51, %v1149_v52  ;;  %1253 = vst [vmem:[#allocation2 + $0xb0] sm:$0xf] %v1147_v58  ;;  %v5342_v58 = vld [vmem:[#allocation2 + $0xa0] sm:$0xf0] }
  0xdf   : > { %v1878_v63 = vpop.f32.mrf.mxu2  ;;  %1254 = vst [vmem:[#allocation2 + $0xbc] sm:$0xf] %v1150_v59  ;;  %v4733_v59 = vld [vmem:[#allocation2 + $0xa8] sm:$0xf] }
  0xe1   : > { %v1841_v12 = vpop.f32.mrf.mxu0 }
  0xe2   : > { %v1967_v3 = vpop.f32.mrf.mxu3  ;;  %v1930_v15 = vpop.f32.mrf.mxu1 }
  0xe3   : > { %v6204_v11 = vadd.f32 %v1967_v3, %v1878_v63  ;;  %v6210_v19 = vadd.f32 %v1930_v15, %v1841_v12  ;;  %v5526_v63 = vld [vmem:[%s6701_s2 + $0x1e0] sm:$0xff]  ;;  %v5339_v12 = vld [vmem:[#allocation2 + $0x88] sm:$0xf0]  ;;  %v5409_v15 = vld [vmem:[#allocation2 + $0x94] sm:$0xf] }
  0xe4   : > { %2018 = vmatmul.bf16.gmra.mxu2 %v4370_v0  ;;  %2742 = vmatmul.bf16.gmra.mxu0 %v4702_v5  ;;  %v4394_v26 = vor.u32 %v5339_v12, %v4393_v8  ;;  %v4726_v30 = vor.u32 %v5409_v15, %v4723_v16 }
  0xe5   : > { %2831 = vmatmul.bf16.gmra.mxu1 %v4706_v14  ;;  %3599 = vmatpush.bf16.msra.mxu3 %v5526_v63  ;;  %v5410_v14 = vld [vmem:[#allocation2 + $0x98] sm:$0xf0]  ;;  %v5412_v63 = vld [vmem:[#allocation2 + $0xac] sm:$0xf] }
  0xe7   : > { %2653 = vmatmul.bf16.gmra.mxu3 %v4698_v13  ;;  %v1881_v20 = vpop.f32.mrf.mxu2  ;;  %v4721_v13 = vld [vmem:[#allocation2 + $0x90] sm:$0xf] }
  0xe9   : > { %v1843_v23 = vpop.f32.mrf.mxu0 }
  0xea   : > { %v1970_v21 = vpop.f32.mrf.mxu3  ;;  %v1932_v24 = vpop.f32.mrf.mxu1 }
  0xeb   : > { %v6212_v22 = vadd.f32 %v1970_v21, %v1881_v20  ;;  %v6214_v25 = vadd.f32 %v1932_v24, %v1843_v23  ;;  %v4729_v20 = vld [vmem:[#allocation2 + $0x98] sm:$0xf]  ;;  %v5411_v21 = vld [vmem:[#allocation2 + $0xa0] sm:$0xf0]  ;;  %v1153_v23 = vrot.slane %v1021_v17, 5 }
  0xed   : > { %v1155_v34 = vrot.slane %v1153_v23, 4  ;;  %v1154_v45 = vsel %vm6097_vm5, %v4313_v33, %v1153_v23 }
  0xee   : > { %1255 = vst [vmem:[#allocation2 + $0xc8] sm:$0xf] %v1154_v45 }
  0xef   : > { %v1883_v41 = vpop.f32.mrf.mxu2 }
  0xf1   : > { %v1846_v54 = vpop.f32.mrf.mxu0 }
  0xf2   : > { %v1972_v46 = vpop.f32.mrf.mxu3  ;;  %v1935_v57 = vpop.f32.mrf.mxu1 }
  0xf3   : > { %v6219_v53 = vadd.f32 %v1972_v46, %v1883_v41  ;;  %v6225_v60 = vadd.f32 %v1935_v57, %v1846_v54  ;;  %v4722_v41 = vor.u32 %v5410_v14, %v4721_v13  ;;  %v1157_v46 = vsel %vm6097_vm5, %v1155_v34, %v1156_v35  ;;  %v4405_v57 = vld [vmem:[#allocation2 + $0x98] sm:$0xf]  ;;  %v1023_v13 = vld [vmem:[%s5825_s13 + $0x6c] sm:$0xe]  ;;  %v1025_v14 = vld [vmem:[%s5825_s13 + $0x74] sm:$0x1] }
  0xf4   : > { %2023 = vmatmul.bf16.gmra.mxu2 %v4382_v43  ;;  %2747 = vmatmul.bf16.gmra.mxu0 %v4714_v48  ;;  %v4730_v43 = vor.u32 %v5411_v21, %v4729_v20  ;;  %1256 = vst [vmem:[#allocation2 + $0xd4] sm:$0xf] %v1157_v46  ;;  %v4406_v12 = vor.u32 %v5342_v58, %v4405_v57  ;;  %v4314_v17 = vrot.slane %v1023_v13, 9  ;;  %v1163_v21 = vrot.slane %v1025_v14, 5  ;;  %v5517_v34 = vld [vmem:[%s6701_s2 + $0x198] sm:$0xff] }
  0xf5   : > { %2836 = vmatmul.bf16.gmra.mxu1 %v4718_v56  ;;  %v5525_v35 = vld [vmem:[%s6701_s2 + $0x1d8] sm:$0xff]  ;;  %3511 = vmatpush.bf16.msra.mxu2 %v5517_v34  ;;  %v5415_v57 = vld [vmem:[#allocation2 + $0xc4] sm:$0xf]  ;;  %v4747_v58 = vld [vmem:[#allocation2 + $0xcc] sm:$0xf0] }
  0xf6   : > { %3600 = vmatpush.bf16.msra.mxu3 %v5525_v35  ;;  %v4750_v13 = vor.u32 %v5415_v57, %v4747_v58  ;;  %v4759_v57 = vld [vmem:[#allocation2 + $0xe4] sm:$0xf0]  ;;  %v5545_v58 = vld [vmem:[%s6702_s3 + $0x38] sm:$0xff] }
  0xf7   : > { %2658 = vmatmul.bf16.gmra.mxu3 %v4710_v55  ;;  %v1886_v0 = vpop.f32.mrf.mxu2  ;;  %4054 = vmatpush.bf16.msra.mxu1 %v5545_v58 }
  0xf9   : > { %v1848_v3 = vpop.f32.mrf.mxu0 }
  0xfa   : > { %v1975_v1 = vpop.f32.mrf.mxu3  ;;  %v1937_v5 = vpop.f32.mrf.mxu1 }
  0xfb   : > { %v6233_v2 = vadd.f32 %v1975_v1, %v1886_v0  ;;  %v6235_v6 = vadd.f32 %v1937_v5, %v1848_v3  ;;  %v4735_v0 = vld [vmem:[#allocation2 + $0xb4] sm:$0xf0]  ;;  %v1024_v1 = vld [vmem:[%s5825_s13 + $0x70] sm:$0xf]  ;;  %v5414_v5 = vld [vmem:[#allocation2 + $0xb8] sm:$0xf0] }
  0xfc   : > { %v4741_v3 = vld [vmem:[#allocation2 + $0xb0] sm:$0xf]  ;;  %v1160_v8 = vrot.slane %v1024_v1, 5  ;;  %v4738_v16 = vor.u32 %v5412_v63, %v4735_v0  ;;  %v4753_v63 = vld [vmem:[#allocation2 + $0xc8] sm:$0xf] }
  0xfd   : > { %v4742_v27 = vor.u32 %v5414_v5, %v4741_v3  ;;  %v5417_v0 = vld [vmem:[#allocation2 + $0xd0] sm:$0xf0] }
  0xfe   : > { %v1162_v20 = vrot.slane %v1160_v8, 4 }
  0xff   : > { %v1888_v24 = vpop.f32.mrf.mxu2 }
 0x101   : > { %v1851_v39 = vpop.f32.mrf.mxu0 }
 0x102   : > { %v1977_v29 = vpop.f32.mrf.mxu3  ;;  %v1940_v44 = vpop.f32.mrf.mxu1 }
 0x103   : > { %v6243_v37 = vadd.f32 %v1977_v29, %v1888_v24  ;;  %v6249_v48 = vadd.f32 %v1940_v44, %v1851_v39  ;;  %v1161_v29 = vsel %vm6097_vm5, %v4314_v17, %v1160_v8  ;;  %v1026_v8 = vld [vmem:[%s5825_s13 + $0x78] sm:$0xe] }
 0x104   : > { %2028 = vmatmul.bf16.gmra.mxu2 %v4394_v26  ;;  %2752 = vmatmul.bf16.gmra.mxu0 %v4726_v30  ;;  %v4734_v26 = vor.u32 %v5413_v62, %v4733_v59  ;;  %v1164_v30 = vsel %vm6097_vm5, %v1162_v20, %v1163_v21  ;;  %1257 = vst [vmem:[#allocation2 + $0xe0] sm:$0xf] %v1161_v29  ;;  %v5533_v59 = vld [vmem:[%s6701_s2 + $0x218] sm:$0xff]  ;;  %v4315_v14 = vrot.slane %v1026_v8, 9  ;;  %v1031_v8 = vld [vmem:[%s5825_s13 + $0x8c] sm:$0x1] }
 0x105   : > { %2841 = vmatmul.bf16.gmra.mxu1 %v4730_v43  ;;  %1258 = vst [vmem:[#allocation2 + $0xec] sm:$0xf] %v1164_v30  ;;  %v1027_v62 = vld [vmem:[%s5825_s13 + $0x7c] sm:$0xf]  ;;  %3689 = vmatpush.bf16.msra.mxu0 %v5533_v59  ;;  %v1030_v59 = vld [vmem:[%s5825_s13 + $0x88] sm:$0xf] }
 0x106   : > { %v1167_v1 = vrot.slane %v1027_v62, 5 }
 0x107   : > { %2663 = vmatmul.bf16.gmra.mxu3 %v4722_v41  ;;  %v1891_v49 = vpop.f32.mrf.mxu2 }
 0x109   : > { %v1853_v54 = vpop.f32.mrf.mxu0 }
 0x10a   : > { %v1980_v51 = vpop.f32.mrf.mxu3  ;;  %v1942_v55 = vpop.f32.mrf.mxu1 }
 0x10b   : > { %v6251_v52 = vadd.f32 %v1980_v51, %v1891_v49  ;;  %v6253_v56 = vadd.f32 %v1942_v55, %v1853_v54  ;;  %v4417_v49 = vld [vmem:[#allocation2 + $0xb0] sm:$0xf]  ;;  %v5345_v51 = vld [vmem:[#allocation2 + $0xb8] sm:$0xf0]  ;;  %v4745_v54 = vld [vmem:[#allocation2 + $0xc0] sm:$0xf] }
 0x10c   : > { %v5416_v55 = vld [vmem:[#allocation2 + $0xc8] sm:$0xf0]  ;;  %v4418_v5 = vor.u32 %v5345_v51, %v4417_v49  ;;  %v5348_v49 = vld [vmem:[#allocation2 + $0xd0] sm:$0xf0]  ;;  %v4757_v51 = vld [vmem:[#allocation2 + $0xd8] sm:$0xf] }
 0x10d   : > { %v4746_v21 = vor.u32 %v5416_v55, %v4745_v54  ;;  %v5419_v54 = vld [vmem:[#allocation2 + $0xe0] sm:$0xf0]  ;;  %v5418_v55 = vld [vmem:[#allocation2 + $0xdc] sm:$0xf]  ;;  %v4765_v62 = vld [vmem:[#allocation2 + $0xe0] sm:$0xf] }
 0x10e   : > { %v5351_v58 = vld [vmem:[#allocation2 + $0xe8] sm:$0xf0] }
 0x10f   : > { %v1893_v9 = vpop.f32.mrf.mxu2 }
 0x111   : > { %v1856_v24 = vpop.f32.mrf.mxu0 }
 0x112   : > { %v1982_v15 = vpop.f32.mrf.mxu3  ;;  %v1945_v28 = vpop.f32.mrf.mxu1 }
 0x113   : > { %v6258_v23 = vadd.f32 %v1982_v15, %v1893_v9  ;;  %v6264_v33 = vadd.f32 %v1945_v28, %v1856_v24  ;;  %v1028_v9 = vld [vmem:[%s5825_s13 + $0x80] sm:$0x1]  ;;  %v1169_v15 = vrot.slane %v1167_v1, 4  ;;  %v4754_v24 = vor.u32 %v5417_v0, %v4753_v63  ;;  %v5420_v63 = vld [vmem:[#allocation2 + $0xe8] sm:$0xf0] }
 0x114   : > { %2033 = vmatmul.bf16.gmra.mxu2 %v4406_v12  ;;  %2757 = vmatmul.bf16.gmra.mxu0 %v4738_v16  ;;  %v1170_v16 = vrot.slane %v1028_v9, 5  ;;  %v1174_v0 = vrot.slane %v1030_v59, 5  ;;  %v4769_v59 = vld [vmem:[#allocation2 + $0xf0] sm:$0xf] }
 0x115   : > { %2846 = vmatmul.bf16.gmra.mxu1 %v4742_v27  ;;  %v1168_v27 = vsel %vm6097_vm5, %v4315_v14, %v1167_v1 }
 0x116   : > { %v1171_v28 = vsel %vm6097_vm5, %v1169_v15, %v1170_v16  ;;  %1259 = vst [vmem:[#allocation2 + $0xf8] sm:$0xf] %v1168_v27  ;;  %v1176_v14 = vrot.slane %v1174_v0, 4  ;;  %v1177_v15 = vrot.slane %v1031_v8, 5 }
 0x117   : > { %2668 = vmatmul.bf16.gmra.mxu3 %v4734_v26  ;;  %v1896_v39 = vpop.f32.mrf.mxu2  ;;  %1260 = vst [vmem:[#allocation2 + $0x104] sm:$0xf] %v1171_v28 }
 0x118   : > { %v1178_v28 = vsel %vm6097_vm5, %v1176_v14, %v1177_v15  ;;  %v1032_v15 = vld [vmem:[%s5825_s13 + $0x90] sm:$0xe] }
 0x119   : > { %v1858_v44 = vpop.f32.mrf.mxu0  ;;  %1262 = vst [vmem:[#allocation2 + $0x11c] sm:$0xf] %v1178_v28 }
 0x11a   : > { %v1985_v41 = vpop.f32.mrf.mxu3  ;;  %v1947_v45 = vpop.f32.mrf.mxu1 }
 0x11b   : > { %v6272_v43 = vadd.f32 %v1985_v41, %v1896_v39  ;;  %v6274_v46 = vadd.f32 %v1947_v45, %v1858_v44  ;;  %v4429_v45 = vld [vmem:[#allocation2 + $0xc8] sm:$0xf] }
 0x11e   : > { %v5423_v8 = vld [vmem:[#allocation2 + $0x100] sm:$0xf0] }
 0x11f   : > { %v1898_v3 = vpop.f32.mrf.mxu2 }
 0x121   : > { %v1861_v20 = vpop.f32.mrf.mxu0 }
 0x122   : > { %v1987_v12 = vpop.f32.mrf.mxu3  ;;  %v1950_v26 = vpop.f32.mrf.mxu1 }
 0x123   : > { %v6282_v17 = vadd.f32 %v1987_v12, %v1898_v3  ;;  %v6288_v29 = vadd.f32 %v1950_v26, %v1861_v20  ;;  %v4430_v3 = vor.u32 %v5348_v49, %v4429_v45  ;;  %v4762_v12 = vor.u32 %v5418_v55, %v4759_v57  ;;  %v4441_v57 = vld [vmem:[#allocation2 + $0xe0] sm:$0xf] }
 0x124   : > { %2038 = vmatmul.bf16.gmra.mxu2 %v4418_v5  ;;  %2762 = vmatmul.bf16.gmra.mxu0 %v4750_v13  ;;  %v1029_v5 = vld [vmem:[%s5825_s13 + $0x84] sm:$0xe] }
 0x125   : > { %2851 = vmatmul.bf16.gmra.mxu1 %v4754_v24  ;;  %v4316_v13 = vrot.slane %v1029_v5, 9  ;;  %v4766_v24 = vor.u32 %v5420_v63, %v4765_v62  ;;  %v5421_v62 = vld [vmem:[#allocation2 + $0xf4] sm:$0xf]  ;;  %v4771_v63 = vld [vmem:[#allocation2 + $0xfc] sm:$0xf0] }
 0x126   : > { %v4777_v5 = vld [vmem:[#allocation2 + $0xf8] sm:$0xf]  ;;  %v4774_v14 = vor.u32 %v5421_v62, %v4771_v63 }
 0x127   : > { %2673 = vmatmul.bf16.gmra.mxu3 %v4746_v21  ;;  %v1901_v30 = vpop.f32.mrf.mxu2  ;;  %v4758_v21 = vor.u32 %v5419_v54, %v4757_v51  ;;  %v1175_v27 = vsel %vm6097_vm5, %v4316_v13, %v1174_v0  ;;  %v4442_v13 = vor.u32 %v5351_v58, %v4441_v57 }
 0x128   : > { %1261 = vst [vmem:[#allocation2 + $0x110] sm:$0xf] %v1175_v27 }
 0x129   : > { %v1863_v39 = vpop.f32.mrf.mxu0 }
 0x12a   : > { %v1990_v34 = vpop.f32.mrf.mxu3  ;;  %v1952_v41 = vpop.f32.mrf.mxu1 }
 0x12b   : > { %v6290_v35 = vadd.f32 %v1990_v34, %v1901_v30  ;;  %v6292_v44 = vadd.f32 %v1952_v41, %v1863_v39  ;;  %v5516_v30 = vld [vmem:[%s6701_s2 + $0x190] sm:$0xff] }
 0x12c   : > { %v5524_v34 = vld [vmem:[%s6701_s2 + $0x1d0] sm:$0xff]  ;;  %3512 = vmatpush.bf16.msra.mxu2 %v5516_v30 }
 0x12d   : > { %3601 = vmatpush.bf16.msra.mxu3 %v5524_v34 }
 0x12f   : > { %v1903_v1 = vpop.f32.mrf.mxu2 }
 0x131   : > { %v2728_v20 = vpop.f32.mrf.mxu0 }
 0x132   : > { %v1992_v9 = vpop.f32.mrf.mxu3  ;;  %v2817_v26 = vpop.f32.mrf.mxu1 }
 0x133   : > { %v6300_v16 = vadd.f32 %v1992_v9, %v1903_v1  ;;  %v5422_v1 = vld [vmem:[#allocation2 + $0xf8] sm:$0xf0] }
 0x134   : > { %2043 = vmatmul.bf16.gmra.mxu2 %v4430_v3  ;;  %2767 = vmatmul.bf16.gmra.mxu0 %v4762_v12  ;;  %v5532_v3 = vld [vmem:[%s6701_s2 + $0x210] sm:$0xff] }
 0x135   : > { %2856 = vmatmul.bf16.gmra.mxu1 %v4766_v24  ;;  %3690 = vmatpush.bf16.msra.mxu0 %v5532_v3 }
 0x137   : > { %2678 = vmatmul.bf16.gmra.mxu3 %v4758_v21  ;;  %v2004_v39 = vpop.f32.mrf.mxu2 }
 0x138   : > { %v2005_v41 = vadd.f32 %v2004_v39, %v6147_v31  ;;  %v1033_v31 = vld [vmem:[%s5825_s13 + $0x94] sm:$0xf]  ;;  %v4770_v39 = vor.u32 %v5422_v1, %v4769_v59 }
 0x139   : > { %v2730_v51 = vpop.f32.mrf.mxu0  ;;  %v1181_v9 = vrot.slane %v1033_v31, 5  ;;  %v4453_v31 = vld [vmem:[#allocation2 + $0xf8] sm:$0xf] }
 0x13a   : > { %v2639_v45 = vpop.f32.mrf.mxu3  ;;  %v2819_v54 = vpop.f32.mrf.mxu1 }
 0x13b   : > { %v2729_v49 = vadd.f32 %v2728_v20, %v2639_v45  ;;  %v1034_v20 = vld [vmem:[%s5825_s13 + $0x98] sm:$0x1]  ;;  %v1183_v27 = vrot.slane %v1181_v9, 4 }
 0x13c   : > { %v1184_v28 = vrot.slane %v1034_v20, 5  ;;  %v5426_v20 = vld [vmem:[#allocation2 + $0x118] sm:$0xf0] }
 0x13d   : > { %v2818_v55 = vadd.f32 %v2817_v26, %v2729_v49  ;;  %v4317_v26 = vrot.slane %v1032_v15, 9  ;;  %v4789_v15 = vld [vmem:[#allocation2 + $0x110] sm:$0xf] }
 0x13f   : > { %v6313_v0 = vadd.f32 %v2818_v55, %v2005_v41  ;;  %v2006_v12 = vpop.f32.mrf.mxu2  ;;  %v4778_v41 = vor.u32 %v5423_v8, %v4777_v5  ;;  %v1182_v49 = vsel %vm6097_vm5, %v4317_v26, %v1181_v9  ;;  %v1185_v55 = vsel %vm6097_vm5, %v1183_v27, %v1184_v28  ;;  %v4781_v5 = vld [vmem:[#allocation2 + $0x108] sm:$0xf]  ;;  %v5424_v8 = vld [vmem:[#allocation2 + $0x10c] sm:$0xf]  ;;  %v4783_v9 = vld [vmem:[#allocation2 + $0x114] sm:$0xf0] }
 0x140   : > { %v2007_v21 = vadd.f32 %v2006_v12, %v6157_v40  ;;  %1263 = vst [vmem:[#allocation2 + $0x128] sm:$0xf] %v1182_v49  ;;  %v4786_v27 = vor.u32 %v5424_v8, %v4783_v9  ;;  %v1035_v28 = vld [vmem:[%s5825_s13 + $0x9c] sm:$0xe] }
 0x141   : > { %v2733_v34 = vpop.f32.mrf.mxu0  ;;  %1264 = vst [vmem:[#allocation2 + $0x134] sm:$0xf] %v1185_v55 }
 0x142   : > { %v2641_v24 = vpop.f32.mrf.mxu3  ;;  %v2822_v45 = vpop.f32.mrf.mxu1 }
 0x143   : > { %v2731_v30 = vadd.f32 %v2730_v51, %v2641_v24 }
 0x144   : > { %2048 = vmatmul.bf16.gmra.mxu2 %v4442_v13  ;;  %2772 = vmatmul.bf16.gmra.mxu0 %v4774_v14  ;;  %v5425_v13 = vld [vmem:[#allocation2 + $0x110] sm:$0xf0] }
 0x145   : > { %v2820_v57 = vadd.f32 %v2819_v54, %v2731_v30  ;;  %2861 = vmatmul.bf16.gmra.mxu1 %v4778_v41  ;;  %v5354_v54 = vld [vmem:[#allocation2 + $0x100] sm:$0xf0]  ;;  %v5544_v14 = vld [vmem:[%s6702_s3 + $0x30] sm:$0xff]  ;;  %v4318_v41 = vrot.slane %v1035_v28, 9  ;;  %v5428_v28 = vld [vmem:[#allocation2 + $0x128] sm:$0xf0] }
 0x146   : > { %v4454_v26 = vor.u32 %v5354_v54, %v4453_v31  ;;  %4055 = vmatpush.bf16.msra.mxu1 %v5544_v14  ;;  %v1037_v30 = vld [vmem:[%s5825_s13 + $0xa4] sm:$0x1]  ;;  %v5523_v54 = vld [vmem:[%s6701_s2 + $0x1c8] sm:$0xff] }
 0x147   : > { %v6326_v40 = vadd.f32 %v2820_v57, %v2007_v21  ;;  %2683 = vmatmul.bf16.gmra.mxu3 %v4770_v39  ;;  %v2009_v51 = vpop.f32.mrf.mxu2  ;;  %v1191_v49 = vrot.slane %v1037_v30, 5  ;;  %v5531_v30 = vld [vmem:[%s6701_s2 + $0x208] sm:$0xff] }
 0x148   : > { %v2010_v58 = vadd.f32 %v2009_v51, %v6171_v4  ;;  %v1036_v4 = vld [vmem:[%s5825_s13 + $0xa0] sm:$0xf]  ;;  %v4782_v51 = vor.u32 %v5425_v13, %v4781_v5  ;;  %3602 = vmatpush.bf16.msra.mxu3 %v5523_v54  ;;  %3691 = vmatpush.bf16.msra.mxu0 %v5531_v30 }
 0x149   : > { %v2735_v63 = vpop.f32.mrf.mxu0  ;;  %v1188_v21 = vrot.slane %v1036_v4, 5 }
 0x14a   : > { %v2644_v59 = vpop.f32.mrf.mxu3  ;;  %v2824_v1 = vpop.f32.mrf.mxu1 }
 0x14b   : > { %v2734_v62 = vadd.f32 %v2733_v34, %v2644_v59 }
 0x14d   : > { %v2823_v3 = vadd.f32 %v2822_v45, %v2734_v62  ;;  %v1190_v45 = vrot.slane %v1188_v21, 4  ;;  %v1189_v62 = vsel %vm6097_vm5, %v4318_v41, %v1188_v21  ;;  %v4793_v21 = vld [vmem:[#allocation2 + $0x120] sm:$0xf] }
 0x14e   : > { %1265 = vst [vmem:[#allocation2 + $0x140] sm:$0xf] %v1189_v62 }
 0x14f   : > { %v6329_v12 = vadd.f32 %v2823_v3, %v2010_v58  ;;  %v2011_v24 = vpop.f32.mrf.mxu2  ;;  %v4790_v58 = vor.u32 %v5426_v20, %v4789_v15  ;;  %v1192_v3 = vsel %vm6097_vm5, %v1190_v45, %v1191_v49  ;;  %v4465_v15 = vld [vmem:[#allocation2 + $0x110] sm:$0xf]  ;;  %v5357_v20 = vld [vmem:[#allocation2 + $0x118] sm:$0xf0] }
 0x150   : > { %v2012_v34 = vadd.f32 %v2011_v24, %v6175_v10  ;;  %1266 = vst [vmem:[#allocation2 + $0x14c] sm:$0xf] %v1192_v3  ;;  %v5427_v24 = vld [vmem:[#allocation2 + $0x124] sm:$0xf]  ;;  %v4466_v49 = vor.u32 %v5357_v20, %v4465_v15 }
 0x151   : > { %v2738_v57 = vpop.f32.mrf.mxu0 }
 0x152   : > { %v2646_v39 = vpop.f32.mrf.mxu3  ;;  %v2827_v59 = vpop.f32.mrf.mxu1 }
 0x153   : > { %v2736_v55 = vadd.f32 %v2735_v63, %v2646_v39  ;;  %v5515_v63 = vld [vmem:[%s6701_s2 + $0x188] sm:$0xff]  ;;  %v5429_v39 = vld [vmem:[#allocation2 + $0x130] sm:$0xf0] }
 0x154   : > { %2053 = vmatmul.bf16.gmra.mxu2 %v4454_v26  ;;  %2777 = vmatmul.bf16.gmra.mxu0 %v4786_v27  ;;  %v4795_v26 = vld [vmem:[#allocation2 + $0x12c] sm:$0xf0] }
 0x155   : > { %v2825_v31 = vadd.f32 %v2824_v1, %v2736_v55  ;;  %2866 = vmatmul.bf16.gmra.mxu1 %v4790_v58  ;;  %3513 = vmatpush.bf16.msra.mxu2 %v5515_v63  ;;  %v4798_v55 = vor.u32 %v5427_v24, %v4795_v26 }
 0x157   : > { %v6342_v10 = vadd.f32 %v2825_v31, %v2012_v34  ;;  %2688 = vmatmul.bf16.gmra.mxu3 %v4782_v51  ;;  %v2014_v5 = vpop.f32.mrf.mxu2  ;;  %v4801_v34 = vld [vmem:[#allocation2 + $0x128] sm:$0xf]  ;;  %v1040_v51 = vld [vmem:[%s5825_s13 + $0xb0] sm:$0x1] }
 0x158   : > { %v2015_v1 = vadd.f32 %v2014_v5, %v6186_v42  ;;  %v1039_v42 = vld [vmem:[%s5825_s13 + $0xac] sm:$0xf]  ;;  %v1198_v31 = vrot.slane %v1040_v51, 5  ;;  %v4794_v5 = vor.u32 %v5428_v28, %v4793_v21 }
 0x159   : > { %v2740_v13 = vpop.f32.mrf.mxu0  ;;  %v1195_v41 = vrot.slane %v1039_v42, 5  ;;  %v4477_v42 = vld [vmem:[#allocation2 + $0x128] sm:$0xf]  ;;  %v5432_v51 = vld [vmem:[#allocation2 + $0x148] sm:$0xf0] }
 0x15a   : > { %v2649_v8 = vpop.f32.mrf.mxu3  ;;  %v2829_v14 = vpop.f32.mrf.mxu1 }
 0x15b   : > { %v2739_v9 = vadd.f32 %v2738_v57, %v2649_v8  ;;  %v1038_v57 = vld [vmem:[%s5825_s13 + $0xa8] sm:$0xe]  ;;  %v1197_v3 = vrot.slane %v1195_v41, 4 }
 0x15c   : > { %v4319_v62 = vrot.slane %v1038_v57, 9  ;;  %v4813_v57 = vld [vmem:[#allocation2 + $0x140] sm:$0xf] }
 0x15d   : > { %v2828_v4 = vadd.f32 %v2827_v59, %v2739_v9 }
 0x15e   : > { %v1196_v9 = vsel %vm6097_vm5, %v4319_v62, %v1195_v41  ;;  %v4807_v41 = vld [vmem:[#allocation2 + $0x144] sm:$0xf0] }
 0x15f   : > { %v6351_v27 = vadd.f32 %v2828_v4, %v2015_v1  ;;  %v2016_v45 = vpop.f32.mrf.mxu2  ;;  %v4802_v1 = vor.u32 %v5429_v39, %v4801_v34  ;;  %v1199_v4 = vsel %vm6097_vm5, %v1197_v3, %v1198_v31  ;;  %1267 = vst [vmem:[#allocation2 + $0x158] sm:$0xf] %v1196_v9  ;;  %v4805_v34 = vld [vmem:[#allocation2 + $0x138] sm:$0xf]  ;;  %v5430_v39 = vld [vmem:[#allocation2 + $0x13c] sm:$0xf] }
 0x160   : > { %v2017_v58 = vadd.f32 %v2016_v45, %v6196_v50  ;;  %1268 = vst [vmem:[#allocation2 + $0x164] sm:$0xf] %v1199_v4  ;;  %v4810_v3 = vor.u32 %v5430_v39, %v4807_v41  ;;  %v1041_v31 = vld [vmem:[%s5825_s13 + $0xb4] sm:$0xe]  ;;  %v935_v39 = vld [vmem:[%s6378_s17 + $0x4] sm:$0xf] }
 0x161   : > { %v2743_v54 = vpop.f32.mrf.mxu0 }
 0x162   : > { %v2651_v59 = vpop.f32.mrf.mxu3  ;;  %v2832_v8 = vpop.f32.mrf.mxu1 }
 0x163   : > { %v2741_v63 = vadd.f32 %v2740_v13, %v2651_v59 }
 0x164   : > { %2058 = vmatmul.bf16.gmra.mxu2 %v4466_v49  ;;  %2782 = vmatmul.bf16.gmra.mxu0 %v4798_v55  ;;  %v5431_v49 = vld [vmem:[#allocation2 + $0x140] sm:$0xf0]  ;;  %v1042_v55 = vld [vmem:[%s5825_s13 + $0xb8] sm:$0xf] }
 0x165   : > { %v2830_v15 = vadd.f32 %v2829_v14, %v2741_v63  ;;  %2871 = vmatmul.bf16.gmra.mxu1 %v4802_v1  ;;  %v5360_v14 = vld [vmem:[#allocation2 + $0x130] sm:$0xf0]  ;;  %v1043_v63 = vld [vmem:[%s5825_s13 + $0xbc] sm:$0x1]  ;;  %v4320_v1 = vrot.slane %v1041_v31, 9  ;;  %s4193_s13 = sshll.u32 %s4190_s16, 4  ;;  %s4194_s13 = int_to_ptr.hbm [resolvable:$true] %s4193_s13 }
 0x166   : > { %v4478_v62 = vor.u32 %v5360_v14, %v4477_v42  ;;  %v1205_v9 = vrot.slane %v1043_v63, 5  ;;  %s5639_s24 = sshra.s32 %s4194_s13, 4  ;;  %s5640_s24 = int_to_ptr.hbm [resolvable:$true] %s5639_s24 }
 0x167   : > { %v6364_v50 = vadd.f32 %v2830_v15, %v2017_v58  ;;  %2693 = vmatmul.bf16.gmra.mxu3 %v4794_v5  ;;  %v2019_v13 = vpop.f32.mrf.mxu2  ;;  %v1202_v58 = vrot.slane %v1042_v55, 5  ;;  %s5641_s19 = scalar_lea.hbm %s5640_s24, 256  ;;  %p5646_p1 = scmp.lt.s32.totalorder %s5640_s24, %s6705_s6 }
 0x168   : > { %v2020_v20 = vadd.f32 %v2019_v13, %v6210_v19  ;;  %v5543_v19 = vld [vmem:[%s6702_s3 + $0x28] sm:$0xff]  ;;  %v4806_v13 = vor.u32 %v5431_v49, %v4805_v34  ;;  %v5514_v34 = vld [vmem:[%s6701_s2 + $0x180] sm:$0xff]  ;;  %p5642_p12 = scmp.ne.s32.totalorder %s5640_s24, %s5641_s19  ;;  %p5647_p2 = scmp.lt.s32.totalorder %s5645_s30, %s5641_s19 }
 0x169   : > { %v2745_v26 = vpop.f32.mrf.mxu0  ;;  %4056 = vmatpush.bf16.msra.mxu1 %v5543_v19  ;;  %v5522_v49 = vld [vmem:[%s6701_s2 + $0x1c0] sm:$0xff]  ;;  %3514 = vmatpush.bf16.msra.mxu2 %v5514_v34 }
 0x16a   : > { %v2654_v21 = vpop.f32.mrf.mxu3  ;;  %v2834_v28 = vpop.f32.mrf.mxu1  ;;  %3603 = vmatpush.bf16.msra.mxu3 %v5522_v49  ;;  %p5643_p13 = pnand %p5642_p12, %p5782_p4  ;;  %p5648_p3 = por %p5647_p2, %p5646_p1 }
 0x16b   : > { %v2744_v24 = vadd.f32 %v2743_v54, %v2654_v21  ;;  %v934_v21 = vld [vmem:[%s6378_s17] sm:$0xf] }
 0x16c   : > { %v944_v41 = vshll.u32 %v934_v21, 16  ;;  %p5644_p0 = pneg %p5643_p13 }
 0x16d   : > { %v2833_v30 = vadd.f32 %v2832_v8, %v2744_v24  ;;  %v1204_v8 = vrot.slane %v1202_v58, 4 }
 0x16e   : > { %v946_v55 = vrot.slane %v944_v41, 5  ;;  %v4819_v41 = vld [vmem:[#allocation2 + $0x15c] sm:$0xf0]  ;;  %p5649_p5 = pnand %p5648_p3, %p5644_p0 }
 0x16f   : > { %v6369_v45 = vadd.f32 %v2833_v30, %v2020_v20  ;;  %v2021_v59 = vpop.f32.mrf.mxu2  ;;  %v4814_v20 = vor.u32 %v5432_v51, %v4813_v57  ;;  %v1203_v30 = vsel %vm6097_vm5, %v4320_v1, %v1202_v58  ;;  %v1206_v42 = vsel %vm6097_vm5, %v1204_v8, %v1205_v9  ;;  %v4489_v9 = vld [vmem:[#allocation2 + $0x140] sm:$0xf] }
 0x170   : > { %v2022_v54 = vadd.f32 %v2021_v59, %v6214_v25  ;;  %1269 = vst [vmem:[#allocation2 + $0x170] sm:$0xf] %v1203_v30  ;;  %v941_v25 = vshrl.u32 %v934_v21, 16  ;;  %v950_v57 = vshll.u32 %v935_v39, 16  ;;  %v954_v51 = vshrl.u32 %v935_v39, 16 }
 0x171   : > { %v2748_v15 = vpop.f32.mrf.mxu0  ;;  %1270 = vst [vmem:[#allocation2 + $0x17c] sm:$0xf] %v1206_v42  ;;  %v5433_v39 = vld [vmem:[#allocation2 + $0x154] sm:$0xf] }
 0x172   : > { %v2656_v5 = vpop.f32.mrf.mxu3  ;;  %v2837_v24 = vpop.f32.mrf.mxu1  ;;  %v943_v19 = vrot.slane %v941_v25, 4  ;;  %v952_v63 = vrot.slane %v950_v57, 5  ;;  %v4817_v25 = vld [vmem:[#allocation2 + $0x150] sm:$0xf] }
 0x173   : > { %v2746_v4 = vadd.f32 %v2745_v26, %v2656_v5 }
 0x174   : > { %2063 = vmatmul.bf16.gmra.mxu2 %v4478_v62  ;;  %2787 = vmatmul.bf16.gmra.mxu0 %v4810_v3  ;;  %v947_v31 = vor.u32 %v946_v55, %v943_v19  ;;  %v4825_v19 = vld [vmem:[#allocation2 + $0x158] sm:$0xf]  ;;  %v5435_v55 = vld [vmem:[#allocation2 + $0x160] sm:$0xf0] }
 0x175   : > { %v2835_v14 = vadd.f32 %v2834_v28, %v2746_v4  ;;  %2876 = vmatmul.bf16.gmra.mxu1 %v4814_v20  ;;  %v936_v28 = vld [vmem:[%s6378_s17 + $0x8] sm:$0x1]  ;;  %v426_v4 = vld [vmem:[%s6378_s17] sm:$0xf] }
 0x176   : > { %v960_v59 = vshll.u32 %v936_v28, 16  ;;  %v948_v20 = vrot.slane %v947_v31, 4  ;;  %431 = vst [vmem:[#allocation2 + $0x180] sm:$0xf] %v426_v4  ;;  %v5530_v28 = vld [vmem:[%s6701_s2 + $0x200] sm:$0xff] }
 0x177   : > { %v6389_v26 = vadd.f32 %v2835_v14, %v2022_v54  ;;  %2698 = vmatmul.bf16.gmra.mxu3 %v4806_v13  ;;  %v2024_v58 = vpop.f32.mrf.mxu2  ;;  %v956_v54 = vrot.slane %v954_v51, 4  ;;  %v427_v13 = vld [vmem:[%s6378_s17 + $0x4] sm:$0xf]  ;;  %v5363_v14 = vld [vmem:[#allocation2 + $0x148] sm:$0xf0]  ;;  %3692 = vmatpush.bf16.msra.mxu0 %v5530_v28 }
 0x178   : > { %v2025_v62 = vadd.f32 %v2024_v58, %v6225_v60  ;;  %v962_v30 = vrot.slane %v960_v59, 5  ;;  %v5434_v60 = vld [vmem:[#allocation2 + $0x158] sm:$0xf0]  ;;  %432 = vst [vmem:[#allocation2 + $0x18c] sm:$0xf] %v427_v13  ;;  %v4490_v59 = vor.u32 %v5363_v14, %v4489_v9 }
 0x179   : > { %v2750_v1 = vpop.f32.mrf.mxu0  ;;  %v957_v21 = vor.u32 %v956_v54, %v952_v63  ;;  %v1271_v31 = vld [vmem:[%s6378_s17] sm:$0xe] }
 0x17a   : > { %v2659_v3 = vpop.f32.mrf.mxu3  ;;  %v2839_v8 = vpop.f32.mrf.mxu1 }
 0x17b   : > { %v2749_v5 = vadd.f32 %v2748_v15, %v2659_v3  ;;  %v953_v15 = vsel %vm5852_vm2, %v948_v20, %v952_v63  ;;  %v958_v34 = vrot.slane %v957_v21, 4  ;;  %v4822_v3 = vor.u32 %v5433_v39, %v4819_v41 }
 0x17c   : > { %992 = vst [vmem:[#allocation2 + $0x184] sm:$0xf] %v953_v15  ;;  %v4826_v15 = vor.u32 %v5435_v55, %v4825_v19  ;;  %v5366_v19 = vld [vmem:[#allocation2 + $0x160] sm:$0xf0]  ;;  %v4829_v55 = vld [vmem:[#allocation2 + $0x168] sm:$0xf] }
 0x17d   : > { %v2838_v42 = vadd.f32 %v2837_v24, %v2749_v5  ;;  %v1272_v24 = vld [vmem:[%s6378_s17 + $0x4] sm:$0xf]  ;;  %v963_v57 = vsel %vm5852_vm2, %v958_v34, %v962_v30  ;;  %v4321_v5 = vrot.slane %v1271_v31, 9  ;;  %v5438_v31 = vld [vmem:[#allocation2 + $0x178] sm:$0xf0] }
 0x17e   : > { %v1285_v51 = vrot.slane %v1272_v24, 5  ;;  %993 = vst [vmem:[#allocation2 + $0x190] sm:$0xf] %v963_v57  ;;  %v4501_v24 = vld [vmem:[#allocation2 + $0x158] sm:$0xf] }
 0x17f   : > { %v6403_v49 = vadd.f32 %v2838_v42, %v2025_v62  ;;  %v2026_v58 = vpop.f32.mrf.mxu2  ;;  %v1273_v62 = vld [vmem:[%s6378_s17 + $0x8] sm:$0x1]  ;;  %v4818_v42 = vor.u32 %v5434_v60, %v4817_v25  ;;  %v5436_v57 = vld [vmem:[#allocation2 + $0x16c] sm:$0xf] }
 0x180   : > { %v2027_v63 = vadd.f32 %v2026_v58, %v6235_v6  ;;  %v1287_v4 = vrot.slane %v1285_v51, 4  ;;  %v1288_v13 = vrot.slane %v1273_v62, 5  ;;  %v1286_v30 = vsel %vm6097_vm5, %v4321_v5, %v1285_v51  ;;  %v4831_v51 = vld [vmem:[#allocation2 + $0x174] sm:$0xf0]  ;;  %v5542_v58 = vld [vmem:[%s6702_s3 + $0x20] sm:$0xff] }
 0x181   : > { %6712 = vst [vmem:[#allocation7_spill] sm:$0xff] %v6403_v49  ;;  %v2753_v21 = vpop.f32.mrf.mxu0  ;;  %4057 = vmatpush.bf16.msra.mxu1 %v5542_v58 }
 0x182   : > { %v2661_v54 = vpop.f32.mrf.mxu3  ;;  %v2842_v49 = vpop.f32.mrf.mxu1  ;;  %v1289_v9 = vsel %vm6097_vm5, %v1287_v4, %v1288_v13  ;;  %1301 = vst [vmem:[#allocation2 + $0x188] sm:$0xf] %v1286_v30 }
 0x183   : > { %v2751_v20 = vadd.f32 %v2750_v1, %v2661_v54  ;;  %1302 = vst [vmem:[#allocation2 + $0x194] sm:$0xf] %v1289_v9  ;;  %v4834_v54 = vor.u32 %v5436_v57, %v4831_v51 }
 0x184   : > { %2068 = vmatmul.bf16.gmra.mxu2 %v4490_v59  ;;  %2792 = vmatmul.bf16.gmra.mxu0 %v4822_v3  ;;  %v5437_v59 = vld [vmem:[#allocation2 + $0x170] sm:$0xf0]  ;;  %v4837_v3 = vld [vmem:[#allocation2 + $0x170] sm:$0xf] }
 0x185   : > { %v2840_v14 = vadd.f32 %v2839_v8, %v2751_v20  ;;  %2881 = vmatmul.bf16.gmra.mxu1 %v4826_v15  ;;  %v4830_v13 = vor.u32 %v5437_v59, %v4829_v55  ;;  %v4838_v20 = vor.u32 %v5438_v31, %v4837_v3  ;;  %v5440_v55 = vld [vmem:[#allocation2 + $0x188] sm:$0xf0] }
 0x187   : > { %v6418_v6 = vadd.f32 %v2840_v14, %v2027_v63  ;;  %2703 = vmatmul.bf16.gmra.mxu3 %v4818_v42  ;;  %v2029_v1 = vpop.f32.mrf.mxu2 }
 0x188   : > { %v2030_v39 = vadd.f32 %v2029_v1, %v6249_v48 }
 0x189   : > { %v2755_v41 = vpop.f32.mrf.mxu0  ;;  %v4849_v57 = vld [vmem:[#allocation2 + $0x188] sm:$0xf] }
 0x18a   : > { %v2664_v25 = vpop.f32.mrf.mxu3  ;;  %v2844_v34 = vpop.f32.mrf.mxu1  ;;  %v5441_v51 = vld [vmem:[#allocation2 + $0x190] sm:$0xf0] }
 0x18b   : > { %v2754_v60 = vadd.f32 %v2753_v21, %v2664_v25 }
 0x18d   : > { %v2843_v28 = vadd.f32 %v2842_v49, %v2754_v60  ;;  %v4502_v49 = vor.u32 %v5366_v19, %v4501_v24  ;;  %v4513_v60 = vld [vmem:[#allocation2 + $0x170] sm:$0xf]  ;;  %v4841_v24 = vld [vmem:[#allocation2 + $0x180] sm:$0xf] }
 0x18e   : > { %v4843_v19 = vld [vmem:[#allocation2 + $0x18c] sm:$0xf0] }
 0x18f   : > { %v6421_v8 = vadd.f32 %v2843_v28, %v2030_v39  ;;  %v2031_v48 = vpop.f32.mrf.mxu2 }
 0x190   : > { %v2032_v62 = vadd.f32 %v2031_v48, %v6253_v56 }
 0x191   : > { %v2758_v4 = vpop.f32.mrf.mxu0 }
 0x192   : > { %v2666_v63 = vpop.f32.mrf.mxu3  ;;  %v2847_v21 = vpop.f32.mrf.mxu1 }
 0x193   : > { %v2756_v5 = vadd.f32 %v2755_v41, %v2666_v63  ;;  %v5369_v41 = vld [vmem:[#allocation2 + $0x178] sm:$0xf0]  ;;  %v4842_v63 = vor.u32 %v5440_v55, %v4841_v24  ;;  %v4999_v24 = vld [vmem:[#allocation2 + $0x3c] sm:$0xf0] }
 0x194   : > { %2073 = vmatmul.bf16.gmra.mxu2 %v4502_v49  ;;  %2797 = vmatmul.bf16.gmra.mxu0 %v4834_v54  ;;  %v4850_v49 = vor.u32 %v5441_v51, %v4849_v57 }
 0x195   : > { %v2845_v42 = vadd.f32 %v2844_v34, %v2756_v5  ;;  %2886 = vmatmul.bf16.gmra.mxu1 %v4838_v20  ;;  %v5439_v34 = vld [vmem:[#allocation2 + $0x184] sm:$0xf] }
 0x196   : > { %v4846_v31 = vor.u32 %v5439_v34, %v4843_v19 }
 0x197   : > { %v6427_v15 = vadd.f32 %v2845_v42, %v2032_v62  ;;  %2708 = vmatmul.bf16.gmra.mxu3 %v4830_v13  ;;  %v2034_v30 = vpop.f32.mrf.mxu2 }
 0x198   : > { %v2035_v9 = vadd.f32 %v2034_v30, %v6264_v33  ;;  %v4514_v33 = vor.u32 %v5369_v41, %v4513_v60  ;;  %v5541_v60 = vld [vmem:[%s6702_s3 + $0x18] sm:$0xff]  ;;  %v5466_v41 = vld [vmem:[#allocation2 + $0x34] sm:$0xf] }
 0x199   : > { %v2760_v1 = vpop.f32.mrf.mxu0  ;;  %4058 = vmatpush.bf16.msra.mxu1 %v5541_v60 }
 0x19a   : > { %v2669_v14 = vpop.f32.mrf.mxu3  ;;  %v2849_v39 = vpop.f32.mrf.mxu1 }
 0x19b   : > { %v2759_v56 = vadd.f32 %v2758_v4, %v2669_v14  ;;  %v4997_v14 = vld [vmem:[#allocation2 + $0x30] sm:$0xf] }
 0x19d   : > { %v2848_v25 = vadd.f32 %v2847_v21, %v2759_v56  ;;  %v5467_v56 = vld [vmem:[#allocation2 + $0x38] sm:$0xf0] }
 0x19e   : > { %v4998_v55 = vor.u32 %v5467_v56, %v4997_v14 }
 0x19f   : > { %v6430_v28 = vadd.f32 %v2848_v25, %v2035_v9  ;;  %v2036_v58 = vpop.f32.mrf.mxu2  ;;  %v5005_v25 = vld [vmem:[#allocation2 + $0x38] sm:$0xf] }
 0x1a0   : > { %v2037_v59 = vadd.f32 %v2036_v58, %v6274_v46 }
 0x1a1   : > { %v2763_v62 = vpop.f32.mrf.mxu0 }
 0x1a2   : > { %v2671_v3 = vpop.f32.mrf.mxu3  ;;  %v2852_v54 = vpop.f32.mrf.mxu1 }
 0x1a3   : > { %v2761_v48 = vadd.f32 %v2760_v1, %v2671_v3 }
 0x1a4   : > { %2078 = vmatmul.bf16.gmra.mxu2 %v4514_v33  ;;  %2802 = vmatmul.bf16.gmra.mxu0 %v4846_v31 }
 0x1a5   : > { %v2850_v5 = vadd.f32 %v2849_v39, %v2761_v48  ;;  %2891 = vmatmul.bf16.gmra.mxu1 %v4850_v49  ;;  %v5468_v39 = vld [vmem:[#allocation2 + $0x40] sm:$0xf0] }
 0x1a6   : > { %v5006_v57 = vor.u32 %v5468_v39, %v5005_v25 }
 0x1a7   : > { %v6433_v4 = vadd.f32 %v2850_v5, %v2037_v59  ;;  %2713 = vmatmul.bf16.gmra.mxu3 %v4842_v63  ;;  %v2039_v13 = vpop.f32.mrf.mxu2  ;;  %v5002_v59 = vor.u32 %v5466_v41, %v4999_v24 }
 0x1a8   : > { %v2040_v20 = vadd.f32 %v2039_v13, %v6288_v29  ;;  %v5009_v13 = vld [vmem:[#allocation2 + $0x48] sm:$0xf] }
 0x1a9   : > { %v2765_v42 = vpop.f32.mrf.mxu0 }
 0x1aa   : > { %v2674_v21 = vpop.f32.mrf.mxu3  ;;  %v2854_v30 = vpop.f32.mrf.mxu1 }
 0x1ab   : > { %v2764_v46 = vadd.f32 %v2763_v62, %v2674_v21  ;;  %v5470_v21 = vld [vmem:[#allocation2 + $0x50] sm:$0xf0] }
 0x1ac   : > { %v5010_v39 = vor.u32 %v5470_v21, %v5009_v13 }
 0x1ad   : > { %v2853_v9 = vadd.f32 %v2852_v54, %v2764_v46  ;;  %v5017_v46 = vld [vmem:[#allocation2 + $0x50] sm:$0xf] }
 0x1af   : > { %v6436_v1 = vadd.f32 %v2853_v9, %v2040_v20  ;;  %v2041_v34 = vpop.f32.mrf.mxu2  ;;  %v5011_v9 = vld [vmem:[#allocation2 + $0x54] sm:$0xf0] }
 0x1b0   : > { %v2042_v29 = vadd.f32 %v2041_v34, %v6292_v44 }
 0x1b1   : > { %v2768_v58 = vpop.f32.mrf.mxu0 }
 0x1b2   : > { %v2676_v19 = vpop.f32.mrf.mxu3  ;;  %v2857_v3 = vpop.f32.mrf.mxu1 }
 0x1b3   : > { %v2766_v51 = vadd.f32 %v2765_v42, %v2676_v19  ;;  %v5471_v42 = vld [vmem:[#allocation2 + $0x58] sm:$0xf0] }
 0x1b4   : > { %3515 = vmatmul.bf16.vlgmr.msra.gmra.mxu2 %v4998_v55  ;;  %3693 = vmatmul.bf16.vlgmr.msra.gmra.mxu0 %v5006_v57  ;;  %v5018_v60 = vor.u32 %v5471_v42, %v5017_v46 }
 0x1b5   : > { %v2855_v33 = vadd.f32 %v2854_v30, %v2766_v51  ;;  %v5469_v30 = vld [vmem:[#allocation2 + $0x4c] sm:$0xf] }
 0x1b6   : > { %v5014_v24 = vor.u32 %v5469_v30, %v5011_v9 }
 0x1b7   : > { %v6442_v31 = vadd.f32 %v2855_v33, %v2042_v29  ;;  %3604 = vmatmul.bf16.vlgmr.msra.gmra.mxu3 %v5002_v59  ;;  %v2044_v48 = vpop.f32.mrf.mxu2  ;;  %v5021_v33 = vld [vmem:[#allocation2 + $0x60] sm:$0xf] }
 0x1b8   : > { %v2045_v62 = vadd.f32 %v2044_v48, %v6155_v36  ;;  %v5473_v48 = vld [vmem:[#allocation2 + $0x68] sm:$0xf0] }
 0x1b9   : > { %v2770_v54 = vpop.f32.mrf.mxu0  ;;  %v5022_v46 = vor.u32 %v5473_v48, %v5021_v33 }
 0x1ba   : > { %v2679_v63 = vpop.f32.mrf.mxu3  ;;  %v2859_v44 = vpop.f32.mrf.mxu1 }
 0x1bb   : > { %v2769_v49 = vadd.f32 %v2768_v58, %v2679_v63  ;;  %v5029_v63 = vld [vmem:[#allocation2 + $0x68] sm:$0xf] }
 0x1bd   : > { %v2858_v5 = vadd.f32 %v2857_v3, %v2769_v49  ;;  %v5474_v49 = vld [vmem:[#allocation2 + $0x70] sm:$0xf0] }
 0x1be   : > { %v5030_v42 = vor.u32 %v5474_v49, %v5029_v63 }
 0x1bf   : > { %v6445_v20 = vadd.f32 %v2858_v5, %v2045_v62  ;;  %v2046_v14 = vpop.f32.mrf.mxu2  ;;  %v5023_v5 = vld [vmem:[#allocation2 + $0x6c] sm:$0xf0] }
 0x1c0   : > { %v2047_v56 = vadd.f32 %v2046_v14, %v6165_v61 }
 0x1c1   : > { %v2773_v41 = vpop.f32.mrf.mxu0 }
 0x1c2   : > { %v2681_v25 = vpop.f32.mrf.mxu3  ;;  %v2862_v34 = vpop.f32.mrf.mxu1 }
 0x1c3   : > { %v2771_v36 = vadd.f32 %v2770_v54, %v2681_v25  ;;  %v5540_v54 = vld [vmem:[%s6702_s3 + $0x10] sm:$0xff] }
 0x1c4   : > { %3520 = vmatmul.bf16.gmra.mxu2 %v5010_v39  ;;  %3698 = vmatmul.bf16.gmra.mxu0 %v5018_v60 }
 0x1c5   : > { %v2860_v29 = vadd.f32 %v2859_v44, %v2771_v36  ;;  %v5472_v44 = vld [vmem:[#allocation2 + $0x64] sm:$0xf]  ;;  %4059 = vmatpush.bf16.msra.mxu1 %v5540_v54 }
 0x1c6   : > { %v5026_v14 = vor.u32 %v5472_v44, %v5023_v5 }
 0x1c7   : > { %v6448_v19 = vadd.f32 %v2860_v29, %v2047_v56  ;;  %3609 = vmatmul.bf16.gmra.mxu3 %v5014_v24  ;;  %v2049_v55 = vpop.f32.mrf.mxu2 }
 0x1c8   : > { %v2050_v57 = vadd.f32 %v2049_v55, %v6173_v7  ;;  %v5033_v55 = vld [vmem:[#allocation2 + $0x78] sm:$0xf] }
 0x1c9   : > { %v2775_v59 = vpop.f32.mrf.mxu0 }
 0x1ca   : > { %v2684_v51 = vpop.f32.mrf.mxu3  ;;  %v2864_v61 = vpop.f32.mrf.mxu1 }
 0x1cb   : > { %v2774_v58 = vadd.f32 %v2773_v41, %v2684_v51  ;;  %v5476_v51 = vld [vmem:[#allocation2 + $0x80] sm:$0xf0] }
 0x1cc   : > { %v5034_v49 = vor.u32 %v5476_v51, %v5033_v55 }
 0x1cd   : > { %v2863_v3 = vadd.f32 %v2862_v34, %v2774_v58  ;;  %v5041_v58 = vld [vmem:[#allocation2 + $0x80] sm:$0xf] }
 0x1cf   : > { %v6451_v62 = vadd.f32 %v2863_v3, %v2050_v57  ;;  %v2051_v13 = vpop.f32.mrf.mxu2  ;;  %v5035_v3 = vld [vmem:[#allocation2 + $0x84] sm:$0xf0] }
 0x1d0   : > { %v2052_v7 = vadd.f32 %v2051_v13, %v6180_v32 }
 0x1d1   : > { %v2778_v9 = vpop.f32.mrf.mxu0 }
 0x1d2   : > { %v2686_v21 = vpop.f32.mrf.mxu3  ;;  %v2867_v56 = vpop.f32.mrf.mxu1 }
 0x1d3   : > { %v2776_v30 = vadd.f32 %v2775_v59, %v2686_v21  ;;  %v5477_v59 = vld [vmem:[#allocation2 + $0x88] sm:$0xf0] }
 0x1d4   : > { %3525 = vmatmul.bf16.gmra.mxu2 %v5022_v46  ;;  %3703 = vmatmul.bf16.gmra.mxu0 %v5030_v42  ;;  %v5042_v54 = vor.u32 %v5477_v59, %v5041_v58 }
 0x1d5   : > { %v2865_v25 = vadd.f32 %v2864_v61, %v2776_v30  ;;  %v5475_v61 = vld [vmem:[#allocation2 + $0x7c] sm:$0xf] }
 0x1d6   : > { %v5038_v5 = vor.u32 %v5475_v61, %v5035_v3 }
 0x1d7   : > { %v6457_v39 = vadd.f32 %v2865_v25, %v2052_v7  ;;  %3614 = vmatmul.bf16.gmra.mxu3 %v5026_v14  ;;  %v2054_v60 = vpop.f32.mrf.mxu2  ;;  %v5045_v25 = vld [vmem:[#allocation2 + $0x90] sm:$0xf] }
 0x1d8   : > { %v2055_v36 = vadd.f32 %v2054_v60, %v6194_v47  ;;  %v5479_v60 = vld [vmem:[#allocation2 + $0x98] sm:$0xf0] }
 0x1d9   : > { %v2780_v34 = vpop.f32.mrf.mxu0  ;;  %v5046_v58 = vor.u32 %v5479_v60, %v5045_v25 }
 0x1da   : > { %v2689_v41 = vpop.f32.mrf.mxu3  ;;  %v2869_v32 = vpop.f32.mrf.mxu1 }
 0x1db   : > { %v2779_v24 = vadd.f32 %v2778_v9, %v2689_v41  ;;  %v5053_v41 = vld [vmem:[#allocation2 + $0x98] sm:$0xf] }
 0x1dd   : > { %v2868_v29 = vadd.f32 %v2867_v56, %v2779_v24  ;;  %v5480_v24 = vld [vmem:[#allocation2 + $0xa0] sm:$0xf0] }
 0x1de   : > { %v5054_v59 = vor.u32 %v5480_v24, %v5053_v41 }
 0x1df   : > { %v6460_v57 = vadd.f32 %v2868_v29, %v2055_v36  ;;  %v2056_v33 = vpop.f32.mrf.mxu2  ;;  %v5047_v29 = vld [vmem:[#allocation2 + $0x9c] sm:$0xf0] }
 0x1e0   : > { %v2057_v48 = vadd.f32 %v2056_v33, %v6204_v11 }
 0x1e1   : > { %v2783_v44 = vpop.f32.mrf.mxu0 }
 0x1e2   : > { %v2691_v63 = vpop.f32.mrf.mxu3  ;;  %v2872_v13 = vpop.f32.mrf.mxu1 }
 0x1e3   : > { %v2781_v47 = vadd.f32 %v2780_v34, %v2691_v63  ;;  %v5539_v34 = vld [vmem:[%s6702_s3 + $0x8] sm:$0xff] }
 0x1e4   : > { %3530 = vmatmul.bf16.gmra.mxu2 %v5034_v49  ;;  %3708 = vmatmul.bf16.gmra.mxu0 %v5042_v54 }
 0x1e5   : > { %v2870_v7 = vadd.f32 %v2869_v32, %v2781_v47  ;;  %v5478_v32 = vld [vmem:[#allocation2 + $0x94] sm:$0xf]  ;;  %4060 = vmatpush.bf16.msra.mxu1 %v5539_v34 }
 0x1e6   : > { %v5050_v33 = vor.u32 %v5478_v32, %v5047_v29 }
 0x1e7   : > { %v6463_v21 = vadd.f32 %v2870_v7, %v2057_v48  ;;  %3619 = vmatmul.bf16.gmra.mxu3 %v5038_v5  ;;  %v2059_v46 = vpop.f32.mrf.mxu2 }
 0x1e8   : > { %v2060_v42 = vadd.f32 %v2059_v46, %v6212_v22  ;;  %v5057_v46 = vld [vmem:[#allocation2 + $0xa8] sm:$0xf] }
 0x1e9   : > { %v2785_v14 = vpop.f32.mrf.mxu0 }
 0x1ea   : > { %v2694_v30 = vpop.f32.mrf.mxu3  ;;  %v2874_v11 = vpop.f32.mrf.mxu1 }
 0x1eb   : > { %v2784_v9 = vadd.f32 %v2783_v44, %v2694_v30  ;;  %v5482_v30 = vld [vmem:[#allocation2 + $0xb0] sm:$0xf0] }
 0x1ec   : > { %v5058_v24 = vor.u32 %v5482_v30, %v5057_v46 }
 0x1ed   : > { %v2873_v56 = vadd.f32 %v2872_v13, %v2784_v9  ;;  %v5065_v9 = vld [vmem:[#allocation2 + $0xb0] sm:$0xf] }
 0x1ef   : > { %v6466_v36 = vadd.f32 %v2873_v56, %v2060_v42  ;;  %v2061_v55 = vpop.f32.mrf.mxu2  ;;  %v5059_v56 = vld [vmem:[#allocation2 + $0xb4] sm:$0xf0] }
 0x1f0   : > { %v2062_v22 = vadd.f32 %v2061_v55, %v6219_v53 }
 0x1f1   : > { %v2788_v3 = vpop.f32.mrf.mxu0 }
 0x1f2   : > { %v2696_v51 = vpop.f32.mrf.mxu3  ;;  %v2877_v48 = vpop.f32.mrf.mxu1 }
 0x1f3   : > { %v2786_v61 = vadd.f32 %v2785_v14, %v2696_v51  ;;  %v5483_v14 = vld [vmem:[#allocation2 + $0xb8] sm:$0xf0] }
 0x1f4   : > { %3535 = vmatmul.bf16.gmra.mxu2 %v5046_v58  ;;  %3713 = vmatmul.bf16.gmra.mxu0 %v5054_v59  ;;  %v5066_v34 = vor.u32 %v5483_v14, %v5065_v9 }
 0x1f5   : > { %v2875_v63 = vadd.f32 %v2874_v11, %v2786_v61  ;;  %v5481_v11 = vld [vmem:[#allocation2 + $0xac] sm:$0xf] }
 0x1f6   : > { %v5062_v29 = vor.u32 %v5481_v11, %v5059_v56 }
 0x1f7   : > { %v6472_v49 = vadd.f32 %v2875_v63, %v2062_v22  ;;  %3624 = vmatmul.bf16.gmra.mxu3 %v5050_v33  ;;  %v2064_v54 = vpop.f32.mrf.mxu2  ;;  %v5069_v63 = vld [vmem:[#allocation2 + $0xc0] sm:$0xf] }
 0x1f8   : > { %v2065_v47 = vadd.f32 %v2064_v54, %v6233_v2  ;;  %v5485_v54 = vld [vmem:[#allocation2 + $0xc8] sm:$0xf0] }
 0x1f9   : > { %v2790_v13 = vpop.f32.mrf.mxu0  ;;  %v5070_v9 = vor.u32 %v5485_v54, %v5069_v63 }
 0x1fa   : > { %v2699_v44 = vpop.f32.mrf.mxu3  ;;  %v2879_v53 = vpop.f32.mrf.mxu1 }
 0x1fb   : > { %v2789_v5 = vadd.f32 %v2788_v3, %v2699_v44  ;;  %v5077_v44 = vld [vmem:[#allocation2 + $0xc8] sm:$0xf] }
 0x1fd   : > { %v2878_v7 = vadd.f32 %v2877_v48, %v2789_v5  ;;  %v5486_v5 = vld [vmem:[#allocation2 + $0xd0] sm:$0xf0] }
 0x1fe   : > { %v5078_v14 = vor.u32 %v5486_v5, %v5077_v44 }
 0x1ff   : > { %v6475_v42 = vadd.f32 %v2878_v7, %v2065_v47  ;;  %v2066_v25 = vpop.f32.mrf.mxu2  ;;  %v5071_v7 = vld [vmem:[#allocation2 + $0xcc] sm:$0xf0] }
 0x200   : > { %v2067_v60 = vadd.f32 %v2066_v25, %v6243_v37 }
 0x201   : > { %v2793_v32 = vpop.f32.mrf.mxu0 }
 0x202   : > { %v2701_v41 = vpop.f32.mrf.mxu3  ;;  %v2882_v55 = vpop.f32.mrf.mxu1 }
 0x203   : > { %v2791_v2 = vadd.f32 %v2790_v13, %v2701_v41  ;;  %v5538_v13 = vld [vmem:[%s6702_s3] sm:$0xff] }
 0x204   : > { %3540 = vmatmul.bf16.gmra.mxu2 %v5058_v24  ;;  %3718 = vmatmul.bf16.gmra.mxu0 %v5066_v34 }
 0x205   : > { %v2880_v22 = vadd.f32 %v2879_v53, %v2791_v2  ;;  %v5484_v53 = vld [vmem:[#allocation2 + $0xc4] sm:$0xf]  ;;  %4061 = vmatpush.bf16.msra.mxu1 %v5538_v13 }
 0x206   : > { %v5074_v25 = vor.u32 %v5484_v53, %v5071_v7 }
 0x207   : > { %v6478_v51 = vadd.f32 %v2880_v22, %v2067_v60  ;;  %3629 = vmatmul.bf16.gmra.mxu3 %v5062_v29  ;;  %v2069_v58 = vpop.f32.mrf.mxu2 }
 0x208   : > { %v2070_v59 = vadd.f32 %v2069_v58, %v6251_v52  ;;  %v5081_v58 = vld [vmem:[#allocation2 + $0xd8] sm:$0xf] }
 0x209   : > { %v2795_v33 = vpop.f32.mrf.mxu0 }
 0x20a   : > { %v2704_v61 = vpop.f32.mrf.mxu3  ;;  %v2884_v37 = vpop.f32.mrf.mxu1 }
 0x20b   : > { %v2794_v3 = vadd.f32 %v2793_v32, %v2704_v61  ;;  %v5488_v61 = vld [vmem:[#allocation2 + $0xe0] sm:$0xf0] }
 0x20c   : > { %v5082_v5 = vor.u32 %v5488_v61, %v5081_v58 }
 0x20d   : > { %v2883_v48 = vadd.f32 %v2882_v55, %v2794_v3  ;;  %v5089_v3 = vld [vmem:[#allocation2 + $0xe0] sm:$0xf] }
 0x20f   : > { %v6481_v47 = vadd.f32 %v2883_v48, %v2070_v59  ;;  %v2071_v46 = vpop.f32.mrf.mxu2  ;;  %v5083_v48 = vld [vmem:[#allocation2 + $0xe4] sm:$0xf0] }
 0x210   : > { %v2072_v52 = vadd.f32 %v2071_v46, %v6258_v23 }
 0x211   : > { %v2798_v56 = vpop.f32.mrf.mxu0 }
 0x212   : > { %v2706_v30 = vpop.f32.mrf.mxu3  ;;  %v2887_v60 = vpop.f32.mrf.mxu1 }
 0x213   : > { %v2796_v11 = vadd.f32 %v2795_v33, %v2706_v30  ;;  %v5489_v33 = vld [vmem:[#allocation2 + $0xe8] sm:$0xf0] }
 0x214   : > { %3545 = vmatmul.bf16.gmra.mxu2 %v5070_v9  ;;  %3723 = vmatmul.bf16.gmra.mxu0 %v5078_v14  ;;  %v5090_v13 = vor.u32 %v5489_v33, %v5089_v3 }
 0x215   : > { %v2885_v41 = vadd.f32 %v2884_v37, %v2796_v11  ;;  %v5487_v37 = vld [vmem:[#allocation2 + $0xdc] sm:$0xf] }
 0x216   : > { %v5086_v7 = vor.u32 %v5487_v37, %v5083_v48 }
 0x217   : > { %v6487_v24 = vadd.f32 %v2885_v41, %v2072_v52  ;;  %3634 = vmatmul.bf16.gmra.mxu3 %v5074_v25  ;;  %v2074_v34 = vpop.f32.mrf.mxu2 }
 0x218   : > { %v2075_v2 = vadd.f32 %v2074_v34, %v6272_v43  ;;  %v5491_v34 = vld [vmem:[#allocation2 + $0xf8] sm:$0xf0] }
 0x219   : > { %v2800_v55 = vpop.f32.mrf.mxu0 }
 0x21a   : > { %v2709_v32 = vpop.f32.mrf.mxu3  ;;  %v2889_v22 = vpop.f32.mrf.mxu1 }
 0x21b   : > { %v2799_v29 = vadd.f32 %v2798_v56, %v2709_v32  ;;  %v5492_v32 = vld [vmem:[#allocation2 + $0x100] sm:$0xf0] }
 0x21d   : > { %v2888_v23 = vadd.f32 %v2887_v60, %v2799_v29  ;;  %v5093_v60 = vld [vmem:[#allocation2 + $0xf0] sm:$0xf]  ;;  %v5490_v29 = vld [vmem:[#allocation2 + $0xf4] sm:$0xf] }
 0x21e   : > { %v5094_v3 = vor.u32 %v5491_v34, %v5093_v60  ;;  %v6505_v34 = vld [vmem:[%s6703_s4] ss:$0 sm:$0xff] }
 0x21f   : > { %v6490_v59 = vadd.f32 %v2888_v23, %v2075_v2  ;;  %v2076_v63 = vpop.f32.mrf.mxu2  ;;  %v5101_v2 = vld [vmem:[#allocation2 + $0xf8] sm:$0xf] }
 0x220   : > { %v2077_v54 = vadd.f32 %v2076_v63, %v6282_v17  ;;  %v5102_v33 = vor.u32 %v5492_v32, %v5101_v2 }
 0x221   : > { %v2803_v53 = vpop.f32.mrf.mxu0 }
 0x222   : > { %v2711_v44 = vpop.f32.mrf.mxu3  ;;  %v2892_v30 = vpop.f32.mrf.mxu1 }
 0x223   : > { %v2801_v43 = vadd.f32 %v2800_v55, %v2711_v44  ;;  %v5095_v55 = vld [vmem:[#allocation2 + $0xfc] sm:$0xf0] }
 0x224   : > { %3550 = vmatmul.bf16.gmra.mxu2 %v5082_v5  ;;  %3728 = vmatmul.bf16.gmra.mxu0 %v5090_v13  ;;  %v5098_v48 = vor.u32 %v5490_v29, %v5095_v55 }
 0x225   : > { %v2890_v46 = vadd.f32 %v2889_v22, %v2801_v43 }
 0x227   : > { %v6493_v52 = vadd.f32 %v2890_v46, %v2077_v54  ;;  %3639 = vmatmul.bf16.gmra.mxu3 %v5086_v7  ;;  %v2079_v9 = vpop.f32.mrf.mxu2  ;;  %v5113_v46 = vld [vmem:[#allocation2 + $0x110] sm:$0xf] }
 0x228   : > { %v2080_v14 = vadd.f32 %v2079_v9, %v6290_v35  ;;  %v5493_v9 = vld [vmem:[#allocation2 + $0x10c] sm:$0xf] }
 0x229   : > { %v2805_v25 = vpop.f32.mrf.mxu0 }
 0x22a   : > { %v2714_v11 = vpop.f32.mrf.mxu3  ;;  %v2894_v61 = vpop.f32.mrf.mxu1 }
 0x22b   : > { %v2804_v56 = vadd.f32 %v2803_v53, %v2714_v11  ;;  %v5105_v53 = vld [vmem:[#allocation2 + $0x108] sm:$0xf] }
 0x22d   : > { %v2893_v17 = vadd.f32 %v2892_v30, %v2804_v56  ;;  %v5495_v30 = vld [vmem:[#allocation2 + $0x118] sm:$0xf0] }
 0x22f   : > { %v6496_v41 = vadd.f32 %v2893_v17, %v2080_v14  ;;  %v2081_v23 = vpop.f32.mrf.mxu2  ;;  %v5107_v14 = vld [vmem:[#allocation2 + $0x114] sm:$0xf0]  ;;  %v5114_v17 = vor.u32 %v5495_v30, %v5113_v46 }
 0x230   : > { %v2082_v22 = vadd.f32 %v2081_v23, %v6300_v16  ;;  %v5494_v16 = vld [vmem:[#allocation2 + $0x110] sm:$0xf0]  ;;  %v5110_v29 = vor.u32 %v5493_v9, %v5107_v14 }
 0x231   : > { %v3694_v37 = vpop.f32.mrf.mxu0 }
 0x232   : > { %v2716_v58 = vpop.f32.mrf.mxu3 }
 0x233   : > { %v2806_v35 = vadd.f32 %v2805_v25, %v2716_v58  ;;  %v5106_v25 = vor.u32 %v5494_v16, %v5105_v53  ;;  %v5496_v53 = vld [vmem:[#allocation2 + $0x124] sm:$0xf] }
 0x234   : > { %3555 = vmatmul.bf16.gmra.mxu2 %v5094_v3  ;;  %3733 = vmatmul.bf16.gmra.mxu0 %v5102_v33 }
 0x235   : > { %v2895_v63 = vadd.f32 %v2894_v61, %v2806_v35 }
 0x237   : > { %v6499_v54 = vadd.f32 %v2895_v63, %v2082_v22  ;;  %3644 = vmatmul.bf16.gmra.mxu3 %v5098_v48  ;;  %v3516_v44 = vpop.f32.mrf.mxu2  ;;  %v5117_v63 = vld [vmem:[#allocation2 + $0x120] sm:$0xf] }
 0x239   : > { %v3696_v43 = vpop.f32.mrf.mxu0 }
 0x23a   : > { %v3605_v5 = vpop.f32.mrf.mxu3 }
 0x23b   : > { %v3606_v13 = vadd.f32 %v3605_v5, %v3516_v44  ;;  %v5497_v5 = vld [vmem:[#allocation2 + $0x128] sm:$0xf0] }
 0x23c   : > { %v5118_v46 = vor.u32 %v5497_v5, %v5117_v63 }
 0x23d   : > { %v3695_v7 = vadd.f32 %v3694_v37, %v3606_v13  ;;  %v5125_v13 = vld [vmem:[#allocation2 + $0x128] sm:$0xf] }
 0x23f   : > { %v3518_v11 = vpop.f32.mrf.mxu2  ;;  %v3806_v60 = vadd.f32 %v3695_v7, %v6313_v0  ;;  %v5119_v7 = vld [vmem:[#allocation2 + $0x12c] sm:$0xf0] }
 0x241   : > { %v3699_v32 = vpop.f32.mrf.mxu0  ;;  %v3906_v23 = vadd.f32 %v6505_v34, %v3806_v60 }
 0x242   : > { %v3607_v56 = vpop.f32.mrf.mxu3 }
 0x243   : > { %v3608_v2 = vadd.f32 %v3607_v56, %v3518_v11  ;;  %v3938_v3 = vmax.f32 %v3906_v23, 0.0  ;;  %v5122_v56 = vor.u32 %v5496_v53, %v5119_v7 }
 0x244   : > { %3560 = vmatmul.bf16.gmra.mxu2 %v5106_v25  ;;  %3738 = vmatmul.bf16.gmra.mxu0 %v5114_v17 }
 0x245   : > { %v3697_v55 = vadd.f32 %v3696_v43, %v3608_v2  ;;  %v5498_v43 = vld [vmem:[#allocation2 + $0x130] sm:$0xf0] }
 0x246   : > { %v5126_v30 = vor.u32 %v5498_v43, %v5125_v13 }
 0x247   : > { %v3807_v22 = vadd.f32 %v3697_v55, %v6326_v40  ;;  %3649 = vmatmul.bf16.gmra.mxu3 %v5110_v29  ;;  %v3521_v61 = vpop.f32.mrf.mxu2 }
 0x249   : > { %v3907_v58 = vadd.f32 %v6505_v34, %v3807_v22  ;;  %v3701_v37 = vpop.f32.mrf.mxu0 }
 0x24a   : > { %v3610_v0 = vpop.f32.mrf.mxu3 }
 0x24b   : > { %v3939_v33 = vmax.f32 %v3907_v58, 0.0  ;;  %v3611_v35 = vadd.f32 %v3610_v0, %v3521_v61  ;;  %v5129_v61 = vld [vmem:[#allocation2 + $0x138] sm:$0xf] }
 0x24d   : > { %v3970_v48 = vpack.c.bf16 %v3939_v33, %v3938_v3  ;;  %v3700_v44 = vadd.f32 %v3699_v32, %v3611_v35  ;;  %v5500_v3 = vld [vmem:[#allocation2 + $0x140] sm:$0xf0]  ;;  %v5137_v33 = vld [vmem:[#allocation2 + $0x140] sm:$0xf]  ;;  %v5501_v35 = vld [vmem:[#allocation2 + $0x148] sm:$0xf0] }
 0x24e   : > { %v5138_v5 = vor.u32 %v5501_v35, %v5137_v33 }
 0x24f   : > { %4062 = vmatmul.bf16.vlgmr.msra.gmra.mxu1 %v3970_v48  ;;  %v3523_v16 = vpop.f32.mrf.mxu2  ;;  %v3808_v9 = vadd.f32 %v3700_v44, %v6329_v12  ;;  %v5130_v44 = vor.u32 %v5500_v3, %v5129_v61 }
 0x251   : > { %v3704_v11 = vpop.f32.mrf.mxu0  ;;  %v3908_v60 = vadd.f32 %v6505_v34, %v3808_v9 }
 0x252   : > { %v3612_v40 = vpop.f32.mrf.mxu3 }
 0x253   : > { %v3613_v14 = vadd.f32 %v3612_v40, %v3523_v16  ;;  %v3940_v22 = vmax.f32 %v3908_v60, 0.0 }
 0x254   : > { %3565 = vmatmul.bf16.gmra.mxu2 %v5118_v46  ;;  %3743 = vmatmul.bf16.gmra.mxu0 %v5126_v30 }
 0x255   : > { %v3702_v25 = vadd.f32 %v3701_v37, %v3613_v14  ;;  %v5499_v37 = vld [vmem:[#allocation2 + $0x13c] sm:$0xf] }
 0x257   : > { %v3809_v17 = vadd.f32 %v3702_v25, %v6342_v10  ;;  %3654 = vmatmul.bf16.gmra.mxu3 %v5122_v56  ;;  %v3526_v2 = vpop.f32.mrf.mxu2  ;;  %v5131_v10 = vld [vmem:[#allocation2 + $0x144] sm:$0xf0] }
 0x258   : > { %v5134_v7 = vor.u32 %v5499_v37, %v5131_v10  ;;  %v937_v10 = vld [vmem:[%s6378_s17 + $0xc] sm:$0xf] }
 0x259   : > { %v3909_v32 = vadd.f32 %v6505_v34, %v3809_v17  ;;  %v3706_v23 = vpop.f32.mrf.mxu0 }
 0x25a   : > { %v3615_v29 = vpop.f32.mrf.mxu3 }
 0x25b   : > { %v3616_v55 = vadd.f32 %v3615_v29, %v3526_v2  ;;  %v3941_v58 = vmax.f32 %v3909_v32, 0.0  ;;  %v5141_v2 = vld [vmem:[#allocation2 + $0x150] sm:$0xf]  ;;  %v5149_v29 = vld [vmem:[#allocation2 + $0x158] sm:$0xf] }
 0x25d   : > { %v3971_v12 = vpack.c.bf16 %v3941_v58, %v3940_v22  ;;  %v3705_v0 = vadd.f32 %v3704_v11, %v3616_v55  ;;  %v5504_v55 = vld [vmem:[#allocation2 + $0x160] sm:$0xf0]  ;;  %v5143_v22 = vld [vmem:[#allocation2 + $0x15c] sm:$0xf0] }
 0x25f   : > { %4067 = vmatmul.bf16.gmra.mxu1 %v3971_v12  ;;  %v3528_v48 = vpop.f32.mrf.mxu2  ;;  %v3810_v13 = vadd.f32 %v3705_v0, %v6351_v27  ;;  %v5150_v0 = vor.u32 %v5504_v55, %v5149_v29 }
 0x261   : > { %v3709_v53 = vpop.f32.mrf.mxu0  ;;  %v3910_v46 = vadd.f32 %v6505_v34, %v3810_v13 }
 0x262   : > { %v3617_v63 = vpop.f32.mrf.mxu3 }
 0x263   : > { %v3618_v43 = vadd.f32 %v3617_v63, %v3528_v48  ;;  %v3942_v25 = vmax.f32 %v3910_v46, 0.0 }
 0x264   : > { %3570 = vmatmul.bf16.gmra.mxu2 %v5130_v44  ;;  %3748 = vmatmul.bf16.gmra.mxu0 %v5138_v5  ;;  %v965_v44 = vshrl.u32 %v937_v10, 16  ;;  %v968_v5 = vshll.u32 %v937_v10, 16  ;;  %v5506_v10 = vld [vmem:[#allocation2 + $0x170] sm:$0xf0] }
 0x265   : > { %v3707_v16 = vadd.f32 %v3706_v23, %v3618_v43  ;;  %v5502_v23 = vld [vmem:[#allocation2 + $0x154] sm:$0xf] }
 0x266   : > { %v5146_v37 = vor.u32 %v5502_v23, %v5143_v22  ;;  %v939_v43 = vld [vmem:[%s6378_s17 + $0x14] sm:$0x1]  ;;  %v970_v46 = vrot.slane %v968_v5, 5  ;;  %v5161_v5 = vld [vmem:[#allocation2 + $0x170] sm:$0xf] }
 0x267   : > { %v3811_v40 = vadd.f32 %v3707_v16, %v6364_v50  ;;  %3659 = vmatmul.bf16.gmra.mxu3 %v5134_v7  ;;  %v3531_v30 = vpop.f32.mrf.mxu2  ;;  %v5503_v50 = vld [vmem:[#allocation2 + $0x158] sm:$0xf0]  ;;  %v1275_v16 = vld [vmem:[%s6378_s17 + $0x10] sm:$0xf] }
 0x268   : > { %v5142_v61 = vor.u32 %v5503_v50, %v5141_v2 }
 0x269   : > { %v3911_v9 = vadd.f32 %v6505_v34, %v3811_v40  ;;  %v3711_v56 = vpop.f32.mrf.mxu0  ;;  %v967_v40 = vrot.slane %v965_v44, 4 }
 0x26a   : > { %v3620_v14 = vpop.f32.mrf.mxu3 }
 0x26b   : > { %v3621_v11 = vadd.f32 %v3620_v14, %v3531_v30  ;;  %v3943_v17 = vmax.f32 %v3911_v9, 0.0  ;;  %v984_v30 = vshll.u32 %v939_v43, 16  ;;  %v1292_v9 = vrot.slane %v1275_v16, 5 }
 0x26d   : > { %v3710_v27 = vadd.f32 %v3709_v53, %v3621_v11  ;;  %v3972_v60 = vpack.c.bf16 %v3943_v17, %v3942_v25  ;;  %v1274_v17 = vld [vmem:[%s6378_s17 + $0xc] sm:$0xe]  ;;  %v986_v2 = vrot.slane %v984_v30, 5  ;;  %v1294_v50 = vrot.slane %v1292_v9, 4 }
 0x26f   : > { %v3812_v32 = vadd.f32 %v3710_v27, %v6369_v45  ;;  %4072 = vmatmul.bf16.gmra.mxu1 %v3972_v60  ;;  %v3533_v58 = vpop.f32.mrf.mxu2  ;;  %v938_v45 = vld [vmem:[%s6378_s17 + $0x10] sm:$0xf]  ;;  %v1276_v27 = vld [vmem:[%s6378_s17 + $0x14] sm:$0x1] }
 0x270   : > { %v974_v53 = vshll.u32 %v938_v45, 16  ;;  %v978_v7 = vshrl.u32 %v938_v45, 16 }
 0x271   : > { %v3912_v3 = vadd.f32 %v6505_v34, %v3812_v32  ;;  %v3714_v35 = vpop.f32.mrf.mxu0  ;;  %v4322_v32 = vrot.slane %v1274_v17, 9 }
 0x272   : > { %v3622_v12 = vpop.f32.mrf.mxu3  ;;  %v980_v25 = vrot.slane %v978_v7, 4  ;;  %v5155_v7 = vld [vmem:[#allocation2 + $0x174] sm:$0xf0] }
 0x273   : > { %v3623_v33 = vadd.f32 %v3622_v12, %v3533_v58  ;;  %v3944_v63 = vmax.f32 %v3912_v3, 0.0  ;;  %v1295_v58 = vrot.slane %v1276_v27, 5  ;;  %v428_v12 = vld [vmem:[%s6378_s17 + $0xc] sm:$0xf] }
 0x274   : > { %3575 = vmatmul.bf16.gmra.mxu2 %v5142_v61  ;;  %3753 = vmatmul.bf16.gmra.mxu0 %v5150_v0  ;;  %v429_v61 = vld [vmem:[%s6378_s17 + $0x10] sm:$0xf]  ;;  %433 = vst [vmem:[#allocation2 + $0x198] sm:$0xf] %v428_v12  ;;  %v5510_v12 = vld [vmem:[#allocation2 + $0x190] sm:$0xf0] }
 0x275   : > { %v3712_v48 = vadd.f32 %v3711_v56, %v3623_v33  ;;  %v976_v56 = vrot.slane %v974_v53, 5  ;;  %434 = vst [vmem:[#allocation2 + $0x1a4] sm:$0xf] %v429_v61  ;;  %v5505_v53 = vld [vmem:[#allocation2 + $0x16c] sm:$0xf]  ;;  %s322_s17 = sand.u32 1, %s5687_s22  }
 0x276   : > { %v5508_v61 = vld [vmem:[#allocation2 + $0x184] sm:$0xf]  ;;  %s4302_s28 = sshll.u32 %s322_s17, 8  ;;  %s4176_s18 = scalar_lea.sflag [#allocation5], %s322_s17 }
 0x277   : > { %v3813_v13 = vadd.f32 %v3712_v48, %v6389_v26  ;;  %3664 = vmatmul.bf16.gmra.mxu3 %v5146_v37  ;;  %v3536_v14 = vpop.f32.mrf.mxu2  ;;  %v971_v26 = vor.u32 %v970_v46, %v967_v40  ;;  %v981_v22 = vor.u32 %v980_v25, %v976_v56  ;;  %v5153_v37 = vld [vmem:[#allocation2 + $0x168] sm:$0xf]  ;;  %v1293_v48 = vsel %vm6097_vm5, %v4322_v32, %v1292_v9  ;;  %s6567_s11 = scalar_lea.vmem [#allocation4], %s4302_s28 }
 0x278   : > { %1303 = vst [vmem:[#allocation2 + $0x1a0] sm:$0xf] %v1293_v48  ;;  %v5154_v46 = vor.u32 %v5506_v10, %v5153_v37  ;;  %s4191_s20 = sshll.u32 %s6567_s11, 4  ;;  %s4192_s20 = int_to_ptr.vmem [resolvable:$true] %s4191_s20 }
 0x279   : > { %v3913_v11 = vadd.f32 %v6505_v34, %v3813_v13  ;;  %v3716_v55 = vpop.f32.mrf.mxu0  ;;  %v972_v0 = vrot.slane %v971_v26, 4  ;;  %v982_v33 = vrot.slane %v981_v22, 4  ;;  %v5507_v13 = vld [vmem:[#allocation2 + $0x178] sm:$0xf0] }
 0x27a   : > { %v3625_v60 = vpop.f32.mrf.mxu3  ;;  %v5162_v30 = vor.u32 %v5507_v13, %v5161_v5 }
 0x27b   : > { %v3626_v29 = vadd.f32 %v3625_v60, %v3536_v14  ;;  %v3945_v23 = vmax.f32 %v3913_v11, 0.0  ;;  %v977_v45 = vsel %vm5852_vm2, %v972_v0, %v976_v56  ;;  %v987_v43 = vsel %vm5852_vm2, %v982_v33, %v986_v2 }
 0x27c   : > { %994 = vst [vmem:[#allocation2 + $0x19c] sm:$0xf] %v977_v45  ;;  %v5158_v56 = vor.u32 %v5505_v53, %v5155_v7 }
 0x27d   : > { %v3973_v3 = vpack.c.bf16 %v3945_v23, %v3944_v63  ;;  %v3715_v44 = vadd.f32 %v3714_v35, %v3626_v29  ;;  %v1296_v63 = vsel %vm6097_vm5, %v1294_v50, %v1295_v58  ;;  %995 = vst [vmem:[#allocation2 + $0x1a8] sm:$0xf] %v987_v43  ;;  %v6713_v35 = vld [vmem:[#allocation7_spill] sm:$0xff]  ;;  %v5165_v23 = vld [vmem:[#allocation2 + $0x180] sm:$0xf] }
 0x27e   : > { %1304 = vst [vmem:[#allocation2 + $0x1ac] sm:$0xf] %v1296_v63  ;;  %v5173_v58 = vld [vmem:[#allocation2 + $0x188] sm:$0xf] }
 0x27f   : > { %4077 = vmatmul.bf16.gmra.mxu1 %v3973_v3  ;;  %v3538_v16 = vpop.f32.mrf.mxu2  ;;  %v3814_v9 = vadd.f32 %v3715_v44, %v6713_v35  ;;  %v5174_v37 = vor.u32 %v5510_v12, %v5173_v58  ;;  %v5177_v35 = vld [vmem:[#allocation2 + $0x198] sm:$0xf] }
 0x281   : > { %v3719_v11 = vpop.f32.mrf.mxu0  ;;  %v3914_v25 = vadd.f32 %v6505_v34, %v3814_v9 }
 0x282   : > { %v3627_v40 = vpop.f32.mrf.mxu3 }
 0x283   : > { %v3628_v14 = vadd.f32 %v3627_v40, %v3538_v16  ;;  %v3946_v32 = vmax.f32 %v3914_v25, 0.0 }
 0x284   : > { %3580 = vmatmul.bf16.gmra.mxu2 %v5154_v46  ;;  %3758 = vmatmul.bf16.gmra.mxu0 %v5162_v30 }
 0x285   : > { %v3717_v38 = vadd.f32 %v3716_v55, %v3628_v14  ;;  %v5509_v55 = vld [vmem:[#allocation2 + $0x188] sm:$0xf0]  ;;  %v5512_v14 = vld [vmem:[#allocation2 + $0x1a0] sm:$0xf0] }
 0x286   : > { %v5166_v33 = vor.u32 %v5509_v55, %v5165_v23 }
 0x287   : > { %v3815_v18 = vadd.f32 %v3717_v38, %v6418_v6  ;;  %3669 = vmatmul.bf16.gmra.mxu3 %v5158_v56  ;;  %v3541_v17 = vpop.f32.mrf.mxu2  ;;  %v5167_v6 = vld [vmem:[#allocation2 + $0x18c] sm:$0xf0]  ;;  %v5513_v56 = vld [vmem:[#allocation2 + $0x1a8] sm:$0xf0]  ;;  %v5511_v38 = vld [vmem:[#allocation2 + $0x19c] sm:$0xf] }
 0x288   : > { %v5170_v44 = vor.u32 %v5508_v61, %v5167_v6 }
 0x289   : > { %v3915_v27 = vadd.f32 %v6505_v34, %v3815_v18  ;;  %v3721_v2 = vpop.f32.mrf.mxu0 }
 0x28a   : > { %v3630_v60 = vpop.f32.mrf.mxu3 }
 0x28b   : > { %v3631_v26 = vadd.f32 %v3630_v60, %v3541_v17  ;;  %v3947_v50 = vmax.f32 %v3915_v27, 0.0  ;;  %v5178_v17 = vor.u32 %v5512_v14, %v5177_v35 }
 0x28d   : > { %v3974_v29 = vpack.c.bf16 %v3947_v50, %v3946_v32  ;;  %v3720_v22 = vadd.f32 %v3719_v11, %v3631_v26  ;;  %v5185_v11 = vld [vmem:[#allocation2 + $0x1a0] sm:$0xf] }
 0x28e   : > { %v5186_v27 = vor.u32 %v5513_v56, %v5185_v11 }
 0x28f   : > { %4082 = vmatmul.bf16.gmra.mxu1 %v3974_v29  ;;  %v3543_v0 = vpop.f32.mrf.mxu2  ;;  %v3816_v10 = vadd.f32 %v3720_v22, %v6421_v8 }
 0x291   : > { %v3724_v48 = vpop.f32.mrf.mxu0  ;;  %v3916_v43 = vadd.f32 %v6505_v34, %v3816_v10 }
 0x292   : > { %v3632_v3 = vpop.f32.mrf.mxu3 }
 0x293   : > { %v3633_v45 = vadd.f32 %v3632_v3, %v3543_v0  ;;  %v3948_v46 = vmax.f32 %v3916_v43, 0.0 }
 0x294   : > { %3585 = vmatmul.bf16.gmra.mxu2 %v5166_v33  ;;  %3763 = vmatmul.bf16.gmra.mxu0 %v5174_v37 }
 0x295   : > { %v3722_v5 = vadd.f32 %v3721_v2, %v3633_v45 }
 0x297   : > { %v3817_v13 = vadd.f32 %v3722_v5, %v6427_v15  ;;  %3674 = vmatmul.bf16.gmra.mxu3 %v5170_v44  ;;  %v3546_v63 = vpop.f32.mrf.mxu2  ;;  %v5179_v15 = vld [vmem:[#allocation2 + $0x1a4] sm:$0xf0] }
 0x298   : > { %v5182_v32 = vor.u32 %v5511_v38, %v5179_v15  ;;  %v6563_v15 = vld [vmem:[%s6704_s5] ss:$0 sm:$0xff] }
 0x299   : > { %v3917_v53 = vadd.f32 %v6505_v34, %v3817_v13  ;;  %v3726_v40 = vpop.f32.mrf.mxu0 }
 0x29a   : > { %v3635_v7 = vpop.f32.mrf.mxu3 }
 0x29b   : > { %v3636_v16 = vadd.f32 %v3635_v7, %v3546_v63  ;;  %v3949_v30 = vmax.f32 %v3917_v53, 0.0 }
 0x29d   : > { %v3975_v8 = vpack.c.bf16 %v3949_v30, %v3948_v46  ;;  %v3725_v9 = vadd.f32 %v3724_v48, %v3636_v16 }
 0x29f   : > { %4087 = vmatmul.bf16.gmra.mxu1 %v3975_v8  ;;  %v3548_v18 = vpop.f32.mrf.mxu2  ;;  %v3818_v60 = vadd.f32 %v3725_v9, %v6430_v28 }
 0x2a1   : > { %v3729_v2 = vpop.f32.mrf.mxu0  ;;  %v3918_v23 = vadd.f32 %v6505_v34, %v3818_v60 }
 0x2a2   : > { %v3637_v25 = vpop.f32.mrf.mxu3 }
 0x2a3   : > { %v3638_v26 = vadd.f32 %v3637_v25, %v3548_v18  ;;  %v3950_v6 = vmax.f32 %v3918_v23, 0.0 }
 0x2a4   : > { %3590 = vmatmul.bf16.gmra.mxu2 %v5178_v17  ;;  %3768 = vmatmul.bf16.gmra.mxu0 %v5186_v27 }
 0x2a5   : > { %v3727_v50 = vadd.f32 %v3726_v40, %v3638_v26 }
 0x2a7   : > { %v3819_v29 = vadd.f32 %v3727_v50, %v6433_v4  ;;  %3679 = vmatmul.bf16.gmra.mxu3 %v5182_v32  ;;  %v3551_v22 = vpop.f32.mrf.mxu2 }
 0x2a9   : > { %v3919_v55 = vadd.f32 %v6505_v34, %v3819_v29  ;;  %v3731_v61 = vpop.f32.mrf.mxu0 }
 0x2aa   : > { %v3640_v58 = vpop.f32.mrf.mxu3 }
 0x2ab   : > { %v3641_v12 = vadd.f32 %v3640_v58, %v3551_v22  ;;  %v3951_v0 = vmax.f32 %v3919_v55, 0.0 }
 0x2ad   : > { %v3976_v28 = vpack.c.bf16 %v3951_v0, %v3950_v6  ;;  %v3730_v3 = vadd.f32 %v3729_v2, %v3641_v12 }
 0x2af   : > { %4092 = vmatmul.bf16.gmra.mxu1 %v3976_v28  ;;  %v3553_v33 = vpop.f32.mrf.mxu2  ;;  %v3820_v10 = vadd.f32 %v3730_v3, %v6436_v1 }
 0x2b1   : > { %v3734_v4 = vpop.f32.mrf.mxu0  ;;  %v3920_v5 = vadd.f32 %v6505_v34, %v3820_v10 }
 0x2b2   : > { %v3642_v37 = vpop.f32.mrf.mxu3 }
 0x2b3   : > { %v3643_v45 = vadd.f32 %v3642_v37, %v3553_v33  ;;  %v3952_v16 = vmax.f32 %v3920_v5, 0.0 }
 0x2b5   : > { %v3732_v48 = vadd.f32 %v3731_v61, %v3643_v45 }
 0x2b7   : > { %v3821_v44 = vadd.f32 %v3732_v48, %v6442_v31  ;;  %v3556_v13 = vpop.f32.mrf.mxu2 }
 0x2b9   : > { %v3921_v43 = vadd.f32 %v6505_v34, %v3821_v44  ;;  %v3736_v7 = vpop.f32.mrf.mxu0 }
 0x2ba   : > { %v3645_v63 = vpop.f32.mrf.mxu3 }
 0x2bb   : > { %v3646_v53 = vadd.f32 %v3645_v63, %v3556_v13  ;;  %v3953_v40 = vmax.f32 %v3921_v43, 0.0 }
 0x2bd   : > { %v3977_v46 = vpack.c.bf16 %v3953_v40, %v3952_v16  ;;  %v3735_v30 = vadd.f32 %v3734_v4, %v3646_v53 }
 0x2bf   : > { %4097 = vmatmul.bf16.gmra.mxu1 %v3977_v46  ;;  %v3558_v1 = vpop.f32.mrf.mxu2  ;;  %v3822_v35 = vadd.f32 %v3735_v30, %v6445_v20 }
 0x2c1   : > { %v3739_v9 = vpop.f32.mrf.mxu0  ;;  %v3922_v56 = vadd.f32 %v6505_v34, %v3822_v35 }
 0x2c2   : > { %v3647_v8 = vpop.f32.mrf.mxu3 }
 0x2c3   : > { %v3648_v31 = vadd.f32 %v3647_v8, %v3558_v1  ;;  %v3954_v27 = vmax.f32 %v3922_v56, 0.0 }
 0x2c5   : > { %v3737_v14 = vadd.f32 %v3736_v7, %v3648_v31 }
 0x2c7   : > { %v3823_v11 = vadd.f32 %v3737_v14, %v6448_v19  ;;  %v3561_v38 = vpop.f32.mrf.mxu2 }
 0x2c9   : > { %v3923_v18 = vadd.f32 %v6505_v34, %v3823_v11  ;;  %v3741_v17 = vpop.f32.mrf.mxu0 }
 0x2ca   : > { %v3650_v25 = vpop.f32.mrf.mxu3 }
 0x2cb   : > { %v3651_v20 = vadd.f32 %v3650_v25, %v3561_v38  ;;  %v3955_v60 = vmax.f32 %v3923_v18, 0.0 }
 0x2cc   : > { %v4063_v26 = vpop.f32.mrf.mxu1 }
 0x2cd   : > { %v4064_v19 = vadd.f32 %v6563_v15, %v4063_v26  ;;  %v3978_v2 = vpack.c.bf16 %v3955_v60, %v3954_v27  ;;  %v3740_v32 = vadd.f32 %v3739_v9, %v3651_v20 }
 0x2cf   : > { %4143 = vst [vmem:[%s6567_s11] sm:$0xff] %v4064_v19  ;;  %4102 = vmatmul.bf16.gmra.mxu1 %v3978_v2  ;;  %v3563_v50 = vpop.f32.mrf.mxu2  ;;  %v3824_v23 = vadd.f32 %v3740_v32, %v6451_v62 }
 0x2d1   : > { %v3744_v55 = vpop.f32.mrf.mxu0  ;;  %v3924_v0 = vadd.f32 %v6505_v34, %v3824_v23 }
 0x2d2   : > { %v3652_v29 = vpop.f32.mrf.mxu3 }
 0x2d3   : > { %v3653_v22 = vadd.f32 %v3652_v29, %v3563_v50  ;;  %v3956_v45 = vmax.f32 %v3924_v0, 0.0 }
 0x2d4   : > { %v4065_v58 = vpop.f32.mrf.mxu1 }
 0x2d5   : > { %v3742_v12 = vadd.f32 %v3741_v17, %v3653_v22  ;;  %v4066_v61 = vadd.f32 %v6563_v15, %v4065_v58 }
 0x2d7   : > { %v3825_v6 = vadd.f32 %v3742_v12, %v6457_v39  ;;  %4144 = vst [vmem:[%s6567_s11 + $0x8] sm:$0xff] %v4066_v61  ;;  %v3566_v28 = vpop.f32.mrf.mxu2 }
 0x2d9   : > { %v3925_v3 = vadd.f32 %v6505_v34, %v3825_v6  ;;  %v3746_v10 = vpop.f32.mrf.mxu0 }
 0x2da   : > { %v3655_v33 = vpop.f32.mrf.mxu3 }
 0x2db   : > { %v3656_v37 = vadd.f32 %v3655_v33, %v3566_v28  ;;  %v3957_v62 = vmax.f32 %v3925_v3, 0.0 }
 0x2dc   : > { %v4068_v4 = vpop.f32.mrf.mxu1 }
 0x2dd   : > { %v4069_v48 = vadd.f32 %v6563_v15, %v4068_v4  ;;  %v3979_v44 = vpack.c.bf16 %v3957_v62, %v3956_v45  ;;  %v3745_v5 = vadd.f32 %v3744_v55, %v3656_v37 }
 0x2df   : > { %4145 = vst [vmem:[%s6567_s11 + $0x10] sm:$0xff] %v4069_v48  ;;  %4107 = vmatmul.bf16.gmra.mxu1 %v3979_v44  ;;  %v3568_v39 = vpop.f32.mrf.mxu2  ;;  %v3826_v43 = vadd.f32 %v3745_v5, %v6460_v57 }
 0x2e1   : > { %v3749_v53 = vpop.f32.mrf.mxu0  ;;  %v3926_v30 = vadd.f32 %v6505_v34, %v3826_v43 }
 0x2e2   : > { %v3657_v13 = vpop.f32.mrf.mxu3 }
 0x2e3   : > { %v3658_v63 = vadd.f32 %v3657_v13, %v3568_v39  ;;  %v3958_v14 = vmax.f32 %v3926_v30, 0.0 }
 0x2e4   : > { %v4070_v7 = vpop.f32.mrf.mxu1 }
 0x2e5   : > { %v3747_v16 = vadd.f32 %v3746_v10, %v3658_v63  ;;  %v4071_v40 = vadd.f32 %v6563_v15, %v4070_v7 }
 0x2e7   : > { %v3827_v46 = vadd.f32 %v3747_v16, %v6463_v21  ;;  %4146 = vst [vmem:[%s6567_s11 + $0x18] sm:$0xff] %v4071_v40  ;;  %v3571_v1 = vpop.f32.mrf.mxu2 }
 0x2e9   : > { %v3927_v8 = vadd.f32 %v6505_v34, %v3827_v46  ;;  %v3751_v9 = vpop.f32.mrf.mxu0 }
 0x2ea   : > { %v3660_v35 = vpop.f32.mrf.mxu3 }
 0x2eb   : > { %v3661_v31 = vadd.f32 %v3660_v35, %v3571_v1  ;;  %v3959_v57 = vmax.f32 %v3927_v8, 0.0 }
 0x2ec   : > { %v4073_v11 = vpop.f32.mrf.mxu1 }
 0x2ed   : > { %v4074_v56 = vadd.f32 %v6563_v15, %v4073_v11  ;;  %v3980_v38 = vpack.c.bf16 %v3959_v57, %v3958_v14  ;;  %v3750_v18 = vadd.f32 %v3749_v53, %v3661_v31 }
 0x2ef   : > { %4147 = vst [vmem:[%s6567_s11 + $0x20] sm:$0xff] %v4074_v56  ;;  %4112 = vmatmul.bf16.gmra.mxu1 %v3980_v38  ;;  %v3573_v21 = vpop.f32.mrf.mxu2  ;;  %v3828_v20 = vadd.f32 %v3750_v18, %v6466_v36 }
 0x2f1   : > { %v3754_v27 = vpop.f32.mrf.mxu0  ;;  %v3928_v32 = vadd.f32 %v6505_v34, %v3828_v20 }
 0x2f2   : > { %v3662_v25 = vpop.f32.mrf.mxu3 }
 0x2f3   : > { %v3663_v17 = vadd.f32 %v3662_v25, %v3573_v21  ;;  %v3960_v58 = vmax.f32 %v3928_v32, 0.0 }
 0x2f4   : > { %v4075_v60 = vpop.f32.mrf.mxu1 }
 0x2f5   : > { %v3752_v26 = vadd.f32 %v3751_v9, %v3663_v17  ;;  %v4076_v19 = vadd.f32 %v6563_v15, %v4075_v60 }
 0x2f7   : > { %v3829_v2 = vadd.f32 %v3752_v26, %v6472_v49  ;;  %4148 = vst [vmem:[%s6567_s11 + $0x28] sm:$0xff] %v4076_v19  ;;  %v3576_v50 = vpop.f32.mrf.mxu2 }
 0x2f9   : > { %v3929_v29 = vadd.f32 %v6505_v34, %v3829_v2  ;;  %v3756_v55 = vpop.f32.mrf.mxu0 }
 0x2fa   : > { %v3665_v23 = vpop.f32.mrf.mxu3 }
 0x2fb   : > { %v3666_v22 = vadd.f32 %v3665_v23, %v3576_v50  ;;  %v3961_v36 = vmax.f32 %v3929_v29, 0.0 }
 0x2fc   : > { %v4078_v12 = vpop.f32.mrf.mxu1 }
 0x2fd   : > { %v4079_v61 = vadd.f32 %v6563_v15, %v4078_v12  ;;  %v3981_v6 = vpack.c.bf16 %v3961_v36, %v3960_v58  ;;  %v3755_v0 = vadd.f32 %v3754_v27, %v3666_v22 }
 0x2ff   : > { %4149 = vst [vmem:[%s6567_s11 + $0x30] sm:$0xff] %v4079_v61  ;;  %4117 = vmatmul.bf16.gmra.mxu1 %v3981_v6  ;;  %v3578_v49 = vpop.f32.mrf.mxu2  ;;  %v3830_v3 = vadd.f32 %v3755_v0, %v6475_v42 }
 0x301   : > { %v3759_v37 = vpop.f32.mrf.mxu0  ;;  %v3930_v48 = vadd.f32 %v6505_v34, %v3830_v3 }
 0x302   : > { %v3667_v28 = vpop.f32.mrf.mxu3 }
 0x303   : > { %v3668_v33 = vadd.f32 %v3667_v28, %v3578_v49  ;;  %v3962_v43 = vmax.f32 %v3930_v48, 0.0 }
 0x304   : > { %v4080_v10 = vpop.f32.mrf.mxu1 }
 0x305   : > { %v3757_v45 = vadd.f32 %v3756_v55, %v3668_v33  ;;  %v4081_v62 = vadd.f32 %v6563_v15, %v4080_v10 }
 0x307   : > { %v3831_v4 = vadd.f32 %v3757_v45, %v6478_v51  ;;  %4150 = vst [vmem:[%s6567_s11 + $0x38] sm:$0xff] %v4081_v62  ;;  %v3581_v44 = vpop.f32.mrf.mxu2 }
 0x309   : > { %v3931_v5 = vadd.f32 %v6505_v34, %v3831_v4  ;;  %v3761_v42 = vpop.f32.mrf.mxu0 }
 0x30a   : > { %v3670_v39 = vpop.f32.mrf.mxu3 }
 0x30b   : > { %v3671_v13 = vadd.f32 %v3670_v39, %v3581_v44  ;;  %v3963_v63 = vmax.f32 %v3931_v5, 0.0 }
 0x30c   : > { %v4083_v53 = vpop.f32.mrf.mxu1 }
 0x30d   : > { %v4084_v7 = vadd.f32 %v6563_v15, %v4083_v53  ;;  %v3982_v16 = vpack.c.bf16 %v3963_v63, %v3962_v43  ;;  %v3760_v40 = vadd.f32 %v3759_v37, %v3671_v13 }
 0x30f   : > { %4151 = vst [vmem:[%s6567_s11 + $0x40] sm:$0xff] %v4084_v7  ;;  %4122 = vmatmul.bf16.gmra.mxu1 %v3982_v16  ;;  %v3583_v51 = vpop.f32.mrf.mxu2  ;;  %v3832_v30 = vadd.f32 %v3760_v40, %v6481_v47 }
 0x311   : > { %v3764_v9 = vpop.f32.mrf.mxu0  ;;  %v3932_v57 = vadd.f32 %v6505_v34, %v3832_v30 }
 0x312   : > { %v3672_v46 = vpop.f32.mrf.mxu3 }
 0x313   : > { %v3673_v1 = vadd.f32 %v3672_v46, %v3583_v51  ;;  %v3964_v21 = vmax.f32 %v3932_v57, 0.0 }
 0x314   : > { %v4085_v8 = vpop.f32.mrf.mxu1 }
 0x315   : > { %v3762_v35 = vadd.f32 %v3761_v42, %v3673_v1  ;;  %v4086_v31 = vadd.f32 %v6563_v15, %v4085_v8 }
 0x317   : > { %v3833_v14 = vadd.f32 %v3762_v35, %v6487_v24  ;;  %4152 = vst [vmem:[%s6567_s11 + $0x48] sm:$0xff] %v4086_v31  ;;  %v3586_v11 = vpop.f32.mrf.mxu2 }
 0x319   : > { %v3933_v56 = vadd.f32 %v6505_v34, %v3833_v14  ;;  %v3766_v60 = vpop.f32.mrf.mxu0 }
 0x31a   : > { %v3675_v38 = vpop.f32.mrf.mxu3 }
 0x31b   : > { %v3676_v18 = vadd.f32 %v3675_v38, %v3586_v11  ;;  %v3965_v25 = vmax.f32 %v3933_v56, 0.0 }
 0x31c   : > { %v4088_v47 = vpop.f32.mrf.mxu1 }
 0x31d   : > { %v4089_v20 = vadd.f32 %v6563_v15, %v4088_v47  ;;  %v3983_v17 = vpack.c.bf16 %v3965_v25, %v3964_v21  ;;  %v3765_v27 = vadd.f32 %v3764_v9, %v3676_v18 }
 0x31f   : > { %4153 = vst [vmem:[%s6567_s11 + $0x50] sm:$0xff] %v4089_v20  ;;  %4127 = vmatmul.bf16.gmra.mxu1 %v3983_v17  ;;  %v3588_v24 = vpop.f32.mrf.mxu2  ;;  %v3834_v19 = vadd.f32 %v3765_v27, %v6490_v59 }
 0x321   : > { %v3934_v22 = vadd.f32 %v6505_v34, %v3834_v19  ;;  %v3769_v36 = vpop.f32.mrf.mxu0 }
 0x322   : > { %v3677_v26 = vpop.f32.mrf.mxu3 }
 0x323   : > { %v3678_v2 = vadd.f32 %v3677_v26, %v3588_v24  ;;  %v3966_v6 = vmax.f32 %v3934_v22, 0.0 }
 0x324   : > { %v4090_v32 = vpop.f32.mrf.mxu1 }
 0x325   : > { %v3767_v50 = vadd.f32 %v3766_v60, %v3678_v2  ;;  %v4091_v29 = vadd.f32 %v6563_v15, %v4090_v32 }
 0x327   : > { %v3835_v23 = vadd.f32 %v3767_v50, %v6493_v52  ;;  %4154 = vst [vmem:[%s6567_s11 + $0x58] sm:$0xff] %v4091_v29  ;;  %v3591_v55 = vpop.f32.mrf.mxu2 }
 0x329   : > { %v3935_v58 = vadd.f32 %v6505_v34, %v3835_v23  ;;  %v3771_v45 = vpop.f32.mrf.mxu0 }
 0x32a   : > { %v3680_v12 = vpop.f32.mrf.mxu3 }
 0x32b   : > { %v3681_v61 = vadd.f32 %v3680_v12, %v3591_v55  ;;  %v3967_v0 = vmax.f32 %v3935_v58, 0.0 }
 0x32c   : > { %v4093_v59 = vpop.f32.mrf.mxu1 }
 0x32d   : > { %v4094_v49 = vadd.f32 %v6563_v15, %v4093_v59  ;;  %v3984_v28 = vpack.c.bf16 %v3967_v0, %v3966_v6  ;;  %v3770_v3 = vadd.f32 %v3769_v36, %v3681_v61 }
 0x32f   : > { %4155 = vst [vmem:[%s6567_s11 + $0x60] sm:$0xff] %v4094_v49  ;;  %4132 = vmatmul.bf16.gmra.mxu1 %v3984_v28  ;;  %v3593_v52 = vpop.f32.mrf.mxu2  ;;  %v3836_v37 = vadd.f32 %v3770_v3, %v6496_v41 }
 0x331   : > { %v3936_v5 = vadd.f32 %v6505_v34, %v3836_v37 }
 0x332   : > { %v3682_v33 = vpop.f32.mrf.mxu3 }
 0x333   : > { %v3683_v10 = vadd.f32 %v3682_v33, %v3593_v52  ;;  %v3968_v13 = vmax.f32 %v3936_v5, 0.0 }
 0x334   : > { %v4095_v62 = vpop.f32.mrf.mxu1 }
 0x335   : > { %v3772_v4 = vadd.f32 %v3771_v45, %v3683_v10  ;;  %v4096_v48 = vadd.f32 %v6563_v15, %v4095_v62 }
 0x337   : > { %v3837_v44 = vadd.f32 %v3772_v4, %v6499_v54  ;;  %4156 = vst [vmem:[%s6567_s11 + $0x68] sm:$0xff] %v4096_v48 }
 0x339   : > { %v3937_v39 = vadd.f32 %v6505_v34, %v3837_v44 }
 0x33b   : > { %v3969_v43 = vmax.f32 %v3937_v39, 0.0 }
 0x33c   : > { %v4098_v63 = vpop.f32.mrf.mxu1 }
 0x33d   : > { %v4099_v41 = vadd.f32 %v6563_v15, %v4098_v63  ;;  %v3985_v42 = vpack.c.bf16 %v3969_v43, %v3968_v13 }
 0x33f   : > { %4157 = vst [vmem:[%s6567_s11 + $0x70] sm:$0xff] %v4099_v41  ;;  %4137 = vmatmul.bf16.gmra.mxu1 %v3985_v42 }
 0x344   : > { %v4100_v53 = vpop.f32.mrf.mxu1 }
 0x345   : > { %v4101_v54 = vadd.f32 %v6563_v15, %v4100_v53 }
 0x347   : > { %4158 = vst [vmem:[%s6567_s11 + $0x78] sm:$0xff] %v4101_v54 }
 0x34c   : > { %v4103_v7 = vpop.f32.mrf.mxu1 }
 0x34d   : > { %v4104_v16 = vadd.f32 %v6563_v15, %v4103_v7 }
 0x34f   : > { %4159 = vst [vmem:[%s6567_s11 + $0x80] sm:$0xff] %v4104_v16 }
 0x354   : > { %v4105_v34 = vpop.f32.mrf.mxu1 }
 0x355   : > { %v4106_v40 = vadd.f32 %v6563_v15, %v4105_v34 }
 0x357   : > { %4160 = vst [vmem:[%s6567_s11 + $0x88] sm:$0xff] %v4106_v40 }
 0x35c   : > { %v4108_v51 = vpop.f32.mrf.mxu1 }
 0x35d   : > { %v4109_v46 = vadd.f32 %v6563_v15, %v4108_v51 }
 0x35f   : > { %4161 = vst [vmem:[%s6567_s11 + $0x90] sm:$0xff] %v4109_v46 }
 0x364   : > { %v4110_v30 = vpop.f32.mrf.mxu1 }
 0x365   : > { %v4111_v1 = vadd.f32 %v6563_v15, %v4110_v30 }
 0x367   : > { %4162 = vst [vmem:[%s6567_s11 + $0x98] sm:$0xff] %v4111_v1 }
 0x36c   : > { %v4113_v8 = vpop.f32.mrf.mxu1 }
 0x36d   : > { %v4114_v35 = vadd.f32 %v6563_v15, %v4113_v8 }
 0x36f   : > { %4163 = vst [vmem:[%s6567_s11 + $0xa0] sm:$0xff] %v4114_v35 }
 0x374   : > { %v4115_v31 = vpop.f32.mrf.mxu1 }
 0x375   : > { %v4116_v9 = vadd.f32 %v6563_v15, %v4115_v31 }
 0x377   : > { %4164 = vst [vmem:[%s6567_s11 + $0xa8] sm:$0xff] %v4116_v9 }
 0x37c   : > { %v4118_v14 = vpop.f32.mrf.mxu1 }
 0x37d   : > { %v4119_v57 = vadd.f32 %v6563_v15, %v4118_v14 }
 0x37f   : > { %4165 = vst [vmem:[%s6567_s11 + $0xb0] sm:$0xff] %v4119_v57 }
 0x384   : > { %v4120_v11 = vpop.f32.mrf.mxu1 }
 0x385   : > { %v4121_v56 = vadd.f32 %v6563_v15, %v4120_v11 }
 0x387   : > { %4166 = vst [vmem:[%s6567_s11 + $0xb8] sm:$0xff] %v4121_v56 }
 0x38c   : > { %v4123_v38 = vpop.f32.mrf.mxu1 }
 0x38d   : > { %v4124_v18 = vadd.f32 %v6563_v15, %v4123_v38 }
 0x38f   : > { %4167 = vst [vmem:[%s6567_s11 + $0xc0] sm:$0xff] %v4124_v18 }
 0x394   : > { %v4125_v21 = vpop.f32.mrf.mxu1 }
 0x395   : > { %v4126_v25 = vadd.f32 %v6563_v15, %v4125_v21 }
 0x397   : > { %4168 = vst [vmem:[%s6567_s11 + $0xc8] sm:$0xff] %v4126_v25 }
 0x39c   : > { %v4128_v47 = vpop.f32.mrf.mxu1 }
 0x39d   : > { %v4129_v20 = vadd.f32 %v6563_v15, %v4128_v47 }
 0x39f   : > { %4169 = vst [vmem:[%s6567_s11 + $0xd0] sm:$0xff] %v4129_v20 }
 0x3a4   : > { %v4130_v17 = vpop.f32.mrf.mxu1 }
 0x3a5   : > { %v4131_v27 = vadd.f32 %v6563_v15, %v4130_v17 }
 0x3a7   : > { %4170 = vst [vmem:[%s6567_s11 + $0xd8] sm:$0xff] %v4131_v27 }
 0x3ac   : > { %v4133_v60 = vpop.f32.mrf.mxu1 }
 0x3ad   : > { %v4134_v24 = vadd.f32 %v6563_v15, %v4133_v60 }
 0x3af   : > { %4171 = vst [vmem:[%s6567_s11 + $0xe0] sm:$0xff] %v4134_v24 }
 0x3b4   : > { %v4135_v26 = vpop.f32.mrf.mxu1 }
 0x3b5   : > { %v4136_v19 = vadd.f32 %v6563_v15, %v4135_v26 }
 0x3b7   : > { %4172 = vst [vmem:[%s6567_s11 + $0xe8] sm:$0xff] %v4136_v19 }
 0x3bc   : > { %v4138_v2 = vpop.f32.mrf.mxu1 }
 0x3bd   : > { %v4139_v32 = vadd.f32 %v6563_v15, %v4138_v2 }
 0x3bf   : > { %4173 = vst [vmem:[%s6567_s11 + $0xf0] sm:$0xff] %v4139_v32 }
 0x3c4   : > { %v4140_v50 = vpop.f32.mrf.mxu1 }
 0x3c5   : > { %v4141_v29 = vadd.f32 %v6563_v15, %v4140_v50 }
 0x3c7   : > { %4174 = vst [vmem:[%s6567_s11 + $0xf8] sm:$0xff] %v4141_v29 }
 0x3c8   : > { %5652 = shalt.err (!%p5649_p5)
}
 0x3c9   : > { %s5705_s17 = smov 128   ;;  %s5706_s11 = smov 8  }
 0x3ca   : > { %5565 = dma.vmem_to_hbm [thread:$0]  (%p5782_p4), %s4192_s20, 4096, %s4194_s13, %s4176_s18, %s5705_s17, %s5705_s17, %s5706_s11  }
 0x3cb PF: > { %p5572_p6 = scmp.ge.s32.totalorder %s5703_s26, 2  ;;  %s4208_s14 = sand.u32 1, %s5683_s21  }
 0x3cc   : > { %s4209_s15 = scalar_lea.sflag [#allocation5], %s4208_s14 }
 0x3cd   : > { %p5568_p7 = pnand %p5572_p6, %p5789_p8 }
 0x3cf   : > { %p5569_p9 = pneg %p5568_p7 }
 0x3d1   : > { %5678 = dma.done.wait (%p5569_p9), %s4209_s15, 4096  }
 0x3d2   : > { %5680 = vsyncadd (%p5569_p9), %s4209_s15, 4294963200  ;;  %s19_s26 = sadd.s32 1, %s5703_s26   ;;  %s6714_s21 = smov %s5687_s22 }
 0x3d3   : > { %p16_p10 = scmp.ge.s32.totalorder %s19_s26, 4   ;;  %s6715_s22 = smov %s5691_s23 }
 0x3d4   : > { %s6716_s23 = smov %s5795_s10  ;;  %s6717_s24 = smov %s5699_s25 }
 0x3d5   : > { %s6718_s25 = smov %s6720_s29  ;;  %18 = sbr.rel (!%p16_p10) target bundleno = 4 (0x4), region = 87 }
 0x3da   :  { %4215 = vsyncpa [#allocation5], 1 }
 0x3db   :  { %4217 = vsyncpa [#allocation5 + $0x1], 1 }

</bundles_post_ra>
